<compile_context>
chip_gen: v6e
topology: v6e:2x2x1
jax: 0.10.0
libtpu: 0.0.40
codegen_flags: <defaults>
</compile_context>

<pallas_src>
import functools

import jax
import jax.numpy as jnp
from jax import lax
from jax.experimental import pallas as pl
from jax.experimental.pallas import tpu as pltpu

F32 = jnp.float32
BF16 = jnp.bfloat16
NEG_BIG = -1e30          # "minus infinity" that is top_k / exp safe
POS_BIG = 1e30           # padded candidate-norm value -> sim ~ -1e30
ALIGN = 16               # bf16-safe sublane alignment for row tiles / padding


# ---------------------------------------------------------------------------
# per-generation tiling parameters
# ---------------------------------------------------------------------------
def _detect_limits():
    try:
        cap = int(getattr(pltpu.get_tpu_info(), "vmem_capacity_bytes"))
    except Exception:
        cap = 0
    if cap >= 100 * 1024 * 1024:           # v5e / v6e: 128 MiB VMEM per TC
        return 100 * 1024 * 1024, 16 * 1024 * 1024, 2048
    return 48 * 1024 * 1024, 8 * 1024 * 1024, 1024   # v7x (64 MiB) / unknown


_VMEM_LIMIT, _TILE_BUDGET, _MAX_TILE = _detect_limits()


# ---------------------------------------------------------------------------
# small helpers
# ---------------------------------------------------------------------------
def _round_up(x, m):
    return (x + m - 1) // m * m


def _pick_row_tile(n_rows, per_row_bytes, max_tile=None):
    """Largest ALIGN-multiple row tile fitting the double-buffer budget,
    additionally capped so a parallel grid axis gets >= 2 steps (v7x 2 TCs)."""
    max_tile = _MAX_TILE if max_tile is None else max_tile
    cap = max(ALIGN, min(max_tile,
                         (_TILE_BUDGET // (2 * max(per_row_bytes, 1)))
                         // ALIGN * ALIGN))
    if n_rows > ALIGN:
        cap = min(cap, max(ALIGN, _round_up(pl.cdiv(n_rows, 2), ALIGN)))
    if n_rows <= cap:
        return max(ALIGN, _round_up(n_rows, ALIGN))
    return cap


def _pad_rows(a, n_rows, value=0.0):
    pad = n_rows - a.shape[0]
    if pad == 0:
        return a
    cfg = ((0, pad),) + ((0, 0),) * (a.ndim - 1)
    return jnp.pad(a, cfg, constant_values=value)


def _const_spec(arr):
    """Full-array block + constant index map -> weight stays VMEM-resident."""
    nd = arr.ndim
    return pl.BlockSpec(arr.shape, lambda *_, _nd=nd: (0,) * _nd)


def _layernorm(x, g, b, eps=1e-5):
    mu = jnp.mean(x, axis=-1, keepdims=True)
    var = jnp.mean((x - mu) ** 2, axis=-1, keepdims=True)
    return (x - mu) * lax.rsqrt(var + eps) * g + b


def _bdot(a, w):
    # bf16 MXU operands (weight already bf16), f32 accumulation.
    return jnp.dot(a.astype(BF16), w, preferred_element_type=F32)


# reference-only helpers (same bf16-at-MXU policy)
def _mm(a, b):
    return jnp.dot(a.astype(BF16), b.astype(BF16), preferred_element_type=F32)


def _mm_nd(a, b):
    return lax.dot_general(a.astype(BF16), b.astype(BF16),
                           (((a.ndim - 1,), (0,)), ((), ())),
                           preferred_element_type=F32)


# ---------------------------------------------------------------------------
# Kernel 1: encoder over [x; candidate_x]   rows -> (x_enc, k)   (bf16 outputs)
# ---------------------------------------------------------------------------
def encode_kernel(x_ref, wlin_ref, wa_ref, wb_ref, wk_ref, vmain_ref, vblock_ref,
                  xout_ref, kout_ref):
    V = vmain_ref[...]                       # (8, d_main) f32
    blin, b0b, ln1g, ln1b = V[0:1], V[1:2], V[2:3], V[3:4]
    b1b, lnmg, lnmb, bk = V[4:5], V[5:6], V[6:7], V[7:8]
    Vb = vblock_ref[...]                     # (2, d_block) f32
    b0a, b1a = Vb[0:1], Vb[1:2]
    w0a, w1a = wa_ref[0], wa_ref[1]          # (d_main, d_block) bf16
    w0b, w1b = wb_ref[0], wb_ref[1]          # (d_block, d_main) bf16

    x = x_ref[...]
    h = _bdot(x, wlin_ref[...]) + blin
    # encoder block 0 (no prenorm): Linear -> ReLU -> (Dropout=id) -> Linear
    t = jnp.maximum(_bdot(h, w0a) + b0a, 0.0)
    h = h + _bdot(t, w0b) + b0b
    # encoder block 1 (prenorm LayerNorm)
    z = _layernorm(h, ln1g, ln1b)
    t = jnp.maximum(_bdot(z, w1a) + b1a, 0.0)
    h = h + _bdot(t, w1b) + b1b
    # mixer normalization + K projection
    zk = _layernorm(h, lnmg, lnmb)
    k = _bdot(zk, wk_ref[...]) + bk
    xout_ref[...] = h.astype(BF16)
    kout_ref[...] = k.astype(BF16)


# ---------------------------------------------------------------------------
# Kernel 2: similarity tiles  sim[b, n] = 2 k.c - ||k||^2 - ||c||^2
# (||k||^2 recomputed per tile; padded ||c||^2 slots carry +1e30 -> no mask)
# ---------------------------------------------------------------------------
def sim_kernel(k_ref, ck_ref, c2_ref, sim_ref):
    k = k_ref[...]                                         # (TQ, D) bf16
    kf = k.astype(F32)
    k2 = jnp.sum(kf * kf, axis=-1, keepdims=True)          # (TQ, 1) f32
    cross = lax.dot_general(2 * k, ck_ref[...],            # fold the 2.0 here
                            (((1,), (1,)), ((), ())),
                            preferred_element_type=F32)    # (TQ, TN)
    sim_ref[...] = cross - k2 - c2_ref[...]


# ---------------------------------------------------------------------------
# Kernel 3: context aggregation + predictor blocks + head (lane-dense output)
# ---------------------------------------------------------------------------
def predict_kernel(xe_ref, k_ref, ck_ref, cy_ref, sim_ref,
                   wa_ref, wb_ref, whb_ref, vmain_ref, vblock_ref,
                   out_ref):
    TB, C, D = ck_ref.shape                  # C padded to a multiple of 16
    V = vmain_ref[...]                       # (8, d_main) f32
    p0lng, p0lnb, p0bb = V[0:1], V[1:2], V[2:3]
    p1lng, p1lnb, p1bb = V[3:4], V[4:5], V[5:6]
    lnhg, lnhb = V[6:7], V[7:8]
    Vb = vblock_ref[...]                     # (3, d_block) f32
    bt1, p0ba, p1ba = Vb[0:1], Vb[1:2], Vb[2:3]
    wt1, p0wa, p1wa = wa_ref[0], wa_ref[1], wa_ref[2]      # bf16
    wt2, p0wb, p1wb = wb_ref[0], wb_ref[1], wb_ref[2]      # bf16
    whb = whb_ref[...]                       # (d_main + 1, 128) f32
    wh = whb[:-1].astype(BF16)
    bh = whb[-1:]

    # softmax over context similarities (padded slots carry NEG_BIG -> prob 0)
    sim = sim_ref[...]
    m = jnp.max(sim, axis=-1, keepdims=True)
    e = jnp.exp(sim - m)
    probs = e * pl.reciprocal(jnp.sum(e, axis=-1, keepdims=True), approx=True)

    # T MLP on (k - context_k); operands already bf16
    diff = k_ref[...][:, None, :] - ck_ref[...]            # (TB, C, D) bf16
    diff2 = diff.reshape(TB * C, D)
    t = jnp.maximum(jnp.dot(diff2, wt1, preferred_element_type=F32) + bt1, 0.0)
    t = jnp.dot(t.astype(BF16), wt2, preferred_element_type=F32)   # no bias
    values = cy_ref[...].astype(F32) + t.reshape(TB, C, D)

    # weighted context sum (f32)
    ctx = jnp.sum(probs[:, :, None] * values, axis=1)      # (TB, D)
    x = xe_ref[...].astype(F32) + ctx

    # predictor block 0 (prenorm)
    z = _layernorm(x, p0lng, p0lnb)
    h = jnp.maximum(_bdot(z, p0wa) + p0ba, 0.0)
    x = x + _bdot(h, p0wb) + p0bb
    # predictor block 1 (prenorm)
    z = _layernorm(x, p1lng, p1lnb)
    h = jnp.maximum(_bdot(z, p1wa) + p1ba, 0.0)
    x = x + _bdot(h, p1wb) + p1bb

    # head: LayerNorm -> ReLU -> Linear   (lane-dense 128-wide store)
    z = jnp.maximum(_layernorm(x, lnhg, lnhb), 0.0)
    out_ref[...] = _bdot(z, wh) + bh


# ---------------------------------------------------------------------------
# pallas_call wrappers
# ---------------------------------------------------------------------------
def encode_all(allx, pk):
    R, d_in = allx.shape
    d_main = pk["wlin"].shape[1]
    d_block = pk["enc_wa"].shape[2]

    per_row = 4 * d_in + 2 * 2 * d_main
    TR = _pick_row_tile(R, per_row)
    R_pad = _round_up(R, TR)
    xp = _pad_rows(allx, R_pad)

    weights = [pk["wlin"], pk["enc_wa"], pk["enc_wb"], pk["wk"],
               pk["enc_vmain"], pk["enc_vblock"]]
    wbytes = sum(int(w.size) * w.dtype.itemsize for w in weights)
    flops = 2 * R_pad * (d_in * d_main
                         + 2 * (d_main * d_block + d_block * d_main)
                         + d_main * d_main)

    return pl.pallas_call(
        encode_kernel,
        grid=(R_pad // TR,),
        in_specs=[pl.BlockSpec((TR, d_in), lambda i: (i, 0))]
                 + [_const_spec(w) for w in weights],
        out_specs=(pl.BlockSpec((TR, d_main), lambda i: (i, 0)),
                   pl.BlockSpec((TR, d_main), lambda i: (i, 0))),
        out_shape=(jax.ShapeDtypeStruct((R_pad, d_main), BF16),
                   jax.ShapeDtypeStruct((R_pad, d_main), BF16)),
        compiler_params=pltpu.CompilerParams(
            dimension_semantics=("parallel",),
            vmem_limit_bytes=_VMEM_LIMIT),
        cost_estimate=pl.CostEstimate(
            flops=int(flops),
            transcendentals=int(3 * R_pad),
            bytes_accessed=int(4 * R_pad * d_in + 4 * R_pad * d_main + wbytes)),
    )(xp, *weights)


def similarities(k, ck):
    B, d_main = k.shape
    N = ck.shape[0]

    # TN chosen to minimise candidate padding; TQ from the row-tile picker.
    TN = min(((_round_up(N, c) - N, -c, c) for c in (128, 256, 512)))[2]
    N_pad = _round_up(N, TN)
    TQ = _pick_row_tile(B, 2 * d_main + 4 * TN, max_tile=256)
    B_pad = _round_up(B, TQ)

    kp = _pad_rows(k, B_pad)
    ckp = _pad_rows(ck, N_pad)
    c2 = jnp.sum(jnp.square(ck.astype(F32)), axis=-1)          # (N,) tiny jnp op
    c2row = jnp.pad(c2, (0, N_pad - N),
                    constant_values=POS_BIG).reshape(1, N_pad)

    sim = pl.pallas_call(
        sim_kernel,
        grid=(B_pad // TQ, N_pad // TN),
        in_specs=[pl.BlockSpec((TQ, d_main), lambda i, j: (i, 0)),
                  pl.BlockSpec((TN, d_main), lambda i, j: (j, 0)),
                  pl.BlockSpec((1, TN), lambda i, j: (0, j))],
        out_specs=pl.BlockSpec((TQ, TN), lambda i, j: (i, j)),
        out_shape=jax.ShapeDtypeStruct((B_pad, N_pad), F32),
        compiler_params=pltpu.CompilerParams(
            dimension_semantics=("parallel", "parallel"),
            vmem_limit_bytes=_VMEM_LIMIT),
        cost_estimate=pl.CostEstimate(
            flops=int(2 * B_pad * N_pad * d_main + 2 * B_pad * N_pad
                      + 2 * B_pad * d_main),
            transcendentals=0,
            bytes_accessed=int(2 * (B_pad + N_pad) * d_main + 4 * N_pad
                               + 4 * B_pad * N_pad)),
    )(kp, ckp, c2row)
    return sim[:B, :N]


def predict(x_enc, k, context_k, context_y_emb, context_sim, pk):
    B, d_main = x_enc.shape
    C = context_k.shape[1]
    d_block = pk["pred_wa"].shape[2]
    out_pad = pk["whb"].shape[1]

    # pad context dim to a multiple of 16 so the bf16 (B*C, D) reshape stays
    # tile aligned; padded slots get NEG_BIG sim -> softmax weight 0.
    C_pad = _round_up(C, ALIGN)
    if C_pad != C:
        context_k = jnp.pad(context_k, ((0, 0), (0, C_pad - C), (0, 0)))
        context_y_emb = jnp.pad(context_y_emb, ((0, 0), (0, C_pad - C), (0, 0)))
        context_sim = jnp.pad(context_sim, ((0, 0), (0, C_pad - C)),
                              constant_values=NEG_BIG)

    per_row = 2 * 2 * d_main + 2 * 2 * C_pad * d_main + 4 * C_pad + 4 * out_pad
    TB = _pick_row_tile(B, per_row, max_tile=128)
    B_pad = _round_up(B, TB)
    x_enc = _pad_rows(x_enc, B_pad)
    k = _pad_rows(k, B_pad)
    context_k = _pad_rows(context_k, B_pad)
    context_y_emb = _pad_rows(context_y_emb, B_pad)
    context_sim = _pad_rows(context_sim, B_pad)

    weights = [pk["pred_wa"], pk["pred_wb"], pk["whb"],
               pk["pred_vmain"], pk["pred_vblock"]]
    wbytes = sum(int(w.size) * w.dtype.itemsize for w in weights)
    flops = (2 * B_pad * C_pad * 2 * d_main * d_block
             + 2 * B_pad * (2 * (d_main * d_block + d_block * d_main)
                            + d_main * out_pad))

    out = pl.pallas_call(
        predict_kernel,
        grid=(B_pad // TB,),
        in_specs=[pl.BlockSpec((TB, d_main), lambda i: (i, 0)),
                  pl.BlockSpec((TB, d_main), lambda i: (i, 0)),
                  pl.BlockSpec((TB, C_pad, d_main), lambda i: (i, 0, 0)),
                  pl.BlockSpec((TB, C_pad, d_main), lambda i: (i, 0, 0)),
                  pl.BlockSpec((TB, C_pad), lambda i: (i, 0))]
                 + [_const_spec(w) for w in weights],
        out_specs=pl.BlockSpec((TB, out_pad), lambda i: (i, 0)),
        out_shape=jax.ShapeDtypeStruct((B_pad, out_pad), F32),
        compiler_params=pltpu.CompilerParams(
            dimension_semantics=("parallel",),
            vmem_limit_bytes=_VMEM_LIMIT),
        cost_estimate=pl.CostEstimate(
            flops=int(flops),
            transcendentals=int(B_pad * (C_pad + 6)),
            bytes_accessed=int(2 * B_pad * 2 * d_main
                               + 2 * B_pad * C_pad * 2 * d_main
                               + 4 * B_pad * C_pad
                               + 4 * B_pad * out_pad + wbytes)),
    )(x_enc, k, context_k, context_y_emb, context_sim, *weights)
    return out[:B]


# ---------------------------------------------------------------------------
# Full TabR forward (eval mode)
# ---------------------------------------------------------------------------
@functools.partial(jax.jit, static_argnames=("context_size", "output_dim"))
def tabr_forward(x, candidate_x, candidate_y, pk, *, context_size, output_dim):
    B = x.shape[0]
    N = candidate_x.shape[0]

    # single encode pass over [x; candidate_x] — weights read once, large MXU M
    allx = jnp.concatenate([x, candidate_x], axis=0)
    x_all, k_all = encode_all(allx, pk)
    x_enc, k = x_all[:B], k_all[:B]
    candidate_k = k_all[B:B + N]

    # nearest-neighbour search (stand-in for faiss IndexFlatL2)
    # TODO(synk): fuse a streaming top-k into the similarity pass (v5e win).
    sim_full = similarities(k, candidate_k)                 # (B, N)
    context_sim, context_idx = lax.top_k(sim_full, context_size)

    # data-dependent gathers (JAX glue, bf16 context tensors)
    context_k = jnp.take(candidate_k, context_idx, axis=0)          # (B, C, D)
    context_y = jnp.take(candidate_y, context_idx, axis=0)          # (B, C)
    context_y_emb = jnp.take(pk["emb"], context_y, axis=0)          # (B, C, D)

    out = predict(x_enc, k, context_k, context_y_emb, context_sim, pk)
    return out[:, :output_dim]


# ---------------------------------------------------------------------------
# pure-JAX reference (mirrors the kernel's bf16 storage / bf16 MXU policy)
# ---------------------------------------------------------------------------
def tabr_reference(x, candidate_x, candidate_y, p, *, context_size):
    def enc(xx):
        h = _mm(xx, p["wlin"]) + p["blin"]
        t = jnp.maximum(_mm(h, p["w0a"]) + p["b0a"], 0.0)
        h = h + _mm(t, p["w0b"]) + p["b0b"]
        z = _layernorm(h, p["ln1g"], p["ln1b"])
        t = jnp.maximum(_mm(z, p["w1a"]) + p["b1a"], 0.0)
        h = h + _mm(t, p["w1b"]) + p["b1b"]
        kk = _mm(_layernorm(h, p["lnmg"], p["lnmb"]), p["wk"]) + p["bk"]
        return h.astype(BF16), kk.astype(BF16)   # mirror bf16 HBM storage

    _, ck = enc(candidate_x)
    xe, k = enc(x)
    cross = lax.dot_general(2 * k, ck, (((1,), (1,)), ((), ())),
                            preferred_element_type=F32)
    kf, ckf = k.astype(F32), ck.astype(F32)
    sim_full = (cross - jnp.sum(kf * kf, -1, keepdims=True)
                - jnp.sum(ckf * ckf, -1)[None, :])
    sim, idx = lax.top_k(sim_full, context_size)
    c_k = jnp.take(ck, idx, axis=0)                                  # bf16
    c_y_emb = jnp.take(p["emb"].astype(BF16),
                       jnp.take(candidate_y, idx, axis=0), axis=0)   # bf16
    probs = jax.nn.softmax(sim, axis=-1)
    diff = k[:, None, :] - c_k
    t = jnp.maximum(_mm_nd(diff, p["wt1"]) + p["bt1"], 0.0)
    t = _mm_nd(t, p["wt2"])
    values = c_y_emb.astype(F32) + t
    xx = xe.astype(F32) + jnp.sum(probs[:, :, None] * values, axis=1)
    for pre in ("p0", "p1"):
        z = _layernorm(xx, p[pre + "lng"], p[pre + "lnb"])
        h = jnp.maximum(_mm(z, p[pre + "wa"]) + p[pre + "ba"], 0.0)
        xx = xx + _mm(h, p[pre + "wb"]) + p[pre + "bb"]
    z = jnp.maximum(_layernorm(xx, p["lnhg"], p["lnhb"]), 0.0)
    return _mm(z, p["wh"]) + p["bh"]


# ---------------------------------------------------------------------------
# deterministic parameter init (matmul weights bf16, everything else f32)
# ---------------------------------------------------------------------------
def init_params(key, d_in, d_main, d_block, output_dim):
    keys = iter(jax.random.split(key, 64))

    def lin(fan_in, fan_out):
        b = 1.0 / jnp.sqrt(jnp.float32(fan_in))
        w = jax.random.uniform(next(keys), (fan_in, fan_out), F32, -b, b)
        bb = jax.random.uniform(next(keys), (1, fan_out), F32, -b, b)
        return w.astype(BF16), bb

    p = {}
    p["wlin"], p["blin"] = lin(d_in, d_main)
    p["w0a"], p["b0a"] = lin(d_main, d_block)
    p["w0b"], p["b0b"] = lin(d_block, d_main)
    p["ln1g"], p["ln1b"] = jnp.ones((1, d_main)), jnp.zeros((1, d_main))
    p["w1a"], p["b1a"] = lin(d_main, d_block)
    p["w1b"], p["b1b"] = lin(d_block, d_main)
    p["lnmg"], p["lnmb"] = jnp.ones((1, d_main)), jnp.zeros((1, d_main))
    p["wk"], p["bk"] = lin(d_main, d_main)
    # label encoder: nn.Embedding(output_dim, d_main), uniform(-1, 1)
    p["emb"] = jax.random.uniform(next(keys), (output_dim, d_main), F32, -1.0, 1.0)
    # T: Linear(d_main, d_block) -> ReLU -> Linear(d_block, d_main, bias=False)
    p["wt1"], p["bt1"] = lin(d_main, d_block)
    p["wt2"], _ = lin(d_block, d_main)
    # predictor blocks (prenorm)
    for pre in ("p0", "p1"):
        p[pre + "lng"], p[pre + "lnb"] = jnp.ones((1, d_main)), jnp.zeros((1, d_main))
        p[pre + "wa"], p[pre + "ba"] = lin(d_main, d_block)
        p[pre + "wb"], p[pre + "bb"] = lin(d_block, d_main)
    # head
    p["lnhg"], p["lnhb"] = jnp.ones((1, d_main)), jnp.zeros((1, d_main))
    p["wh"], p["bh"] = lin(d_main, output_dim)
    return p


def pack_params(p, output_dim):
    """Pack the many tiny per-layer params into a few kernel-side arrays and
    pad the head weights to a lane-dense width of 128."""
    d_main = p["wlin"].shape[1]
    out_pad = max(128, _round_up(output_dim, 128))
    wh_p = jnp.zeros((d_main, out_pad), F32).at[:, :output_dim].set(
        p["wh"].astype(F32))
    bh_p = jnp.zeros((1, out_pad), F32).at[:, :output_dim].set(p["bh"])
    return {
        # encoder
        "wlin": p["wlin"],
        "wk": p["wk"],
        "enc_wa": jnp.stack([p["w0a"], p["w1a"]]),
        "enc_wb": jnp.stack([p["w0b"], p["w1b"]]),
        "enc_vmain": jnp.concatenate(
            [p["blin"], p["b0b"], p["ln1g"], p["ln1b"],
             p["b1b"], p["lnmg"], p["lnmb"], p["bk"]], axis=0),
        "enc_vblock": jnp.concatenate([p["b0a"], p["b1a"]], axis=0),
        # predictor + head
        "pred_wa": jnp.stack([p["wt1"], p["p0wa"], p["p1wa"]]),
        "pred_wb": jnp.stack([p["wt2"], p["p0wb"], p["p1wb"]]),
        "whb": jnp.concatenate([wh_p, bh_p], axis=0),
        "pred_vmain": jnp.concatenate(
            [p["p0lng"], p["p0lnb"], p["p0bb"],
             p["p1lng"], p["p1lnb"], p["p1bb"],
             p["lnhg"], p["lnhb"]], axis=0),
        "pred_vblock": jnp.concatenate([p["bt1"], p["p0ba"], p["p1ba"]], axis=0),
        # label embedding (feeds bf16 context values)
        "emb": p["emb"].astype(BF16),
    }


if __name__ == "__main__":
    # small shapes consistent with the module (all-numerical features)
    B, N_CAND, DIM_INPUT = 8, 64, 8
    D_MAIN, D_BLOCK, OUTPUT_DIM, CONTEXT_SIZE = 32, 64, 4, 8

    root = jax.random.PRNGKey(0)
    k_x, k_cx, k_cy, k_p = jax.random.split(root, 4)
    x = jax.random.normal(k_x, (B, DIM_INPUT), F32)
    candidate_x = jax.random.normal(k_cx, (N_CAND, DIM_INPUT), F32)
    candidate_y = jax.random.randint(k_cy, (N_CAND,), 0, OUTPUT_DIM, jnp.int32)
    params = init_params(k_p, DIM_INPUT, D_MAIN, D_BLOCK, OUTPUT_DIM)
    packed = pack_params(params, OUTPUT_DIM)

    out = tabr_forward(x, candidate_x, candidate_y, packed,
                       context_size=CONTEXT_SIZE, output_dim=OUTPUT_DIM)
    out = jax.block_until_ready(out)
    assert out.shape == (B, OUTPUT_DIM)

    ref = tabr_reference(x, candidate_x, candidate_y, params,
                         context_size=CONTEXT_SIZE)
    # tolerance covers the approx-reciprocal softmax denominator in the kernel
    assert jnp.allclose(out, ref, atol=1e-2, rtol=1e-2), (out, ref)

    print("KERNEL_OK")
</pallas_src>

<mosaic_0001>
module attributes {stable_mosaic.version = 11 : i64} {
  func.func @encode_kernel(%arg0: i32, %arg1: memref<48x8xf32, #tpu.memory_space<vmem>>, %arg2: memref<8x32xbf16, #tpu.memory_space<vmem>>, %arg3: memref<2x32x64xbf16, #tpu.memory_space<vmem>>, %arg4: memref<2x64x32xbf16, #tpu.memory_space<vmem>>, %arg5: memref<32x32xbf16, #tpu.memory_space<vmem>>, %arg6: memref<8x32xf32, #tpu.memory_space<vmem>>, %arg7: memref<2x64xf32, #tpu.memory_space<vmem>>, %arg8: memref<48x32xbf16, #tpu.memory_space<vmem>>, %arg9: memref<48x32xbf16, #tpu.memory_space<vmem>>) attributes {dimension_semantics = [#tpu.dimension_semantics<parallel>], iteration_bounds = array<i64: 2>, scalar_prefetch = 0 : i64, scratch_operands = 0 : i64, tpu.core_type = #tpu.core_type<tc>, window_params = [{transform_indices = @transform_0, window_bounds = array<i64: 48, 8>}, {pipeline_mode = #tpu.pipeline_mode<synchronous>, transform_indices = @transform_1, window_bounds = array<i64: 8, 32>}, {pipeline_mode = #tpu.pipeline_mode<synchronous>, transform_indices = @transform_2, window_bounds = array<i64: 2, 32, 64>}, {pipeline_mode = #tpu.pipeline_mode<synchronous>, transform_indices = @transform_3, window_bounds = array<i64: 2, 64, 32>}, {pipeline_mode = #tpu.pipeline_mode<synchronous>, transform_indices = @transform_4, window_bounds = array<i64: 32, 32>}, {pipeline_mode = #tpu.pipeline_mode<synchronous>, transform_indices = @transform_5, window_bounds = array<i64: 8, 32>}, {pipeline_mode = #tpu.pipeline_mode<synchronous>, transform_indices = @transform_6, window_bounds = array<i64: 2, 64>}, {transform_indices = @transform_7, window_bounds = array<i64: 48, 32>}, {transform_indices = @transform_8, window_bounds = array<i64: 48, 32>}]} {
    %c0 = arith.constant 0 : index
    %c0_0 = arith.constant 0 : index
    %0 = vector.load %arg6[%c0, %c0_0] : memref<8x32xf32, #tpu.memory_space<vmem>>, vector<8x32xf32>
    %1 = vector.extract_strided_slice %0 {offsets = [0, 0], sizes = [1, 32], strides = [1, 1]} : vector<8x32xf32> to vector<1x32xf32>
    %2 = vector.extract_strided_slice %0 {offsets = [1, 0], sizes = [1, 32], strides = [1, 1]} : vector<8x32xf32> to vector<1x32xf32>
    %3 = vector.extract_strided_slice %0 {offsets = [2, 0], sizes = [1, 32], strides = [1, 1]} : vector<8x32xf32> to vector<1x32xf32>
    %4 = vector.extract_strided_slice %0 {offsets = [3, 0], sizes = [1, 32], strides = [1, 1]} : vector<8x32xf32> to vector<1x32xf32>
    %5 = vector.extract_strided_slice %0 {offsets = [4, 0], sizes = [1, 32], strides = [1, 1]} : vector<8x32xf32> to vector<1x32xf32>
    %6 = vector.extract_strided_slice %0 {offsets = [5, 0], sizes = [1, 32], strides = [1, 1]} : vector<8x32xf32> to vector<1x32xf32>
    %7 = vector.extract_strided_slice %0 {offsets = [6, 0], sizes = [1, 32], strides = [1, 1]} : vector<8x32xf32> to vector<1x32xf32>
    %8 = vector.extract_strided_slice %0 {offsets = [7, 0], sizes = [1, 32], strides = [1, 1]} : vector<8x32xf32> to vector<1x32xf32>
    %c0_1 = arith.constant 0 : index
    %c0_2 = arith.constant 0 : index
    %9 = vector.load %arg7[%c0_1, %c0_2] : memref<2x64xf32, #tpu.memory_space<vmem>>, vector<2x64xf32>
    %10 = vector.extract_strided_slice %9 {offsets = [0, 0], sizes = [1, 64], strides = [1, 1]} : vector<2x64xf32> to vector<1x64xf32>
    %11 = vector.extract_strided_slice %9 {offsets = [1, 0], sizes = [1, 64], strides = [1, 1]} : vector<2x64xf32> to vector<1x64xf32>
    %c0_3 = arith.constant 0 : index
    %c0_4 = arith.constant 0 : index
    %c0_5 = arith.constant 0 : index
    %12 = vector.load %arg3[%c0_3, %c0_4, %c0_5] : memref<2x32x64xbf16, #tpu.memory_space<vmem>>, vector<1x32x64xbf16>
    %13 = vector.shape_cast %12 : vector<1x32x64xbf16> to vector<32x64xbf16>
    %c1 = arith.constant 1 : index
    %c0_6 = arith.constant 0 : index
    %c0_7 = arith.constant 0 : index
    %14 = vector.load %arg3[%c1, %c0_6, %c0_7] : memref<2x32x64xbf16, #tpu.memory_space<vmem>>, vector<1x32x64xbf16>
    %15 = vector.shape_cast %14 : vector<1x32x64xbf16> to vector<32x64xbf16>
    %c0_8 = arith.constant 0 : index
    %c0_9 = arith.constant 0 : index
    %c0_10 = arith.constant 0 : index
    %16 = vector.load %arg4[%c0_8, %c0_9, %c0_10] : memref<2x64x32xbf16, #tpu.memory_space<vmem>>, vector<1x64x32xbf16>
    %17 = vector.shape_cast %16 : vector<1x64x32xbf16> to vector<64x32xbf16>
    %c1_11 = arith.constant 1 : index
    %c0_12 = arith.constant 0 : index
    %c0_13 = arith.constant 0 : index
    %18 = vector.load %arg4[%c1_11, %c0_12, %c0_13] : memref<2x64x32xbf16, #tpu.memory_space<vmem>>, vector<1x64x32xbf16>
    %19 = vector.shape_cast %18 : vector<1x64x32xbf16> to vector<64x32xbf16>
    %c0_14 = arith.constant 0 : index
    %c0_15 = arith.constant 0 : index
    %20 = vector.load %arg1[%c0_14, %c0_15] : memref<48x8xf32, #tpu.memory_space<vmem>>, vector<48x8xf32>
    %c0_16 = arith.constant 0 : index
    %c0_17 = arith.constant 0 : index
    %21 = vector.load %arg2[%c0_16, %c0_17] : memref<8x32xbf16, #tpu.memory_space<vmem>>, vector<8x32xbf16>
    %22 = arith.truncf %20 : vector<48x8xf32> to vector<48x8xbf16>
    %cst = arith.constant dense<0.000000e+00> : vector<48x32xf32>
    %23 = tpu.matmul %22, %21, %cst {dimension_numbers = #tpu.dot_dimension_numbers<[1], [0], [0], [1], [0, 0, 1, 1], [], []>} : vector<48x8xbf16>, vector<8x32xbf16>, vector<48x32xf32> -> vector<48x32xf32>
    %24 = vector.broadcast %1 : vector<1x32xf32> to vector<48x32xf32>
    %25 = arith.addf %23, %24 : vector<48x32xf32>
    %26 = arith.truncf %25 : vector<48x32xf32> to vector<48x32xbf16>
    %cst_18 = arith.constant dense<0.000000e+00> : vector<48x64xf32>
    %27 = tpu.matmul %26, %13, %cst_18 {dimension_numbers = #tpu.dot_dimension_numbers<[1], [0], [0], [1], [0, 0, 1, 1], [], []>} : vector<48x32xbf16>, vector<32x64xbf16>, vector<48x64xf32> -> vector<48x64xf32>
    %28 = vector.broadcast %10 : vector<1x64xf32> to vector<48x64xf32>
    %29 = arith.addf %27, %28 : vector<48x64xf32>
    %cst_19 = arith.constant 0.000000e+00 : f32
    %30 = vector.broadcast %cst_19 : f32 to vector<48x64xf32>
    %31 = arith.maximumf %29, %30 : vector<48x64xf32>
    %32 = arith.truncf %31 : vector<48x64xf32> to vector<48x64xbf16>
    %cst_20 = arith.constant dense<0.000000e+00> : vector<48x32xf32>
    %33 = tpu.matmul %32, %17, %cst_20 {dimension_numbers = #tpu.dot_dimension_numbers<[1], [0], [0], [1], [0, 0, 1, 1], [], []>} : vector<48x64xbf16>, vector<64x32xbf16>, vector<48x32xf32> -> vector<48x32xf32>
    %34 = arith.addf %25, %33 : vector<48x32xf32>
    %35 = vector.broadcast %2 : vector<1x32xf32> to vector<48x32xf32>
    %36 = arith.addf %34, %35 : vector<48x32xf32>
    %cst_21 = arith.constant dense<0.000000e+00> : vector<48xf32>
    %37 = vector.multi_reduction <add>, %36, %cst_21 [1] : vector<48x32xf32> to vector<48xf32>
    %38 = vector.shape_cast %37 : vector<48xf32> to vector<48x1xf32>
    %cst_22 = arith.constant 3.200000e+01 : f32
    %39 = vector.broadcast %cst_22 : f32 to vector<48x1xf32>
    %40 = arith.divf %38, %39 : vector<48x1xf32>
    %41 = vector.broadcast %40 : vector<48x1xf32> to vector<48x32xf32>
    %42 = arith.subf %36, %41 : vector<48x32xf32>
    %43 = arith.mulf %42, %42 : vector<48x32xf32>
    %cst_23 = arith.constant dense<0.000000e+00> : vector<48xf32>
    %44 = vector.multi_reduction <add>, %43, %cst_23 [1] : vector<48x32xf32> to vector<48xf32>
    %45 = vector.shape_cast %44 : vector<48xf32> to vector<48x1xf32>
    %cst_24 = arith.constant 3.200000e+01 : f32
    %46 = vector.broadcast %cst_24 : f32 to vector<48x1xf32>
    %47 = arith.divf %45, %46 : vector<48x1xf32>
    %48 = vector.broadcast %40 : vector<48x1xf32> to vector<48x32xf32>
    %49 = arith.subf %36, %48 : vector<48x32xf32>
    %cst_25 = arith.constant 9.99999974E-6 : f32
    %50 = vector.broadcast %cst_25 : f32 to vector<48x1xf32>
    %51 = arith.addf %47, %50 : vector<48x1xf32>
    %52 = math.rsqrt %51 : vector<48x1xf32>
    %53 = vector.broadcast %52 : vector<48x1xf32> to vector<48x32xf32>
    %54 = arith.mulf %49, %53 : vector<48x32xf32>
    %55 = vector.broadcast %3 : vector<1x32xf32> to vector<48x32xf32>
    %56 = arith.mulf %54, %55 : vector<48x32xf32>
    %57 = vector.broadcast %4 : vector<1x32xf32> to vector<48x32xf32>
    %58 = arith.addf %56, %57 : vector<48x32xf32>
    %59 = arith.truncf %58 : vector<48x32xf32> to vector<48x32xbf16>
    %cst_26 = arith.constant dense<0.000000e+00> : vector<48x64xf32>
    %60 = tpu.matmul %59, %15, %cst_26 {dimension_numbers = #tpu.dot_dimension_numbers<[1], [0], [0], [1], [0, 0, 1, 1], [], []>} : vector<48x32xbf16>, vector<32x64xbf16>, vector<48x64xf32> -> vector<48x64xf32>
    %61 = vector.broadcast %11 : vector<1x64xf32> to vector<48x64xf32>
    %62 = arith.addf %60, %61 : vector<48x64xf32>
    %cst_27 = arith.constant 0.000000e+00 : f32
    %63 = vector.broadcast %cst_27 : f32 to vector<48x64xf32>
    %64 = arith.maximumf %62, %63 : vector<48x64xf32>
    %65 = arith.truncf %64 : vector<48x64xf32> to vector<48x64xbf16>
    %cst_28 = arith.constant dense<0.000000e+00> : vector<48x32xf32>
    %66 = tpu.matmul %65, %19, %cst_28 {dimension_numbers = #tpu.dot_dimension_numbers<[1], [0], [0], [1], [0, 0, 1, 1], [], []>} : vector<48x64xbf16>, vector<64x32xbf16>, vector<48x32xf32> -> vector<48x32xf32>
    %67 = arith.addf %36, %66 : vector<48x32xf32>
    %68 = vector.broadcast %5 : vector<1x32xf32> to vector<48x32xf32>
    %69 = arith.addf %67, %68 : vector<48x32xf32>
    %cst_29 = arith.constant dense<0.000000e+00> : vector<48xf32>
    %70 = vector.multi_reduction <add>, %69, %cst_29 [1] : vector<48x32xf32> to vector<48xf32>
    %71 = vector.shape_cast %70 : vector<48xf32> to vector<48x1xf32>
    %cst_30 = arith.constant 3.200000e+01 : f32
    %72 = vector.broadcast %cst_30 : f32 to vector<48x1xf32>
    %73 = arith.divf %71, %72 : vector<48x1xf32>
    %74 = vector.broadcast %73 : vector<48x1xf32> to vector<48x32xf32>
    %75 = arith.subf %69, %74 : vector<48x32xf32>
    %76 = arith.mulf %75, %75 : vector<48x32xf32>
    %cst_31 = arith.constant dense<0.000000e+00> : vector<48xf32>
    %77 = vector.multi_reduction <add>, %76, %cst_31 [1] : vector<48x32xf32> to vector<48xf32>
    %78 = vector.shape_cast %77 : vector<48xf32> to vector<48x1xf32>
    %cst_32 = arith.constant 3.200000e+01 : f32
    %79 = vector.broadcast %cst_32 : f32 to vector<48x1xf32>
    %80 = arith.divf %78, %79 : vector<48x1xf32>
    %81 = vector.broadcast %73 : vector<48x1xf32> to vector<48x32xf32>
    %82 = arith.subf %69, %81 : vector<48x32xf32>
    %cst_33 = arith.constant 9.99999974E-6 : f32
    %83 = vector.broadcast %cst_33 : f32 to vector<48x1xf32>
    %84 = arith.addf %80, %83 : vector<48x1xf32>
    %85 = math.rsqrt %84 : vector<48x1xf32>
    %86 = vector.broadcast %85 : vector<48x1xf32> to vector<48x32xf32>
    %87 = arith.mulf %82, %86 : vector<48x32xf32>
    %88 = vector.broadcast %6 : vector<1x32xf32> to vector<48x32xf32>
    %89 = arith.mulf %87, %88 : vector<48x32xf32>
    %90 = vector.broadcast %7 : vector<1x32xf32> to vector<48x32xf32>
    %91 = arith.addf %89, %90 : vector<48x32xf32>
    %c0_34 = arith.constant 0 : index
    %c0_35 = arith.constant 0 : index
    %92 = vector.load %arg5[%c0_34, %c0_35] : memref<32x32xbf16, #tpu.memory_space<vmem>>, vector<32x32xbf16>
    %93 = arith.truncf %91 : vector<48x32xf32> to vector<48x32xbf16>
    %cst_36 = arith.constant dense<0.000000e+00> : vector<48x32xf32>
    %94 = tpu.matmul %93, %92, %cst_36 {dimension_numbers = #tpu.dot_dimension_numbers<[1], [0], [0], [1], [0, 0, 1, 1], [], []>} : vector<48x32xbf16>, vector<32x32xbf16>, vector<48x32xf32> -> vector<48x32xf32>
    %95 = vector.broadcast %8 : vector<1x32xf32> to vector<48x32xf32>
    %96 = arith.addf %94, %95 : vector<48x32xf32>
    %97 = arith.truncf %69 : vector<48x32xf32> to vector<48x32xbf16>
    %c0_37 = arith.constant 0 : index
    %c0_38 = arith.constant 0 : index
    %98 = vector.load %arg8[%c0_37, %c0_38] : memref<48x32xbf16, #tpu.memory_space<vmem>>, vector<48x32xbf16>
    tpu.vector_store %arg8[%c0_37, %c0_38], %97 {strides = array<i32>} : memref<48x32xbf16, #tpu.memory_space<vmem>>, vector<48x32xbf16>,
    %99 = arith.truncf %96 : vector<48x32xf32> to vector<48x32xbf16>
    %c0_39 = arith.constant 0 : index
    %c0_40 = arith.constant 0 : index
    %100 = vector.load %arg9[%c0_39, %c0_40] : memref<48x32xbf16, #tpu.memory_space<vmem>>, vector<48x32xbf16>
    tpu.vector_store %arg9[%c0_39, %c0_40], %99 {strides = array<i32>} : memref<48x32xbf16, #tpu.memory_space<vmem>>, vector<48x32xbf16>,
    return
  }
  func.func @transform_0(%arg0: i32) -> (i32, i32) {
    %c0_i32 = arith.constant 0 : i32
    %c0_i32_0 = arith.constant 0 : i32
    return %arg0, %c0_i32 : i32, i32
  }
  func.func @transform_1(%arg0: i32) -> (i32, i32) {
    %c0_i32 = arith.constant 0 : i32
    %c0_i32_0 = arith.constant 0 : i32
    %c0_i32_1 = arith.constant 0 : i32
    return %c0_i32, %c0_i32_0 : i32, i32
  }
  func.func @transform_2(%arg0: i32) -> (i32, i32, i32) {
    %c0_i32 = arith.constant 0 : i32
    %c0_i32_0 = arith.constant 0 : i32
    %c0_i32_1 = arith.constant 0 : i32
    %c0_i32_2 = arith.constant 0 : i32
    return %c0_i32, %c0_i32_0, %c0_i32_1 : i32, i32, i32
  }
  func.func @transform_3(%arg0: i32) -> (i32, i32, i32) {
    %c0_i32 = arith.constant 0 : i32
    %c0_i32_0 = arith.constant 0 : i32
    %c0_i32_1 = arith.constant 0 : i32
    %c0_i32_2 = arith.constant 0 : i32
    return %c0_i32, %c0_i32_0, %c0_i32_1 : i32, i32, i32
  }
  func.func @transform_4(%arg0: i32) -> (i32, i32) {
    %c0_i32 = arith.constant 0 : i32
    %c0_i32_0 = arith.constant 0 : i32
    %c0_i32_1 = arith.constant 0 : i32
    return %c0_i32, %c0_i32_0 : i32, i32
  }
  func.func @transform_5(%arg0: i32) -> (i32, i32) {
    %c0_i32 = arith.constant 0 : i32
    %c0_i32_0 = arith.constant 0 : i32
    %c0_i32_1 = arith.constant 0 : i32
    return %c0_i32, %c0_i32_0 : i32, i32
  }
  func.func @transform_6(%arg0: i32) -> (i32, i32) {
    %c0_i32 = arith.constant 0 : i32
    %c0_i32_0 = arith.constant 0 : i32
    %c0_i32_1 = arith.constant 0 : i32
    return %c0_i32, %c0_i32_0 : i32, i32
  }
  func.func @transform_7(%arg0: i32) -> (i32, i32) {
    %c0_i32 = arith.constant 0 : i32
    %c0_i32_0 = arith.constant 0 : i32
    return %arg0, %c0_i32 : i32, i32
  }
  func.func @transform_8(%arg0: i32) -> (i32, i32) {
    %c0_i32 = arith.constant 0 : i32
    %c0_i32_0 = arith.constant 0 : i32
    return %arg0, %c0_i32 : i32, i32
  }
}

module attributes {stable_mosaic.version = 11 : i64} {
  func.func @sim_kernel(%arg0: i32, %arg1: i32, %arg2: memref<16x32xbf16, #tpu.memory_space<vmem>>, %arg3: memref<128x32xbf16, #tpu.memory_space<vmem>>, %arg4: memref<1x128xf32, #tpu.memory_space<vmem>>, %arg5: memref<16x128xf32, #tpu.memory_space<vmem>>) attributes {dimension_semantics = [#tpu.dimension_semantics<parallel>, #tpu.dimension_semantics<parallel>], iteration_bounds = array<i64: 1, 1>, scalar_prefetch = 0 : i64, scratch_operands = 0 : i64, tpu.core_type = #tpu.core_type<tc>, window_params = [{transform_indices = @transform_0, window_bounds = array<i64: 16, 32>}, {transform_indices = @transform_1, window_bounds = array<i64: 128, 32>}, {transform_indices = @transform_2, window_bounds = array<i64: 1, 128>}, {transform_indices = @transform_3, window_bounds = array<i64: 16, 128>}]} {
    %c0 = arith.constant 0 : index
    %c0_0 = arith.constant 0 : index
    %0 = vector.load %arg2[%c0, %c0_0] : memref<16x32xbf16, #tpu.memory_space<vmem>>, vector<16x32xbf16>
    %1 = arith.extf %0 : vector<16x32xbf16> to vector<16x32xf32>
    %2 = arith.mulf %1, %1 : vector<16x32xf32>
    %cst = arith.constant dense<0.000000e+00> : vector<16xf32>
    %3 = vector.multi_reduction <add>, %2, %cst [1] : vector<16x32xf32> to vector<16xf32>
    %4 = vector.shape_cast %3 : vector<16xf32> to vector<16x1xf32>
    %cst_1 = arith.constant 2.000000e+00 : bf16
    %5 = vector.broadcast %cst_1 : bf16 to vector<16x32xbf16>
    %6 = arith.mulf %5, %0 : vector<16x32xbf16>
    %c0_2 = arith.constant 0 : index
    %c0_3 = arith.constant 0 : index
    %7 = vector.load %arg3[%c0_2, %c0_3] : memref<128x32xbf16, #tpu.memory_space<vmem>>, vector<128x32xbf16>
    %cst_4 = arith.constant dense<0.000000e+00> : vector<16x128xf32>
    %8 = tpu.matmul %6, %7, %cst_4 {dimension_numbers = #tpu.dot_dimension_numbers<[1], [1], [0], [0], [0, 0, 1, 0], [], []>} : vector<16x32xbf16>, vector<128x32xbf16>, vector<16x128xf32> -> vector<16x128xf32>
    %9 = vector.broadcast %4 : vector<16x1xf32> to vector<16x128xf32>
    %10 = arith.subf %8, %9 : vector<16x128xf32>
    %c0_5 = arith.constant 0 : index
    %c0_6 = arith.constant 0 : index
    %11 = vector.load %arg4[%c0_5, %c0_6] : memref<1x128xf32, #tpu.memory_space<vmem>>, vector<1x128xf32>
    %12 = vector.broadcast %11 : vector<1x128xf32> to vector<16x128xf32>
    %13 = arith.subf %10, %12 : vector<16x128xf32>
    %c0_7 = arith.constant 0 : index
    %c0_8 = arith.constant 0 : index
    %14 = vector.load %arg5[%c0_7, %c0_8] : memref<16x128xf32, #tpu.memory_space<vmem>>, vector<16x128xf32>
    tpu.vector_store %arg5[%c0_7, %c0_8], %13 {strides = array<i32>} : memref<16x128xf32, #tpu.memory_space<vmem>>, vector<16x128xf32>,
    return
  }
  func.func @transform_0(%arg0: i32, %arg1: i32) -> (i32, i32) {
    %c0_i32 = arith.constant 0 : i32
    %c0_i32_0 = arith.constant 0 : i32
    return %arg0, %c0_i32 : i32, i32
  }
  func.func @transform_1(%arg0: i32, %arg1: i32) -> (i32, i32) {
    %c0_i32 = arith.constant 0 : i32
    %c0_i32_0 = arith.constant 0 : i32
    return %arg1, %c0_i32 : i32, i32
  }
  func.func @transform_2(%arg0: i32, %arg1: i32) -> (i32, i32) {
    %c0_i32 = arith.constant 0 : i32
    %c0_i32_0 = arith.constant 0 : i32
    return %c0_i32, %arg1 : i32, i32
  }
  func.func @transform_3(%arg0: i32, %arg1: i32) -> (i32, i32) {
    %c0_i32 = arith.constant 0 : i32
    return %arg0, %arg1 : i32, i32
  }
}

module attributes {stable_mosaic.version = 11 : i64} {
  func.func @predict_kernel(%arg0: i32, %arg1: memref<16x32xbf16, #tpu.memory_space<vmem>>, %arg2: memref<16x32xbf16, #tpu.memory_space<vmem>>, %arg3: memref<16x16x32xbf16, #tpu.memory_space<vmem>>, %arg4: memref<16x16x32xbf16, #tpu.memory_space<vmem>>, %arg5: memref<16x16xf32, #tpu.memory_space<vmem>>, %arg6: memref<3x32x64xbf16, #tpu.memory_space<vmem>>, %arg7: memref<3x64x32xbf16, #tpu.memory_space<vmem>>, %arg8: memref<33x128xf32, #tpu.memory_space<vmem>>, %arg9: memref<8x32xf32, #tpu.memory_space<vmem>>, %arg10: memref<3x64xf32, #tpu.memory_space<vmem>>, %arg11: memref<16x128xf32, #tpu.memory_space<vmem>>) attributes {dimension_semantics = [#tpu.dimension_semantics<parallel>], iteration_bounds = array<i64: 1>, scalar_prefetch = 0 : i64, scratch_operands = 0 : i64, tpu.core_type = #tpu.core_type<tc>, window_params = [{transform_indices = @transform_0, window_bounds = array<i64: 16, 32>}, {transform_indices = @transform_1, window_bounds = array<i64: 16, 32>}, {transform_indices = @transform_2, window_bounds = array<i64: 16, 16, 32>}, {transform_indices = @transform_3, window_bounds = array<i64: 16, 16, 32>}, {transform_indices = @transform_4, window_bounds = array<i64: 16, 16>}, {pipeline_mode = #tpu.pipeline_mode<synchronous>, transform_indices = @transform_5, window_bounds = array<i64: 3, 32, 64>}, {pipeline_mode = #tpu.pipeline_mode<synchronous>, transform_indices = @transform_6, window_bounds = array<i64: 3, 64, 32>}, {pipeline_mode = #tpu.pipeline_mode<synchronous>, transform_indices = @transform_7, window_bounds = array<i64: 33, 128>}, {pipeline_mode = #tpu.pipeline_mode<synchronous>, transform_indices = @transform_8, window_bounds = array<i64: 8, 32>}, {pipeline_mode = #tpu.pipeline_mode<synchronous>, transform_indices = @transform_9, window_bounds = array<i64: 3, 64>}, {transform_indices = @transform_10, window_bounds = array<i64: 16, 128>}]} {
    %c0 = arith.constant 0 : index
    %c0_0 = arith.constant 0 : index
    %0 = vector.load %arg9[%c0, %c0_0] : memref<8x32xf32, #tpu.memory_space<vmem>>, vector<8x32xf32>
    %1 = vector.extract_strided_slice %0 {offsets = [0, 0], sizes = [1, 32], strides = [1, 1]} : vector<8x32xf32> to vector<1x32xf32>
    %2 = vector.extract_strided_slice %0 {offsets = [1, 0], sizes = [1, 32], strides = [1, 1]} : vector<8x32xf32> to vector<1x32xf32>
    %3 = vector.extract_strided_slice %0 {offsets = [2, 0], sizes = [1, 32], strides = [1, 1]} : vector<8x32xf32> to vector<1x32xf32>
    %4 = vector.extract_strided_slice %0 {offsets = [3, 0], sizes = [1, 32], strides = [1, 1]} : vector<8x32xf32> to vector<1x32xf32>
    %5 = vector.extract_strided_slice %0 {offsets = [4, 0], sizes = [1, 32], strides = [1, 1]} : vector<8x32xf32> to vector<1x32xf32>
    %6 = vector.extract_strided_slice %0 {offsets = [5, 0], sizes = [1, 32], strides = [1, 1]} : vector<8x32xf32> to vector<1x32xf32>
    %7 = vector.extract_strided_slice %0 {offsets = [6, 0], sizes = [1, 32], strides = [1, 1]} : vector<8x32xf32> to vector<1x32xf32>
    %8 = vector.extract_strided_slice %0 {offsets = [7, 0], sizes = [1, 32], strides = [1, 1]} : vector<8x32xf32> to vector<1x32xf32>
    %c0_1 = arith.constant 0 : index
    %c0_2 = arith.constant 0 : index
    %9 = vector.load %arg10[%c0_1, %c0_2] : memref<3x64xf32, #tpu.memory_space<vmem>>, vector<3x64xf32>
    %10 = vector.extract_strided_slice %9 {offsets = [0, 0], sizes = [1, 64], strides = [1, 1]} : vector<3x64xf32> to vector<1x64xf32>
    %11 = vector.extract_strided_slice %9 {offsets = [1, 0], sizes = [1, 64], strides = [1, 1]} : vector<3x64xf32> to vector<1x64xf32>
    %12 = vector.extract_strided_slice %9 {offsets = [2, 0], sizes = [1, 64], strides = [1, 1]} : vector<3x64xf32> to vector<1x64xf32>
    %c0_3 = arith.constant 0 : index
    %c0_4 = arith.constant 0 : index
    %c0_5 = arith.constant 0 : index
    %13 = vector.load %arg6[%c0_3, %c0_4, %c0_5] : memref<3x32x64xbf16, #tpu.memory_space<vmem>>, vector<1x32x64xbf16>
    %14 = vector.shape_cast %13 : vector<1x32x64xbf16> to vector<32x64xbf16>
    %c1 = arith.constant 1 : index
    %c0_6 = arith.constant 0 : index
    %c0_7 = arith.constant 0 : index
    %15 = vector.load %arg6[%c1, %c0_6, %c0_7] : memref<3x32x64xbf16, #tpu.memory_space<vmem>>, vector<1x32x64xbf16>
    %16 = vector.shape_cast %15 : vector<1x32x64xbf16> to vector<32x64xbf16>
    %c2 = arith.constant 2 : index
    %c0_8 = arith.constant 0 : index
    %c0_9 = arith.constant 0 : index
    %17 = vector.load %arg6[%c2, %c0_8, %c0_9] : memref<3x32x64xbf16, #tpu.memory_space<vmem>>, vector<1x32x64xbf16>
    %18 = vector.shape_cast %17 : vector<1x32x64xbf16> to vector<32x64xbf16>
    %c0_10 = arith.constant 0 : index
    %c0_11 = arith.constant 0 : index
    %c0_12 = arith.constant 0 : index
    %19 = vector.load %arg7[%c0_10, %c0_11, %c0_12] : memref<3x64x32xbf16, #tpu.memory_space<vmem>>, vector<1x64x32xbf16>
    %20 = vector.shape_cast %19 : vector<1x64x32xbf16> to vector<64x32xbf16>
    %c1_13 = arith.constant 1 : index
    %c0_14 = arith.constant 0 : index
    %c0_15 = arith.constant 0 : index
    %21 = vector.load %arg7[%c1_13, %c0_14, %c0_15] : memref<3x64x32xbf16, #tpu.memory_space<vmem>>, vector<1x64x32xbf16>
    %22 = vector.shape_cast %21 : vector<1x64x32xbf16> to vector<64x32xbf16>
    %c2_16 = arith.constant 2 : index
    %c0_17 = arith.constant 0 : index
    %c0_18 = arith.constant 0 : index
    %23 = vector.load %arg7[%c2_16, %c0_17, %c0_18] : memref<3x64x32xbf16, #tpu.memory_space<vmem>>, vector<1x64x32xbf16>
    %24 = vector.shape_cast %23 : vector<1x64x32xbf16> to vector<64x32xbf16>
    %c0_19 = arith.constant 0 : index
    %c0_20 = arith.constant 0 : index
    %25 = vector.load %arg8[%c0_19, %c0_20] : memref<33x128xf32, #tpu.memory_space<vmem>>, vector<33x128xf32>
    %26 = vector.extract_strided_slice %25 {offsets = [0, 0], sizes = [32, 128], strides = [1, 1]} : vector<33x128xf32> to vector<32x128xf32>
    %27 = arith.truncf %26 : vector<32x128xf32> to vector<32x128xbf16>
    %28 = vector.extract_strided_slice %25 {offsets = [32, 0], sizes = [1, 128], strides = [1, 1]} : vector<33x128xf32> to vector<1x128xf32>
    %c0_21 = arith.constant 0 : index
    %c0_22 = arith.constant 0 : index
    %29 = vector.load %arg5[%c0_21, %c0_22] : memref<16x16xf32, #tpu.memory_space<vmem>>, vector<16x16xf32>
    %cst = arith.constant dense<0xFF800000> : vector<16xf32>
    %30 = vector.multi_reduction <maximumf>, %29, %cst [1] : vector<16x16xf32> to vector<16xf32>
    %31 = vector.shape_cast %30 : vector<16xf32> to vector<16x1xf32>
    %32 = vector.broadcast %31 : vector<16x1xf32> to vector<16x16xf32>
    %33 = arith.subf %29, %32 : vector<16x16xf32>
    %34 = math.exp %33 : vector<16x16xf32>
    %cst_23 = arith.constant dense<0.000000e+00> : vector<16xf32>
    %35 = vector.multi_reduction <add>, %34, %cst_23 [1] : vector<16x16xf32> to vector<16xf32>
    %36 = vector.shape_cast %35 : vector<16xf32> to vector<16x1xf32>
    %37 = tpu.reciprocal %36 {approx = true} : vector<16x1xf32> -> vector<16x1xf32>
    %38 = vector.broadcast %37 : vector<16x1xf32> to vector<16x16xf32>
    %39 = arith.mulf %34, %38 : vector<16x16xf32>
    %c0_24 = arith.constant 0 : index
    %c0_25 = arith.constant 0 : index
    %40 = vector.load %arg2[%c0_24, %c0_25] : memref<16x32xbf16, #tpu.memory_space<vmem>>, vector<16x32xbf16>
    %41 = vector.shape_cast %40 : vector<16x32xbf16> to vector<16x1x32xbf16>
    %c0_26 = arith.constant 0 : index
    %c0_27 = arith.constant 0 : index
    %c0_28 = arith.constant 0 : index
    %42 = vector.load %arg3[%c0_26, %c0_27, %c0_28] : memref<16x16x32xbf16, #tpu.memory_space<vmem>>, vector<16x16x32xbf16>
    %43 = vector.broadcast %41 : vector<16x1x32xbf16> to vector<16x16x32xbf16>
    %44 = arith.subf %43, %42 : vector<16x16x32xbf16>
    %45 = vector.shape_cast %44 : vector<16x16x32xbf16> to vector<256x32xbf16>
    %cst_29 = arith.constant dense<0.000000e+00> : vector<256x64xf32>
    %46 = tpu.matmul %45, %14, %cst_29 {dimension_numbers = #tpu.dot_dimension_numbers<[1], [0], [0], [1], [0, 0, 1, 1], [], []>} : vector<256x32xbf16>, vector<32x64xbf16>, vector<256x64xf32> -> vector<256x64xf32>
    %47 = vector.broadcast %10 : vector<1x64xf32> to vector<256x64xf32>
    %48 = arith.addf %46, %47 : vector<256x64xf32>
    %cst_30 = arith.constant 0.000000e+00 : f32
    %49 = vector.broadcast %cst_30 : f32 to vector<256x64xf32>
    %50 = arith.maximumf %48, %49 : vector<256x64xf32>
    %51 = arith.truncf %50 : vector<256x64xf32> to vector<256x64xbf16>
    %cst_31 = arith.constant dense<0.000000e+00> : vector<256x32xf32>
    %52 = tpu.matmul %51, %20, %cst_31 {dimension_numbers = #tpu.dot_dimension_numbers<[1], [0], [0], [1], [0, 0, 1, 1], [], []>} : vector<256x64xbf16>, vector<64x32xbf16>, vector<256x32xf32> -> vector<256x32xf32>
    %c0_32 = arith.constant 0 : index
    %c0_33 = arith.constant 0 : index
    %c0_34 = arith.constant 0 : index
    %53 = vector.load %arg4[%c0_32, %c0_33, %c0_34] : memref<16x16x32xbf16, #tpu.memory_space<vmem>>, vector<16x16x32xbf16>
    %54 = arith.extf %53 : vector<16x16x32xbf16> to vector<16x16x32xf32>
    %55 = vector.shape_cast %52 : vector<256x32xf32> to vector<16x16x32xf32>
    %56 = arith.addf %54, %55 : vector<16x16x32xf32>
    %57 = vector.shape_cast %39 : vector<16x16xf32> to vector<16x16x1xf32>
    %58 = vector.broadcast %57 : vector<16x16x1xf32> to vector<16x16x32xf32>
    %59 = arith.mulf %58, %56 : vector<16x16x32xf32>
    %cst_35 = arith.constant dense<0.000000e+00> : vector<16x32xf32>
    %60 = vector.multi_reduction <add>, %59, %cst_35 [1] : vector<16x16x32xf32> to vector<16x32xf32>
    %c0_36 = arith.constant 0 : index
    %c0_37 = arith.constant 0 : index
    %61 = vector.load %arg1[%c0_36, %c0_37] : memref<16x32xbf16, #tpu.memory_space<vmem>>, vector<16x32xbf16>
    %62 = arith.extf %61 : vector<16x32xbf16> to vector<16x32xf32>
    %63 = arith.addf %62, %60 : vector<16x32xf32>
    %cst_38 = arith.constant dense<0.000000e+00> : vector<16xf32>
    %64 = vector.multi_reduction <add>, %63, %cst_38 [1] : vector<16x32xf32> to vector<16xf32>
    %65 = vector.shape_cast %64 : vector<16xf32> to vector<16x1xf32>
    %cst_39 = arith.constant 3.200000e+01 : f32
    %66 = vector.broadcast %cst_39 : f32 to vector<16x1xf32>
    %67 = arith.divf %65, %66 : vector<16x1xf32>
    %68 = vector.broadcast %67 : vector<16x1xf32> to vector<16x32xf32>
    %69 = arith.subf %63, %68 : vector<16x32xf32>
    %70 = arith.mulf %69, %69 : vector<16x32xf32>
    %cst_40 = arith.constant dense<0.000000e+00> : vector<16xf32>
    %71 = vector.multi_reduction <add>, %70, %cst_40 [1] : vector<16x32xf32> to vector<16xf32>
    %72 = vector.shape_cast %71 : vector<16xf32> to vector<16x1xf32>
    %cst_41 = arith.constant 3.200000e+01 : f32
    %73 = vector.broadcast %cst_41 : f32 to vector<16x1xf32>
    %74 = arith.divf %72, %73 : vector<16x1xf32>
    %75 = vector.broadcast %67 : vector<16x1xf32> to vector<16x32xf32>
    %76 = arith.subf %63, %75 : vector<16x32xf32>
    %cst_42 = arith.constant 9.99999974E-6 : f32
    %77 = vector.broadcast %cst_42 : f32 to vector<16x1xf32>
    %78 = arith.addf %74, %77 : vector<16x1xf32>
    %79 = math.rsqrt %78 : vector<16x1xf32>
    %80 = vector.broadcast %79 : vector<16x1xf32> to vector<16x32xf32>
    %81 = arith.mulf %76, %80 : vector<16x32xf32>
    %82 = vector.broadcast %1 : vector<1x32xf32> to vector<16x32xf32>
    %83 = arith.mulf %81, %82 : vector<16x32xf32>
    %84 = vector.broadcast %2 : vector<1x32xf32> to vector<16x32xf32>
    %85 = arith.addf %83, %84 : vector<16x32xf32>
    %86 = arith.truncf %85 : vector<16x32xf32> to vector<16x32xbf16>
    %cst_43 = arith.constant dense<0.000000e+00> : vector<16x64xf32>
    %87 = tpu.matmul %86, %16, %cst_43 {dimension_numbers = #tpu.dot_dimension_numbers<[1], [0], [0], [1], [0, 0, 1, 1], [], []>} : vector<16x32xbf16>, vector<32x64xbf16>, vector<16x64xf32> -> vector<16x64xf32>
    %88 = vector.broadcast %11 : vector<1x64xf32> to vector<16x64xf32>
    %89 = arith.addf %87, %88 : vector<16x64xf32>
    %cst_44 = arith.constant 0.000000e+00 : f32
    %90 = vector.broadcast %cst_44 : f32 to vector<16x64xf32>
    %91 = arith.maximumf %89, %90 : vector<16x64xf32>
    %92 = arith.truncf %91 : vector<16x64xf32> to vector<16x64xbf16>
    %cst_45 = arith.constant dense<0.000000e+00> : vector<16x32xf32>
    %93 = tpu.matmul %92, %22, %cst_45 {dimension_numbers = #tpu.dot_dimension_numbers<[1], [0], [0], [1], [0, 0, 1, 1], [], []>} : vector<16x64xbf16>, vector<64x32xbf16>, vector<16x32xf32> -> vector<16x32xf32>
    %94 = arith.addf %63, %93 : vector<16x32xf32>
    %95 = vector.broadcast %3 : vector<1x32xf32> to vector<16x32xf32>
    %96 = arith.addf %94, %95 : vector<16x32xf32>
    %cst_46 = arith.constant dense<0.000000e+00> : vector<16xf32>
    %97 = vector.multi_reduction <add>, %96, %cst_46 [1] : vector<16x32xf32> to vector<16xf32>
    %98 = vector.shape_cast %97 : vector<16xf32> to vector<16x1xf32>
    %cst_47 = arith.constant 3.200000e+01 : f32
    %99 = vector.broadcast %cst_47 : f32 to vector<16x1xf32>
    %100 = arith.divf %98, %99 : vector<16x1xf32>
    %101 = vector.broadcast %100 : vector<16x1xf32> to vector<16x32xf32>
    %102 = arith.subf %96, %101 : vector<16x32xf32>
    %103 = arith.mulf %102, %102 : vector<16x32xf32>
    %cst_48 = arith.constant dense<0.000000e+00> : vector<16xf32>
    %104 = vector.multi_reduction <add>, %103, %cst_48 [1] : vector<16x32xf32> to vector<16xf32>
    %105 = vector.shape_cast %104 : vector<16xf32> to vector<16x1xf32>
    %cst_49 = arith.constant 3.200000e+01 : f32
    %106 = vector.broadcast %cst_49 : f32 to vector<16x1xf32>
    %107 = arith.divf %105, %106 : vector<16x1xf32>
    %108 = vector.broadcast %100 : vector<16x1xf32> to vector<16x32xf32>
    %109 = arith.subf %96, %108 : vector<16x32xf32>
    %cst_50 = arith.constant 9.99999974E-6 : f32
    %110 = vector.broadcast %cst_50 : f32 to vector<16x1xf32>
    %111 = arith.addf %107, %110 : vector<16x1xf32>
    %112 = math.rsqrt %111 : vector<16x1xf32>
    %113 = vector.broadcast %112 : vector<16x1xf32> to vector<16x32xf32>
    %114 = arith.mulf %109, %113 : vector<16x32xf32>
    %115 = vector.broadcast %4 : vector<1x32xf32> to vector<16x32xf32>
    %116 = arith.mulf %114, %115 : vector<16x32xf32>
    %117 = vector.broadcast %5 : vector<1x32xf32> to vector<16x32xf32>
    %118 = arith.addf %116, %117 : vector<16x32xf32>
    %119 = arith.truncf %118 : vector<16x32xf32> to vector<16x32xbf16>
    %cst_51 = arith.constant dense<0.000000e+00> : vector<16x64xf32>
    %120 = tpu.matmul %119, %18, %cst_51 {dimension_numbers = #tpu.dot_dimension_numbers<[1], [0], [0], [1], [0, 0, 1, 1], [], []>} : vector<16x32xbf16>, vector<32x64xbf16>, vector<16x64xf32> -> vector<16x64xf32>
    %121 = vector.broadcast %12 : vector<1x64xf32> to vector<16x64xf32>
    %122 = arith.addf %120, %121 : vector<16x64xf32>
    %cst_52 = arith.constant 0.000000e+00 : f32
    %123 = vector.broadcast %cst_52 : f32 to vector<16x64xf32>
    %124 = arith.maximumf %122, %123 : vector<16x64xf32>
    %125 = arith.truncf %124 : vector<16x64xf32> to vector<16x64xbf16>
    %cst_53 = arith.constant dense<0.000000e+00> : vector<16x32xf32>
    %126 = tpu.matmul %125, %24, %cst_53 {dimension_numbers = #tpu.dot_dimension_numbers<[1], [0], [0], [1], [0, 0, 1, 1], [], []>} : vector<16x64xbf16>, vector<64x32xbf16>, vector<16x32xf32> -> vector<16x32xf32>
    %127 = arith.addf %96, %126 : vector<16x32xf32>
    %128 = vector.broadcast %6 : vector<1x32xf32> to vector<16x32xf32>
    %129 = arith.addf %127, %128 : vector<16x32xf32>
    %cst_54 = arith.constant dense<0.000000e+00> : vector<16xf32>
    %130 = vector.multi_reduction <add>, %129, %cst_54 [1] : vector<16x32xf32> to vector<16xf32>
    %131 = vector.shape_cast %130 : vector<16xf32> to vector<16x1xf32>
    %cst_55 = arith.constant 3.200000e+01 : f32
    %132 = vector.broadcast %cst_55 : f32 to vector<16x1xf32>
    %133 = arith.divf %131, %132 : vector<16x1xf32>
    %134 = vector.broadcast %133 : vector<16x1xf32> to vector<16x32xf32>
    %135 = arith.subf %129, %134 : vector<16x32xf32>
    %136 = arith.mulf %135, %135 : vector<16x32xf32>
    %cst_56 = arith.constant dense<0.000000e+00> : vector<16xf32>
    %137 = vector.multi_reduction <add>, %136, %cst_56 [1] : vector<16x32xf32> to vector<16xf32>
    %138 = vector.shape_cast %137 : vector<16xf32> to vector<16x1xf32>
    %cst_57 = arith.constant 3.200000e+01 : f32
    %139 = vector.broadcast %cst_57 : f32 to vector<16x1xf32>
    %140 = arith.divf %138, %139 : vector<16x1xf32>
    %141 = vector.broadcast %133 : vector<16x1xf32> to vector<16x32xf32>
    %142 = arith.subf %129, %141 : vector<16x32xf32>
    %cst_58 = arith.constant 9.99999974E-6 : f32
    %143 = vector.broadcast %cst_58 : f32 to vector<16x1xf32>
    %144 = arith.addf %140, %143 : vector<16x1xf32>
    %145 = math.rsqrt %144 : vector<16x1xf32>
    %146 = vector.broadcast %145 : vector<16x1xf32> to vector<16x32xf32>
    %147 = arith.mulf %142, %146 : vector<16x32xf32>
    %148 = vector.broadcast %7 : vector<1x32xf32> to vector<16x32xf32>
    %149 = arith.mulf %147, %148 : vector<16x32xf32>
    %150 = vector.broadcast %8 : vector<1x32xf32> to vector<16x32xf32>
    %151 = arith.addf %149, %150 : vector<16x32xf32>
    %cst_59 = arith.constant 0.000000e+00 : f32
    %152 = vector.broadcast %cst_59 : f32 to vector<16x32xf32>
    %153 = arith.maximumf %151, %152 : vector<16x32xf32>
    %154 = arith.truncf %153 : vector<16x32xf32> to vector<16x32xbf16>
    %cst_60 = arith.constant dense<0.000000e+00> : vector<16x128xf32>
    %155 = tpu.matmul %154, %27, %cst_60 {dimension_numbers = #tpu.dot_dimension_numbers<[1], [0], [0], [1], [0, 0, 1, 1], [], []>} : vector<16x32xbf16>, vector<32x128xbf16>, vector<16x128xf32> -> vector<16x128xf32>
    %156 = vector.broadcast %28 : vector<1x128xf32> to vector<16x128xf32>
    %157 = arith.addf %155, %156 : vector<16x128xf32>
    %c0_61 = arith.constant 0 : index
    %c0_62 = arith.constant 0 : index
    %158 = vector.load %arg11[%c0_61, %c0_62] : memref<16x128xf32, #tpu.memory_space<vmem>>, vector<16x128xf32>
    tpu.vector_store %arg11[%c0_61, %c0_62], %157 {strides = array<i32>} : memref<16x128xf32, #tpu.memory_space<vmem>>, vector<16x128xf32>,
    return
  }
  func.func @transform_0(%arg0: i32) -> (i32, i32) {
    %c0_i32 = arith.constant 0 : i32
    %c0_i32_0 = arith.constant 0 : i32
    return %arg0, %c0_i32 : i32, i32
  }
  func.func @transform_1(%arg0: i32) -> (i32, i32) {
    %c0_i32 = arith.constant 0 : i32
    %c0_i32_0 = arith.constant 0 : i32
    return %arg0, %c0_i32 : i32, i32
  }
  func.func @transform_2(%arg0: i32) -> (i32, i32, i32) {
    %c0_i32 = arith.constant 0 : i32
    %c0_i32_0 = arith.constant 0 : i32
    %c0_i32_1 = arith.constant 0 : i32
    return %arg0, %c0_i32, %c0_i32_0 : i32, i32, i32
  }
  func.func @transform_3(%arg0: i32) -> (i32, i32, i32) {
    %c0_i32 = arith.constant 0 : i32
    %c0_i32_0 = arith.constant 0 : i32
    %c0_i32_1 = arith.constant 0 : i32
    return %arg0, %c0_i32, %c0_i32_0 : i32, i32, i32
  }
  func.func @transform_4(%arg0: i32) -> (i32, i32) {
    %c0_i32 = arith.constant 0 : i32
    %c0_i32_0 = arith.constant 0 : i32
    return %arg0, %c0_i32 : i32, i32
  }
  func.func @transform_5(%arg0: i32) -> (i32, i32, i32) {
    %c0_i32 = arith.constant 0 : i32
    %c0_i32_0 = arith.constant 0 : i32
    %c0_i32_1 = arith.constant 0 : i32
    %c0_i32_2 = arith.constant 0 : i32
    return %c0_i32, %c0_i32_0, %c0_i32_1 : i32, i32, i32
  }
  func.func @transform_6(%arg0: i32) -> (i32, i32, i32) {
    %c0_i32 = arith.constant 0 : i32
    %c0_i32_0 = arith.constant 0 : i32
    %c0_i32_1 = arith.constant 0 : i32
    %c0_i32_2 = arith.constant 0 : i32
    return %c0_i32, %c0_i32_0, %c0_i32_1 : i32, i32, i32
  }
  func.func @transform_7(%arg0: i32) -> (i32, i32) {
    %c0_i32 = arith.constant 0 : i32
    %c0_i32_0 = arith.constant 0 : i32
    %c0_i32_1 = arith.constant 0 : i32
    return %c0_i32, %c0_i32_0 : i32, i32
  }
  func.func @transform_8(%arg0: i32) -> (i32, i32) {
    %c0_i32 = arith.constant 0 : i32
    %c0_i32_0 = arith.constant 0 : i32
    %c0_i32_1 = arith.constant 0 : i32
    return %c0_i32, %c0_i32_0 : i32, i32
  }
  func.func @transform_9(%arg0: i32) -> (i32, i32) {
    %c0_i32 = arith.constant 0 : i32
    %c0_i32_0 = arith.constant 0 : i32
    %c0_i32_1 = arith.constant 0 : i32
    return %c0_i32, %c0_i32_0 : i32, i32
  }
  func.func @transform_10(%arg0: i32) -> (i32, i32) {
    %c0_i32 = arith.constant 0 : i32
    %c0_i32_0 = arith.constant 0 : i32
    return %arg0, %c0_i32 : i32, i32
  }
}

</mosaic_0001>

<bundles_post_ra>
// kernel: tabr_forward.4
= control target key start
LH: loop header
LB: loop body
LE: loop exit
PB: predicated region body
PF: predicated region fallthrough
CT: control target
= control target key end

     0   :  { %vm22_vm0 = vcmask 261120   ;;  %v227_v0 = vmov 0.0   ;;  %vm228_vm1 = vmmov 0   ;;  %s299_s1 = inlined_call_operand.vmem [shape: bf16[128,32], index: 1, kind: input, shape index: {}]   ;;  %s300_s0 = inlined_call_operand.vmem [shape: bf16[16,32], index: 0, kind: input, shape index: {}]   ;;  %s301_s2 = inlined_call_operand.vmem [shape: f32[1,128], index: 2, kind: input, shape index: {}]   ;;  %s302_s3 = inlined_call_operand.vmem [shape: f32[16,128], index: 3, kind: output, shape index: {}]  }
   0x1   :  { %197 = vmatprep.subr.bf16.mxu0 %v227_v0  ;;  %v219_v1 = vld [vmem:[%s299_s1 + $0x38] sm:$0xff]   ;;  %213 = vmatprep.mubr.msk.bf16.mxu0 %vm228_vm1, %v227_v0  ;;  %v220_v3 = vld [vmem:[%s299_s1 + $0x30] sm:$0xff]   ;;  %v16_v5 = vld [vmem:[%s300_s0] sm:$0xf] }
   0x2   :  { %v117_v2 = vsel %vm22_vm0, %v219_v1, 0  ;;  %v114_v4 = vsel %vm22_vm0, %v220_v3, 0  ;;  %v17_v6 = vld [vmem:[%s300_s0 + $0x4] sm:$0xf]  ;;  %v18_v7 = vunpack.c.l.bf16 %v16_v5  ;;  %v221_v10 = vld [vmem:[%s299_s1 + $0x28] sm:$0xff]   ;;  %v223_v17 = vld [vmem:[%s299_s1 + $0x18] sm:$0xff]  }
   0x3   :  { %198 = vmatpush3.bf16.xpose.msra.mxu0 %v117_v2  ;;  %v19_v8 = vunpack.c.l.bf16 %v17_v6  ;;  %v111_v14 = vsel %vm22_vm0, %v221_v10, 0  ;;  %v222_v15 = vld [vmem:[%s299_s1 + $0x20] sm:$0xff]   ;;  %v105_v18 = vsel %vm22_vm0, %v223_v17, 0  ;;  %v224_v19 = vld [vmem:[%s299_s1 + $0x10] sm:$0xff]   ;;  %v225_v21 = vld [vmem:[%s299_s1 + $0x8] sm:$0xff]   ;;  %v29_v25 = vmul.bf16 1073758208, %v16_v5 }
   0x4   :  { %199 = vmatprep.subr.bf16.mxu0 %v227_v0  ;;  %v20_v9 = vmul.f32 %v18_v7, %v18_v7  ;;  %v108_v16 = vsel %vm22_vm0, %v222_v15, 0  ;;  %v102_v20 = vsel %vm22_vm0, %v224_v19, 0  ;;  %v99_v22 = vsel %vm22_vm0, %v225_v21, 0  ;;  %v226_v23 = vld [vmem:[%s299_s1] sm:$0xff]  }
   0x5   :  { %v21_v11 = vmul.f32 %v19_v8, %v19_v8  ;;  %v96_v24 = vsel %vm22_vm0, %v226_v23, 0  ;;  %v30_v26 = vmul.bf16 1073758208, %v17_v6  ;;  %v187_v30 = vld [vmem:[%s301_s2] ss:$0 sm:$0xff] }
   0x6   :  { %v23_v12 = vsel %vm22_vm0, %v20_v9, 0.0 }
   0x7   :  { %24 = vadd.xlane.f32.xlu0 %v23_v12  ;;  %v26_v13 = vsel %vm22_vm0, %v21_v11, 0.0  ;;  %v177_v27 = vcombine.low %v29_v25, %v30_v26 }
   0xb   :  { %200 = vmatpush3.bf16.xpose.msra.mxu0 %v114_v4  ;;  %27 = vadd.xlane.f32.xlu0 %v26_v13 }
   0xc   :  { %201 = vmatprep.subr.bf16.mxu0 %v227_v0 }
  0x13   :  { %202 = vmatpush3.bf16.xpose.msra.mxu0 %v111_v14 }
  0x14   :  { %203 = vmatprep.subr.bf16.mxu0 %v227_v0 }
  0x1b   :  { %204 = vmatpush3.bf16.xpose.msra.mxu0 %v108_v16 }
  0x1c   :  { %205 = vmatprep.subr.bf16.mxu0 %v227_v0 }
  0x23   :  { %206 = vmatpush3.bf16.xpose.msra.mxu0 %v105_v18 }
  0x24   :  { %207 = vmatprep.subr.bf16.mxu0 %v227_v0 }
  0x2b   :  { %208 = vmatpush3.bf16.xpose.msra.mxu0 %v102_v20 }
  0x2c   :  { %209 = vmatprep.subr.bf16.mxu0 %v227_v0 }
  0x33   :  { %210 = vmatpush3.bf16.xpose.msra.mxu0 %v99_v22 }
  0x34   :  { %211 = vmatprep.subr.bf16.mxu0 %v227_v0 }
  0x3b   :  { %212 = vmatpush3.bf16.xpose.msra.mxu0 %v96_v24 }
  0x42   :  { %214 = vmatmul.mubr.msk.bf16.vlgmr.msra.gmra.mxu0 %vm22_vm0, %v177_v27 }
  0x90   :  { %v25_v28 = vpop.xlane.xlu0 %24 }
  0x94   :  { %v28_v33 = vpop.xlane.xlu0 %27 }
 0x102   :  { %v153_v29 = vpop.f32.mrf.mxu0 }
 0x103   :  { %v160_v31 = vsub.f32 %v153_v29, %v25_v28 }
 0x104   :  { %v215_v32 = vpop.f32.mrf.mxu0 }
 0x105   :  { %v169_v34 = vsub.f32 %v160_v31, %v187_v30 }
 0x106   :  { %v156_v35 = vpop.f32.mrf.mxu0 }
 0x107   :  { %171 = vst [vmem:[%s302_s3] sm:$0xff] %v169_v34  ;;  %v161_v36 = vsub.f32 %v156_v35, %v28_v33 }
 0x108   :  { %v216_v37 = vpop.f32.mrf.mxu0 }
 0x109   :  { %v170_v38 = vsub.f32 %v161_v36, %v187_v30 }
 0x10b   :  { %172 = vst [vmem:[%s302_s3 + $0x8] sm:$0xff] %v170_v38 }

// kernel: tabr_forward.3
= control target key start
LH: loop header
LB: loop body
LE: loop exit
PB: predicated region body
PF: predicated region fallthrough
CT: control target
= control target key end

     0   :  { %s1592_s27 = smov 0   ;;  %s1918_s0 = inlined_call_operand.vmem [shape: f32[96,8], index: 0, kind: input, shape index: {}]   ;;  %s1919_s1 = inlined_call_operand.vmem [shape: bf16[8,32], index: 1, kind: input, shape index: {}]   ;;  %s1920_s2 = inlined_call_operand.vmem [shape: bf16[2,32,64], index: 2, kind: input, shape index: {}]   ;;  %s1921_s3 = inlined_call_operand.vmem [shape: bf16[2,64,32], index: 3, kind: input, shape index: {}]   ;;  %s1922_s4 = inlined_call_operand.vmem [shape: bf16[32,32], index: 4, kind: input, shape index: {}]   ;;  %s1923_s5 = inlined_call_operand.vmem [shape: f32[8,32], index: 5, kind: input, shape index: {}]   ;;  %s1924_s6 = inlined_call_operand.vmem [shape: f32[2,64], index: 6, kind: input, shape index: {}]   ;;  %s1925_s7 = inlined_call_operand.vmem [shape: bf16[96,32], index: 7, kind: output, shape index: {0}]   ;;  %s1926_s8 = inlined_call_operand.vmem [shape: bf16[96,32], index: 8, kind: output, shape index: {1}]  }
   0x1 LB: > { %s1276_s28 = sadd.s32 4294967295, %s1543_s27   ;;  %p1280_p0 = scmp.ge.s32.totalorder %s1543_s27, 1  ;;  %s1543_s27 = sphi %s1592_s27, %s19_s27  }
   0x2   : > { %p266_p1 = scmp.lt.s32.totalorder %s1543_s27, 3 }
   0x4   : > { %p267_p2 = pnand %p1280_p0, %p266_p1 }
   0x5   : > { %s305_s9 = smul.u32 (!%p267_p2), 6, %s1276_s28 }
   0x6   : > { %270 = sbr.rel (%p267_p2) target bundleno = 1864 (0x748), region = 48 }
   0x7   : > { %p306_p3 = scmp.lt.s32.totalorder (!%p267_p2), %s305_s9, 11 }
   0xb   : > { %v358_v0 = vld [vmem:[%s1919_s1] sm:$0xf]  ;;  %vm376_vm0 = vcmask 1043456   ;;  %v1545_v1 = vmov 0.0   ;;  %vm1546_vm1 = vmmov 0   ;;  %s1928_s9 = smov (!%p306_p3, %s305_s9), 11  ;;  %v362_v17 = vlaneseq }
   0xc   : > { %1387 = vmatprep.subr.bf16.mxu0 %v1545_v1  ;;  %v378_v2 = vsel %vm376_vm0, %v358_v0, 0  ;;  %1389 = vmatprep.mubr.msk.bf16.mxu0 %vm1546_vm1, %v1545_v1  ;;  %s1281_s10 = sshll.u32 %s1928_s9, 3  ;;  %vm366_vm2 = vcmask 64512   ;;  %v1499_v12 = vld [vmem:[%s1920_s2 + $0x8] sm:$0xff]   ;;  %v1500_v13 = vld [vmem:[%s1920_s2] sm:$0xff]   ;;  %v1501_v14 = vld [vmem:[%s1921_s3 + $0x18] sm:$0xff]  }
   0xd   : > { %1388 = vmatpush3.bf16.msra.mxu0 %v378_v2  ;;  %1401 = vmatprep.subr.bf16.mxu1 %v1545_v1  ;;  %s309_s13 = scalar_lea.vmem %s1918_s0, %s1281_s10  ;;  %v1502_v15 = vld [vmem:[%s1921_s3 + $0x10] sm:$0xff]   ;;  %v1503_v16 = vld [vmem:[%s1921_s3 + $0x8] sm:$0xff]   ;;  %v1642_v18 = vshrl.u32 %v362_v17, 7  ;;  %v1648_v20 = vld [vmem:[%s1923_s5] sm:$0xff]  ;;  %vm456_vm3 = vcmask 261120   ;;  %vm556_vm4 = vcmask 523264  }
   0xe   : > { %1405 = vmatprep.mubr.msk.bf16.mxu1 %vm1546_vm1, %v1545_v1  ;;  %1417 = vmatprep.subr.bf16.mxu0 %v1545_v1  ;;  %v352_v3 = vld [vmem:[%s309_s13] sm:$0xff]  ;;  %v353_v4 = vld [vmem:[%s309_s13 + $0x8] sm:$0xff]  ;;  %v354_v6 = vld [vmem:[%s309_s13 + $0x10] sm:$0xff]  ;;  %s1282_s22 = sshll.u32 %s1928_s9, 2  ;;  %vm1149_vm5 = vcmask 257024  }
   0xf   : > { %v359_v5 = vpack.c.bf16 %v353_v4, %v352_v3  ;;  %v355_v7 = vld [vmem:[%s309_s13 + $0x18] sm:$0xff]  ;;  %v356_v9 = vld [vmem:[%s309_s13 + $0x20] sm:$0xff]  ;;  %v357_v10 = vld [vmem:[%s309_s13 + $0x28] sm:$0xff]  ;;  %1402 = vmatpush3.bf16.msra.mxu1 %v1499_v12  ;;  %v364_v19 = vsub.s32 0, %v1642_v18  ;;  %s1828_s25 = scalar_lea.vmem %s1925_s7, %s1282_s22  ;;  %s321_s12 = scalar_lea.vmem %s1926_s8, %s1282_s22 }
  0x10   : > { %v360_v8 = vpack.c.bf16 %v355_v7, %v354_v6  ;;  %v361_v11 = vpack.c.bf16 %v357_v10, %v356_v9  ;;  %1403 = vmatprep.subr.bf16.mxu1 %v1545_v1  ;;  %v1504_v43 = vld [vmem:[%s1921_s3] sm:$0xff]   ;;  %v631_v10 = vsub.s32 1, %v1642_v18 }
  0x11   : > { %1390 = vmatmul.mubr.msk.bf16.vlgmr.msra.gmra.mxu0 %vm366_vm2, %v359_v5  ;;  %v365_v22 = vrot.slane %v1648_v20, %v364_v19  ;;  %v1685_v44 = vld [vmem:[%s1924_s6] sm:$0x3] }
  0x12   : > { %1393 = vmatprep.mubr.msk.bf16.mxu0 %vm1546_vm1, %v1545_v1  ;;  %1418 = vmatpush3.bf16.msra.mxu0 %v1501_v14  ;;  %v443_v45 = vrot.slane %v1685_v44, %v364_v19 }
  0x13   : > { %1404 = vmatpush3.bf16.msra.mxu1 %v1500_v13  ;;  %1419 = vmatprep.subr.bf16.mxu0 %v1545_v1 }
  0x14   : > { %1437 = vmatprep.subr.bf16.mxu1 %v1545_v1 }
  0x16   : > { %1420 = vmatpush3.bf16.msra.mxu0 %v1502_v15 }
  0x17   : > { %1421 = vmatprep.subr.bf16.mxu0 %v1545_v1 }
  0x19   : > { %1394 = vmatmul.mubr.msk.bf16.gmra.mxu0 %vm366_vm2, %v360_v8 }
  0x1a   : > { %1397 = vmatprep.mubr.msk.bf16.mxu0 %vm1546_vm1, %v1545_v1  ;;  %1422 = vmatpush3.bf16.msra.mxu0 %v1503_v16 }
  0x1b   : > { %1423 = vmatprep.subr.bf16.mxu0 %v1545_v1 }
  0x1e   : > { %1424 = vmatpush3.bf16.msra.mxu0 %v1504_v43 }
  0x1f   : > { %1453 = vmatprep.subr.bf16.mxu0 %v1545_v1 }
  0x21   : > { %1398 = vmatmul.mubr.msk.bf16.gmra.mxu0 %vm366_vm2, %v361_v11  ;;  %v632_v11 = vrot.slane %v1648_v20, %v631_v10 }
  0x22   : > { %1425 = vmatprep.mubr.msk.bf16.mxu0 %vm1546_vm1, %v1545_v1 }
  0xd1   : > { %v414_v21 = vpop.f32.mrf.mxu0 }
  0xd2   : > { %v1651_v25 = vadd.f32 %v414_v21, %v365_v22 }
  0xd3   : > { %v1391_v23 = vpop.f32.mrf.mxu0 }
  0xd5   : > { %v417_v24 = vpop.f32.mrf.mxu0 }
  0xd6   : > { %v1653_v26 = vadd.f32 %v417_v24, %v365_v22 }
  0xd7   : > { %v1392_v27 = vpop.f32.mrf.mxu0 }
  0xd8   : > { %v437_v28 = vpack.c.bf16 %v1653_v26, %v1651_v25 }
  0xd9   : > { %v422_v29 = vpop.f32.mrf.mxu0 }
  0xda   : > { %1406 = vmatmul.mubr.msk.bf16.vlgmr.msra.gmra.mxu1 %vm456_vm3, %v437_v28  ;;  %v1660_v32 = vadd.f32 %v422_v29, %v365_v22 }
  0xdb   : > { %v1395_v30 = vpop.f32.mrf.mxu0  ;;  %1409 = vmatprep.mubr.msk.bf16.mxu1 %vm1546_vm1, %v1545_v1 }
  0xdd   : > { %v425_v31 = vpop.f32.mrf.mxu0 }
  0xde   : > { %v1662_v33 = vadd.f32 %v425_v31, %v365_v22 }
  0xdf   : > { %v1396_v34 = vpop.f32.mrf.mxu0 }
  0xe0   : > { %v438_v35 = vpack.c.bf16 %v1662_v33, %v1660_v32 }
  0xe1   : > { %v430_v36 = vpop.f32.mrf.mxu0 }
  0xe2   : > { %1410 = vmatmul.mubr.msk.bf16.gmra.mxu1 %vm456_vm3, %v438_v35  ;;  %v1669_v39 = vadd.f32 %v430_v36, %v365_v22 }
  0xe3   : > { %v1399_v37 = vpop.f32.mrf.mxu0  ;;  %1413 = vmatprep.mubr.msk.bf16.mxu1 %vm1546_vm1, %v1545_v1 }
  0xe5   : > { %v433_v38 = vpop.f32.mrf.mxu0 }
  0xe6   : > { %v1671_v40 = vadd.f32 %v433_v38, %v365_v22 }
  0xe7   : > { %v1400_v41 = vpop.f32.mrf.mxu0 }
  0xe8   : > { %v439_v42 = vpack.c.bf16 %v1671_v40, %v1669_v39 }
  0xea   : > { %1414 = vmatmul.mubr.msk.bf16.gmra.mxu1 %vm456_vm3, %v439_v42 }
  0xeb   : > { %1441 = vmatprep.mubr.msk.bf16.mxu1 %vm1546_vm1, %v1545_v1 }
 0x19a   : > { %v500_v46 = vpop.f32.mrf.mxu1 }
 0x19b   : > { %v501_v48 = vadd.f32 %v500_v46, %v443_v45 }
 0x19c   : > { %v1407_v47 = vpop.f32.mrf.mxu1 }
 0x19d   : > { %v523_v52 = vmax.f32 %v501_v48, 0.0 }
 0x19e   : > { %v503_v49 = vpop.f32.mrf.mxu1 }
 0x19f   : > { %v504_v50 = vadd.f32 %v503_v49, %v443_v45 }
 0x1a0   : > { %v1408_v51 = vpop.f32.mrf.mxu1 }
 0x1a1   : > { %v524_v53 = vmax.f32 %v504_v50, 0.0 }
 0x1a2   : > { %v508_v54 = vpop.f32.mrf.mxu1 }
 0x1a3   : > { %v529_v55 = vpack.c.bf16 %v524_v53, %v523_v52  ;;  %v509_v57 = vadd.f32 %v508_v54, %v443_v45 }
 0x1a4   : > { %v1411_v56 = vpop.f32.mrf.mxu1 }
 0x1a5   : > { %1426 = vmatmul.mubr.msk.bf16.vlgmr.msra.gmra.mxu0 %vm556_vm4, %v529_v55  ;;  %v525_v61 = vmax.f32 %v509_v57, 0.0 }
 0x1a6   : > { %v511_v58 = vpop.f32.mrf.mxu1  ;;  %1429 = vmatprep.mubr.msk.bf16.mxu0 %vm1546_vm1, %v1545_v1 }
 0x1a7   : > { %v512_v59 = vadd.f32 %v511_v58, %v443_v45 }
 0x1a8   : > { %v1412_v60 = vpop.f32.mrf.mxu1 }
 0x1a9   : > { %v526_v62 = vmax.f32 %v512_v59, 0.0 }
 0x1aa   : > { %v516_v63 = vpop.f32.mrf.mxu1 }
 0x1ab   : > { %v530_v0 = vpack.c.bf16 %v526_v62, %v525_v61  ;;  %v517_v3 = vadd.f32 %v516_v63, %v443_v45 }
 0x1ac   : > { %v1415_v2 = vpop.f32.mrf.mxu1 }
 0x1ad   : > { %1430 = vmatmul.mubr.msk.bf16.gmra.mxu0 %vm556_vm4, %v530_v0  ;;  %v527_v7 = vmax.f32 %v517_v3, 0.0 }
 0x1ae   : > { %v519_v4 = vpop.f32.mrf.mxu1  ;;  %1433 = vmatprep.mubr.msk.bf16.mxu0 %vm1546_vm1, %v1545_v1 }
 0x1af   : > { %v520_v5 = vadd.f32 %v519_v4, %v443_v45 }
 0x1b0   : > { %v1416_v6 = vpop.f32.mrf.mxu1 }
 0x1b1   : > { %v528_v8 = vmax.f32 %v520_v5, 0.0 }
 0x1b3   : > { %v531_v9 = vpack.c.bf16 %v528_v8, %v527_v7 }
 0x1b5   : > { %1434 = vmatmul.mubr.msk.bf16.gmra.mxu0 %vm556_vm4, %v531_v9 }
 0x1b6   : > { %1461 = vmatprep.mubr.msk.bf16.mxu0 %vm1546_vm1, %v1545_v1 }
 0x265   : > { %v600_v12 = vpop.f32.mrf.mxu0 }
 0x266   : > { %v623_v13 = vadd.f32 %v600_v12, %v1651_v25 }
 0x267   : > { %v1427_v14 = vpop.f32.mrf.mxu0 }
 0x268   : > { %v1702_v15 = vadd.f32 %v632_v11, %v623_v13  ;;  %v1505_v13 = vld [vmem:[%s1920_s2 + $0x18] sm:$0xff]   ;;  %v1506_v14 = vld [vmem:[%s1920_s2 + $0x10] sm:$0xff]  }
 0x269   : > { %v603_v16 = vpop.f32.mrf.mxu0  ;;  %1438 = vmatpush3.bf16.msra.mxu1 %v1505_v13 }
 0x26a   : > { %v624_v17 = vadd.f32 %v603_v16, %v1653_v26  ;;  %v639_v19 = vsel %vm456_vm3, %v1702_v15, 0.0  ;;  %1439 = vmatprep.subr.bf16.mxu1 %v1545_v1  ;;  %v1507_v16 = vld [vmem:[%s1921_s3 + $0x38] sm:$0xff]  }
 0x26b   : > { %640 = vadd.xlane.f32.xlu0 %v639_v19  ;;  %v1428_v21 = vpop.f32.mrf.mxu0  ;;  %1454 = vmatpush3.bf16.msra.mxu0 %v1507_v16  ;;  %v1509_v19 = vld [vmem:[%s1921_s3 + $0x28] sm:$0xff]  }
 0x26c   : > { %v1707_v22 = vadd.f32 %v632_v11, %v624_v17  ;;  %v1508_v17 = vld [vmem:[%s1921_s3 + $0x30] sm:$0xff]   ;;  %1455 = vmatprep.subr.bf16.mxu0 %v1545_v1 }
 0x26d   : > { %v608_v23 = vpop.f32.mrf.mxu0  ;;  %1440 = vmatpush3.bf16.msra.mxu1 %v1506_v14 }
 0x26e   : > { %v625_v24 = vadd.f32 %v608_v23, %v1660_v32  ;;  %v642_v27 = vsel %vm456_vm3, %v1707_v22, 0.0  ;;  %1473 = vmatprep.subr.bf16.mxu1 %v1545_v1 }
 0x26f   : > { %643 = vadd.xlane.f32.xlu0 %v642_v27  ;;  %v1431_v25 = vpop.f32.mrf.mxu0  ;;  %1456 = vmatpush3.bf16.msra.mxu0 %v1508_v17 }
 0x270   : > { %v1712_v28 = vadd.f32 %v632_v11, %v625_v24  ;;  %1457 = vmatprep.subr.bf16.mxu0 %v1545_v1 }
 0x271   : > { %v611_v29 = vpop.f32.mrf.mxu0 }
 0x272   : > { %v626_v26 = vadd.f32 %v611_v29, %v1662_v33  ;;  %v645_v30 = vsel %vm456_vm3, %v1712_v28, 0.0 }
 0x273   : > { %646 = vadd.xlane.f32.xlu1 %v645_v30  ;;  %v1432_v31 = vpop.f32.mrf.mxu0  ;;  %1458 = vmatpush3.bf16.msra.mxu0 %v1509_v19 }
 0x274   : > { %v1717_v34 = vadd.f32 %v632_v11, %v626_v26  ;;  %1459 = vmatprep.subr.bf16.mxu0 %v1545_v1 }
 0x275   : > { %v616_v35 = vpop.f32.mrf.mxu0 }
 0x276   : > { %v627_v32 = vadd.f32 %v616_v35, %v1669_v39  ;;  %v648_v36 = vsel %vm456_vm3, %v1717_v34, 0.0 }
 0x277   : > { %649 = vadd.xlane.f32.xlu1 %v648_v36  ;;  %v1435_v37 = vpop.f32.mrf.mxu0  ;;  %v720_v36 = vsub.s32 2, %v1642_v18 }
 0x278   : > { %v1722_v38 = vadd.f32 %v632_v11, %v627_v32 }
 0x279   : > { %v619_v41 = vpop.f32.mrf.mxu0 }
 0x27a   : > { %v628_v33 = vadd.f32 %v619_v41, %v1671_v40  ;;  %v651_v42 = vsel %vm456_vm3, %v1722_v38, 0.0 }
 0x27b   : > { %652 = vadd.xlane.f32.xlu0 %v651_v42  ;;  %v1436_v43 = vpop.f32.mrf.mxu0 }
 0x27c   : > { %v1727_v45 = vadd.f32 %v632_v11, %v628_v33  ;;  %v721_v43 = vrot.slane %v1648_v20, %v720_v36 }
 0x27e   : > { %v654_v39 = vsel %vm456_vm3, %v1727_v45, 0.0 }
 0x27f   : > { %655 = vadd.xlane.f32.xlu1 %v654_v39 }
 0x2f4   : > { %v641_v46 = vpop.xlane.xlu0 %640 }
 0x2f5   : > { %v658_v47 = vmul.f32 0.03125, %v641_v46 }
 0x2f7   : > { %v1732_v48 = vsub.f32 %v1702_v15, %v658_v47  ;;  %v730_v47 = vsub.s32 3, %v1642_v18 }
 0x2f8   : > { %v644_v49 = vpop.xlane.xlu0 %643 }
 0x2f9   : > { %v659_v50 = vmul.f32 0.03125, %v644_v49  ;;  %v670_v40 = vmul.f32 %v1732_v48, %v1732_v48 }
 0x2fb   : > { %v1737_v51 = vsub.f32 %v1707_v22, %v659_v50  ;;  %v676_v52 = vsel %vm456_vm3, %v670_v40, 0.0 }
 0x2fc   : > { %v647_v53 = vpop.xlane.xlu1 %646  ;;  %677 = vadd.xlane.f32.xlu0 %v676_v52 }
 0x2fd   : > { %v660_v54 = vmul.f32 0.03125, %v647_v53  ;;  %v671_v55 = vmul.f32 %v1737_v51, %v1737_v51 }
 0x2ff   : > { %v1743_v56 = vsub.f32 %v1712_v28, %v660_v54  ;;  %v679_v57 = vsel %vm456_vm3, %v671_v55, 0.0  ;;  %v731_v55 = vrot.slane %v1648_v20, %v730_v47 }
 0x300   : > { %v650_v58 = vpop.xlane.xlu1 %649  ;;  %680 = vadd.xlane.f32.xlu1 %v679_v57 }
 0x301   : > { %v661_v59 = vmul.f32 0.03125, %v650_v58  ;;  %v672_v60 = vmul.f32 %v1743_v56, %v1743_v56 }
 0x303   : > { %v1749_v61 = vsub.f32 %v1717_v34, %v661_v59  ;;  %v682_v62 = vsel %vm456_vm3, %v672_v60, 0.0 }
 0x304   : > { %683 = vadd.xlane.f32.xlu0 %v682_v62  ;;  %v653_v63 = vpop.xlane.xlu0 %652 }
 0x305   : > { %v662_v0 = vmul.f32 0.03125, %v653_v63  ;;  %v673_v2 = vmul.f32 %v1749_v61, %v1749_v61 }
 0x307   : > { %v1755_v3 = vsub.f32 %v1722_v38, %v662_v0  ;;  %v685_v4 = vsel %vm456_vm3, %v673_v2, 0.0 }
 0x308   : > { %686 = vadd.xlane.f32.xlu1 %v685_v4  ;;  %v656_v5 = vpop.xlane.xlu1 %655 }
 0x309   : > { %v663_v6 = vmul.f32 0.03125, %v656_v5  ;;  %v674_v7 = vmul.f32 %v1755_v3, %v1755_v3 }
 0x30b   : > { %v1761_v8 = vsub.f32 %v1727_v45, %v663_v6  ;;  %v688_v9 = vsel %vm456_vm3, %v674_v7, 0.0 }
 0x30c   : > { %689 = vadd.xlane.f32.xlu0 %v688_v9 }
 0x30d   : > { %v675_v11 = vmul.f32 %v1761_v8, %v1761_v8 }
 0x30f   : > { %v691_v12 = vsel %vm456_vm3, %v675_v11, 0.0 }
 0x310   : > { %692 = vadd.xlane.f32.xlu1 %v691_v12 }
 0x385   : > { %v678_v21 = vpop.xlane.xlu0 %677 }
 0x386   : > { %v694_v23 = vmul.f32 0.03125, %v678_v21 }
 0x388   : > { %v700_v24 = vadd.f32 1e-05, %v694_v23 }
 0x389   : > { %v681_v27 = vpop.xlane.xlu1 %680 }
 0x38a   : > { %1513 = vrsqrt.f32 %v700_v24  ;;  %v695_v25 = vmul.f32 0.03125, %v681_v27 }
 0x38c   : > { %v701_v29 = vadd.f32 1e-05, %v695_v25 }
 0x38d   : > { %v684_v26 = vpop.xlane.xlu0 %683 }
 0x38e   : > { %1515 = vrsqrt.f32 %v701_v29  ;;  %v696_v30 = vmul.f32 0.03125, %v684_v26 }
 0x390   : > { %v702_v31 = vadd.f32 1e-05, %v696_v30 }
 0x391   : > { %v687_v35 = vpop.xlane.xlu1 %686 }
 0x392   : > { %1517 = vrsqrt.f32 %v702_v31  ;;  %v697_v32 = vmul.f32 0.03125, %v687_v35 }
 0x394   : > { %v703_v37 = vadd.f32 1e-05, %v697_v32 }
 0x395   : > { %v690_v41 = vpop.xlane.xlu0 %689 }
 0x396   : > { %1519 = vrsqrt.f32 %v703_v37  ;;  %v698_v33 = vmul.f32 0.03125, %v690_v41 }
 0x397   : > { %v1514_v42 = vpop.eup %1513 }
 0x398   : > { %v712_v39 = vmul.f32 %v1514_v42, %v1732_v48  ;;  %v704_v46 = vadd.f32 1e-05, %v698_v33 }
 0x399   : > { %v693_v49 = vpop.xlane.xlu1 %692 }
 0x39a   : > { %1521 = vrsqrt.f32 %v704_v46  ;;  %v699_v50 = vmul.f32 0.03125, %v693_v49  ;;  %v722_v52 = vmul.f32 %v721_v43, %v712_v39 }
 0x39b   : > { %v1516_v40 = vpop.eup %1515 }
 0x39c   : > { %v713_v53 = vmul.f32 %v1516_v40, %v1737_v51  ;;  %v705_v54 = vadd.f32 1e-05, %v699_v50  ;;  %v732_v59 = vadd.f32 %v731_v55, %v722_v52  ;;  %v930_v52 = vsub.s32 4, %v1642_v18 }
 0x39e   : > { %v723_v57 = vmul.f32 %v721_v43, %v713_v53  ;;  %1523 = vrsqrt.f32 %v705_v54  ;;  %v931_v53 = vrot.slane %v1648_v20, %v930_v52 }
 0x39f   : > { %v1518_v58 = vpop.eup %1517 }
 0x3a0   : > { %v733_v60 = vadd.f32 %v731_v55, %v723_v57  ;;  %v714_v48 = vmul.f32 %v1518_v58, %v1743_v56 }
 0x3a2   : > { %v738_v62 = vpack.c.bf16 %v733_v60, %v732_v59  ;;  %v724_v2 = vmul.f32 %v721_v43, %v714_v48 }
 0x3a3   : > { %v1520_v63 = vpop.eup %1519 }
 0x3a4   : > { %1442 = vmatmul.mubr.msk.bf16.vlgmr.msra.gmra.mxu1 %vm456_vm3, %v738_v62  ;;  %v715_v0 = vmul.f32 %v1520_v63, %v1749_v61  ;;  %v734_v5 = vadd.f32 %v731_v55, %v724_v2 }
 0x3a5   : > { %1445 = vmatprep.mubr.msk.bf16.mxu1 %vm1546_vm1, %v1545_v1 }
 0x3a6   : > { %v725_v51 = vmul.f32 %v721_v43, %v715_v0 }
 0x3a7   : > { %v1522_v4 = vpop.eup %1521 }
 0x3a8   : > { %v735_v6 = vadd.f32 %v731_v55, %v725_v51  ;;  %v716_v7 = vmul.f32 %v1522_v4, %v1755_v3  ;;  %v1510_v3 = vld [vmem:[%s1921_s3 + $0x20] sm:$0xff]  }
 0x3a9   : > { %1460 = vmatpush3.bf16.msra.mxu0 %v1510_v3 }
 0x3aa   : > { %v739_v9 = vpack.c.bf16 %v735_v6, %v734_v5  ;;  %v726_v12 = vmul.f32 %v721_v43, %v716_v7 }
 0x3ab   : > { %v1524_v11 = vpop.eup %1523 }
 0x3ac   : > { %1446 = vmatmul.mubr.msk.bf16.gmra.mxu1 %vm456_vm3, %v739_v9  ;;  %v717_v56 = vmul.f32 %v1524_v11, %v1761_v8  ;;  %v736_v13 = vadd.f32 %v731_v55, %v726_v12  ;;  %v744_v8 = vrot.slane %v1685_v44, %v631_v10 }
 0x3ad   : > { %1449 = vmatprep.mubr.msk.bf16.mxu1 %vm1546_vm1, %v1545_v1 }
 0x3ae   : > { %v727_v61 = vmul.f32 %v721_v43, %v717_v56 }
 0x3b0   : > { %v737_v14 = vadd.f32 %v731_v55, %v727_v61 }
 0x3b2   : > { %v740_v16 = vpack.c.bf16 %v737_v14, %v736_v13 }
 0x3b4   : > { %1450 = vmatmul.mubr.msk.bf16.gmra.mxu1 %vm456_vm3, %v740_v16 }
 0x3b5   : > { %1477 = vmatprep.mubr.msk.bf16.mxu1 %vm1546_vm1, %v1545_v1 }
 0x464   : > { %v800_v17 = vpop.f32.mrf.mxu1 }
 0x465   : > { %v801_v21 = vadd.f32 %v800_v17, %v744_v8 }
 0x466   : > { %v1443_v19 = vpop.f32.mrf.mxu1 }
 0x467   : > { %v823_v25 = vmax.f32 %v801_v21, 0.0 }
 0x468   : > { %v803_v23 = vpop.f32.mrf.mxu1 }
 0x469   : > { %v804_v24 = vadd.f32 %v803_v23, %v744_v8 }
 0x46a   : > { %v1444_v27 = vpop.f32.mrf.mxu1 }
 0x46b   : > { %v824_v29 = vmax.f32 %v804_v24, 0.0 }
 0x46c   : > { %v808_v26 = vpop.f32.mrf.mxu1 }
 0x46d   : > { %v829_v30 = vpack.c.bf16 %v824_v29, %v823_v25  ;;  %v809_v35 = vadd.f32 %v808_v26, %v744_v8 }
 0x46e   : > { %v1447_v31 = vpop.f32.mrf.mxu1 }
 0x46f   : > { %1462 = vmatmul.mubr.msk.bf16.vlgmr.msra.gmra.mxu0 %vm556_vm4, %v829_v30  ;;  %v825_v10 = vmax.f32 %v809_v35, 0.0 }
 0x470   : > { %v811_v32 = vpop.f32.mrf.mxu1  ;;  %1465 = vmatprep.mubr.msk.bf16.mxu0 %vm1546_vm1, %v1545_v1 }
 0x471   : > { %v812_v36 = vadd.f32 %v811_v32, %v744_v8 }
 0x472   : > { %v1448_v44 = vpop.f32.mrf.mxu1 }
 0x473   : > { %v826_v37 = vmax.f32 %v812_v36, 0.0 }
 0x474   : > { %v816_v41 = vpop.f32.mrf.mxu1 }
 0x475   : > { %v830_v33 = vpack.c.bf16 %v826_v37, %v825_v10  ;;  %v817_v43 = vadd.f32 %v816_v41, %v744_v8 }
 0x476   : > { %v1451_v42 = vpop.f32.mrf.mxu1 }
 0x477   : > { %1466 = vmatmul.mubr.msk.bf16.gmra.mxu0 %vm556_vm4, %v830_v33  ;;  %v827_v49 = vmax.f32 %v817_v43, 0.0 }
 0x478   : > { %v819_v39 = vpop.f32.mrf.mxu1  ;;  %1469 = vmatprep.mubr.msk.bf16.mxu0 %vm1546_vm1, %v1545_v1 }
 0x479   : > { %v820_v46 = vadd.f32 %v819_v39, %v744_v8 }
 0x47a   : > { %v1452_v47 = vpop.f32.mrf.mxu1 }
 0x47b   : > { %v828_v50 = vmax.f32 %v820_v46, 0.0 }
 0x47d   : > { %v831_v40 = vpack.c.bf16 %v828_v50, %v827_v49 }
 0x47f   : > { %1470 = vmatmul.mubr.msk.bf16.gmra.mxu0 %vm556_vm4, %v831_v40 }
 0x52f   : > { %v899_v54 = vpop.f32.mrf.mxu0 }
 0x530   : > { %v922_v55 = vadd.f32 %v899_v54, %v1702_v15 }
 0x531   : > { %v1463_v57 = vpop.f32.mrf.mxu0 }
 0x532   : > { %v932_v58 = vadd.f32 %v931_v53, %v922_v55 }
 0x533   : > { %v902_v59 = vpop.f32.mrf.mxu0 }
 0x534   : > { %v1342_v60 = vpack.c.bf16 %v932_v58, %v932_v58  ;;  %v923_v48 = vadd.f32 %v902_v59, %v1707_v22  ;;  %v938_v62 = vsel %vm456_vm3, %v932_v58, 0.0 }
 0x535   : > { %939 = vadd.xlane.f32.xlu0 %v938_v62  ;;  %v1464_v63 = vpop.f32.mrf.mxu0 }
 0x536   : > { %1150 = vst.msk [vmem:[%s1828_s25] sm:$0xf] %vm1149_vm5, %v1342_v60  ;;  %v933_v15 = vadd.f32 %v931_v53, %v923_v48  ;;  %v1511_v60 = vld [vmem:[%s1922_s4 + $0x8] sm:$0xff]   ;;  %v1512_v48 = vld [vmem:[%s1922_s4] sm:$0xff]  }
 0x537   : > { %v907_v0 = vpop.f32.mrf.mxu0  ;;  %1474 = vmatpush3.bf16.msra.mxu1 %v1511_v60 }
 0x538   : > { %v1343_v2 = vpack.c.bf16 %v933_v15, %v933_v15  ;;  %v924_v51 = vadd.f32 %v907_v0, %v1712_v28  ;;  %v941_v4 = vsel %vm456_vm3, %v933_v15, 0.0  ;;  %1475 = vmatprep.subr.bf16.mxu1 %v1545_v1 }
 0x539   : > { %942 = vadd.xlane.f32.xlu1 %v941_v4  ;;  %v1467_v5 = vpop.f32.mrf.mxu0 }
 0x53a   : > { %1151 = vst.msk [vmem:[%s1828_s25 + $0x4] sm:$0xf] %vm1149_vm5, %v1343_v2  ;;  %v934_v22 = vadd.f32 %v931_v53, %v924_v51 }
 0x53b   : > { %v910_v6 = vpop.f32.mrf.mxu0  ;;  %1476 = vmatpush3.bf16.msra.mxu1 %v1512_v48 }
 0x53c   : > { %v1344_v7 = vpack.c.bf16 %v934_v22, %v934_v22  ;;  %v925_v9 = vadd.f32 %v910_v6, %v1717_v34  ;;  %v944_v11 = vsel %vm456_vm3, %v934_v22, 0.0 }
 0x53d   : > { %945 = vadd.xlane.f32.xlu0 %v944_v11  ;;  %v1468_v56 = vpop.f32.mrf.mxu0 }
 0x53e   : > { %1152 = vst.msk [vmem:[%s1828_s25 + $0x8] sm:$0xf] %vm1149_vm5, %v1344_v7  ;;  %v935_v28 = vadd.f32 %v931_v53, %v925_v9  ;;  %v1018_v9 = vsub.s32 5, %v1642_v18 }
 0x53f   : > { %v915_v12 = vpop.f32.mrf.mxu0 }
 0x540   : > { %v1345_v61 = vpack.c.bf16 %v935_v28, %v935_v28  ;;  %v926_v13 = vadd.f32 %v915_v12, %v1722_v38  ;;  %v947_v14 = vsel %vm456_vm3, %v935_v28, 0.0 }
 0x541   : > { %948 = vadd.xlane.f32.xlu1 %v947_v14  ;;  %v1471_v16 = vpop.f32.mrf.mxu0 }
 0x542   : > { %1153 = vst.msk [vmem:[%s1828_s25 + $0xc] sm:$0xf] %vm1149_vm5, %v1345_v61  ;;  %v936_v34 = vadd.f32 %v931_v53, %v926_v13  ;;  %v1019_v61 = vrot.slane %v1648_v20, %v1018_v9  ;;  %v1028_v16 = vsub.s32 6, %v1642_v18 }
 0x543   : > { %v918_v3 = vpop.f32.mrf.mxu0 }
 0x544   : > { %v1346_v8 = vpack.c.bf16 %v936_v34, %v936_v34  ;;  %v927_v17 = vadd.f32 %v918_v3, %v1727_v45  ;;  %v950_v19 = vsel %vm456_vm3, %v936_v34, 0.0 }
 0x545   : > { %951 = vadd.xlane.f32.xlu0 %v950_v19  ;;  %v1472_v21 = vpop.f32.mrf.mxu0 }
 0x546   : > { %1154 = vst.msk [vmem:[%s1828_s25 + $0x10] sm:$0xf] %vm1149_vm5, %v1346_v8  ;;  %v937_v23 = vadd.f32 %v931_v53, %v927_v17 }
 0x548   : > { %v1347_v38 = vpack.c.bf16 %v937_v23, %v937_v23  ;;  %v953_v24 = vsel %vm456_vm3, %v937_v23, 0.0 }
 0x549   : > { %954 = vadd.xlane.f32.xlu1 %v953_v24 }
 0x54a   : > { %1155 = vst.msk [vmem:[%s1828_s25 + $0x14] sm:$0xf] %vm1149_vm5, %v1347_v38 }
 0x5be   : > { %v940_v27 = vpop.xlane.xlu0 %939 }
 0x5bf   : > { %v956_v25 = vmul.f32 0.03125, %v940_v27 }
 0x5c1   : > { %v962_v29 = vsub.f32 %v932_v58, %v956_v25 }
 0x5c2   : > { %v943_v26 = vpop.xlane.xlu1 %942 }
 0x5c3   : > { %v957_v30 = vmul.f32 0.03125, %v943_v26  ;;  %v968_v31 = vmul.f32 %v962_v29, %v962_v29 }
 0x5c5   : > { %v1853_v45 = vsub.f32 %v933_v15, %v957_v30  ;;  %v974_v35 = vsel %vm456_vm3, %v968_v31, 0.0 }
 0x5c6   : > { %v946_v32 = vpop.xlane.xlu0 %945  ;;  %975 = vadd.xlane.f32.xlu0 %v974_v35 }
 0x5c7   : > { %v958_v36 = vmul.f32 0.03125, %v946_v32  ;;  %v969_v44 = vmul.f32 %v1853_v45, %v1853_v45 }
 0x5c9   : > { %v1858_v10 = vsub.f32 %v934_v22, %v958_v36  ;;  %v977_v37 = vsel %vm456_vm3, %v969_v44, 0.0 }
 0x5ca   : > { %v949_v41 = vpop.xlane.xlu1 %948  ;;  %978 = vadd.xlane.f32.xlu1 %v977_v37 }
 0x5cb   : > { %v959_v33 = vmul.f32 0.03125, %v949_v41  ;;  %v970_v42 = vmul.f32 %v1858_v10, %v1858_v10 }
 0x5cd   : > { %v1863_v43 = vsub.f32 %v935_v28, %v959_v33  ;;  %v980_v39 = vsel %vm456_vm3, %v970_v42, 0.0 }
 0x5ce   : > { %981 = vadd.xlane.f32.xlu0 %v980_v39  ;;  %v952_v46 = vpop.xlane.xlu0 %951 }
 0x5cf   : > { %v960_v47 = vmul.f32 0.03125, %v952_v46  ;;  %v971_v49 = vmul.f32 %v1863_v43, %v1863_v43 }
 0x5d1   : > { %v1868_v50 = vsub.f32 %v936_v34, %v960_v47  ;;  %v983_v40 = vsel %vm456_vm3, %v971_v49, 0.0  ;;  %v1045_v49 = vsub.s32 7, %v1642_v18 }
 0x5d2   : > { %984 = vadd.xlane.f32.xlu1 %v983_v40  ;;  %v955_v52 = vpop.xlane.xlu1 %954 }
 0x5d3   : > { %v961_v53 = vmul.f32 0.03125, %v955_v52  ;;  %v972_v54 = vmul.f32 %v1868_v50, %v1868_v50 }
 0x5d5   : > { %v1873_v55 = vsub.f32 %v937_v23, %v961_v53  ;;  %v986_v57 = vsel %vm456_vm3, %v972_v54, 0.0  ;;  %v1029_v23 = vrot.slane %v1648_v20, %v1028_v16 }
 0x5d6   : > { %987 = vadd.xlane.f32.xlu0 %v986_v57 }
 0x5d7   : > { %v973_v58 = vmul.f32 %v1873_v55, %v1873_v55 }
 0x5d9   : > { %v989_v59 = vsel %vm456_vm3, %v973_v58, 0.0 }
 0x5da   : > { %990 = vadd.xlane.f32.xlu1 %v989_v59 }
 0x64f   : > { %v976_v62 = vpop.xlane.xlu0 %975 }
 0x650   : > { %v992_v63 = vmul.f32 0.03125, %v976_v62 }
 0x652   : > { %v998_v15 = vadd.f32 1e-05, %v992_v63 }
 0x653   : > { %v979_v0 = vpop.xlane.xlu1 %978 }
 0x654   : > { %1525 = vrsqrt.f32 %v998_v15  ;;  %v993_v2 = vmul.f32 0.03125, %v979_v0 }
 0x656   : > { %v999_v51 = vadd.f32 1e-05, %v993_v2 }
 0x657   : > { %v982_v4 = vpop.xlane.xlu0 %981 }
 0x658   : > { %1527 = vrsqrt.f32 %v999_v51  ;;  %v994_v5 = vmul.f32 0.03125, %v982_v4 }
 0x65a   : > { %v1000_v22 = vadd.f32 1e-05, %v994_v5 }
 0x65b   : > { %v985_v6 = vpop.xlane.xlu1 %984 }
 0x65c   : > { %1529 = vrsqrt.f32 %v1000_v22  ;;  %v995_v7 = vmul.f32 0.03125, %v985_v6 }
 0x65e   : > { %v1001_v11 = vadd.f32 1e-05, %v995_v7 }
 0x65f   : > { %v988_v56 = vpop.xlane.xlu0 %987 }
 0x660   : > { %1531 = vrsqrt.f32 %v1001_v11  ;;  %v996_v28 = vmul.f32 0.03125, %v988_v56 }
 0x661   : > { %v1526_v12 = vpop.eup %1525 }
 0x662   : > { %v1010_v13 = vmul.f32 %v1526_v12, %v962_v29  ;;  %v1002_v14 = vadd.f32 1e-05, %v996_v28 }
 0x663   : > { %v991_v34 = vpop.xlane.xlu1 %990 }
 0x664   : > { %1533 = vrsqrt.f32 %v1002_v14  ;;  %v997_v3 = vmul.f32 0.03125, %v991_v34  ;;  %v1020_v17 = vmul.f32 %v1019_v61, %v1010_v13 }
 0x665   : > { %v1528_v8 = vpop.eup %1527 }
 0x666   : > { %v1011_v19 = vmul.f32 %v1528_v8, %v1853_v45  ;;  %v1003_v21 = vadd.f32 1e-05, %v997_v3  ;;  %v1030_v27 = vadd.f32 %v1029_v23, %v1020_v17 }
 0x668   : > { %v1021_v38 = vmul.f32 %v1019_v61, %v1011_v19  ;;  %1535 = vrsqrt.f32 %v1003_v21 }
 0x669   : > { %v1530_v24 = vpop.eup %1529 }
 0x66a   : > { %v1031_v25 = vadd.f32 %v1029_v23, %v1021_v38  ;;  %v1012_v29 = vmul.f32 %v1530_v24, %v1858_v10 }
 0x66c   : > { %v1040_v26 = vpack.c.bf16 %v1031_v25, %v1030_v27  ;;  %v1022_v35 = vmul.f32 %v1019_v61, %v1012_v29 }
 0x66d   : > { %v1532_v30 = vpop.eup %1531 }
 0x66e   : > { %1478 = vmatmul.mubr.msk.bf16.vlgmr.msra.gmra.mxu1 %vm456_vm3, %v1040_v26  ;;  %v1013_v31 = vmul.f32 %v1532_v30, %v1863_v43  ;;  %v1032_v36 = vadd.f32 %v1029_v23, %v1022_v35 }
 0x66f   : > { %1481 = vmatprep.mubr.msk.bf16.mxu1 %vm1546_vm1, %v1545_v1 }
 0x670   : > { %v1023_v45 = vmul.f32 %v1019_v61, %v1013_v31 }
 0x671   : > { %v1534_v32 = vpop.eup %1533 }
 0x672   : > { %v1033_v44 = vadd.f32 %v1029_v23, %v1023_v45  ;;  %v1014_v37 = vmul.f32 %v1534_v32, %v1868_v50  ;;  %v1046_v50 = vrot.slane %v1648_v20, %v1045_v49 }
 0x674   : > { %v1041_v41 = vpack.c.bf16 %v1033_v44, %v1032_v36  ;;  %v1024_v42 = vmul.f32 %v1019_v61, %v1014_v37 }
 0x675   : > { %v1536_v33 = vpop.eup %1535 }
 0x676   : > { %1482 = vmatmul.mubr.msk.bf16.gmra.mxu1 %vm456_vm3, %v1041_v41  ;;  %v1015_v10 = vmul.f32 %v1536_v33, %v1873_v55  ;;  %v1034_v39 = vadd.f32 %v1029_v23, %v1024_v42 }
 0x677   : > { %1485 = vmatprep.mubr.msk.bf16.mxu1 %vm1546_vm1, %v1545_v1 }
 0x678   : > { %v1025_v43 = vmul.f32 %v1019_v61, %v1015_v10 }
 0x67a   : > { %v1035_v46 = vadd.f32 %v1029_v23, %v1025_v43 }
 0x67c   : > { %v1042_v47 = vpack.c.bf16 %v1035_v46, %v1034_v39 }
 0x67e   : > { %1486 = vmatmul.mubr.msk.bf16.gmra.mxu1 %vm456_vm3, %v1042_v47 }
 0x72e   : > { %v1102_v40 = vpop.f32.mrf.mxu1 }
 0x72f   : > { %v1103_v52 = vadd.f32 %v1102_v40, %v1046_v50 }
 0x730   : > { %v1479_v53 = vpop.f32.mrf.mxu1 }
 0x731   : > { %v1348_v54 = vpack.c.bf16 %v1103_v52, %v1103_v52 }
 0x732   : > { %v1105_v1 = vpop.f32.mrf.mxu1 }
 0x733   : > { %1180 = vst.msk [vmem:[%s321_s12] sm:$0xf] %vm1149_vm5, %v1348_v54  ;;  %v1106_v55 = vadd.f32 %v1105_v1, %v1046_v50 }
 0x734   : > { %v1480_v57 = vpop.f32.mrf.mxu1 }
 0x735   : > { %v1349_v58 = vpack.c.bf16 %v1106_v55, %v1106_v55 }
 0x736   : > { %v1110_v59 = vpop.f32.mrf.mxu1 }
 0x737   : > { %1181 = vst.msk [vmem:[%s321_s12 + $0x4] sm:$0xf] %vm1149_vm5, %v1349_v58  ;;  %v1111_v18 = vadd.f32 %v1110_v59, %v1046_v50 }
 0x738   : > { %v1483_v20 = vpop.f32.mrf.mxu1 }
 0x739   : > { %v1350_v60 = vpack.c.bf16 %v1111_v18, %v1111_v18 }
 0x73a   : > { %v1113_v48 = vpop.f32.mrf.mxu1 }
 0x73b   : > { %1182 = vst.msk [vmem:[%s321_s12 + $0x8] sm:$0xf] %vm1149_vm5, %v1350_v60  ;;  %v1114_v62 = vadd.f32 %v1113_v48, %v1046_v50 }
 0x73c   : > { %v1484_v63 = vpop.f32.mrf.mxu1 }
 0x73d   : > { %v1351_v15 = vpack.c.bf16 %v1114_v62, %v1114_v62 }
 0x73e   : > { %v1118_v0 = vpop.f32.mrf.mxu1 }
 0x73f   : > { %1183 = vst.msk [vmem:[%s321_s12 + $0xc] sm:$0xf] %vm1149_vm5, %v1351_v15  ;;  %v1119_v2 = vadd.f32 %v1118_v0, %v1046_v50 }
 0x740   : > { %v1487_v51 = vpop.f32.mrf.mxu1 }
 0x741   : > { %v1352_v4 = vpack.c.bf16 %v1119_v2, %v1119_v2 }
 0x742   : > { %v1121_v5 = vpop.f32.mrf.mxu1 }
 0x743   : > { %1184 = vst.msk [vmem:[%s321_s12 + $0x10] sm:$0xf] %vm1149_vm5, %v1352_v4  ;;  %v1122_v22 = vadd.f32 %v1121_v5, %v1046_v50 }
 0x744   : > { %v1488_v6 = vpop.f32.mrf.mxu1 }
 0x745   : > { %v1353_v7 = vpack.c.bf16 %v1122_v22, %v1122_v22 }
 0x747   : > { %1185 = vst.msk [vmem:[%s321_s12 + $0x14] sm:$0xf] %vm1149_vm5, %v1353_v7 }
 0x748 PF: > { %s19_s27 = sadd.s32 1, %s1543_s27  }
 0x749   : > { %p16_p4 = scmp.ge.s32.totalorder %s19_s27, 4  }
 0x74b   :  { %18 = sbr.rel (!%p16_p4) target bundleno = 1 (0x1), region = 92 }

// kernel: tabr_forward.5
= control target key start
LH: loop header
LB: loop body
LE: loop exit
PB: predicated region body
PF: predicated region fallthrough
CT: control target
= control target key end

     0   :  { %vm87_vm0 = vcmask 130048   ;;  %v125_v0 = vlaneseq  ;;  %v2395_v3 = vmov 1966171168   ;;  %vm530_vm1 = vcmask 261120   ;;  %s3104_s4 = inlined_call_operand.vmem [shape: f32[16,16], index: 4, kind: input, shape index: {}]   ;;  %s3105_s5 = inlined_call_operand.vmem [shape: bf16[3,32,64], index: 5, kind: input, shape index: {}]   ;;  %s3106_s1 = inlined_call_operand.vmem [shape: bf16[16,32], index: 1, kind: input, shape index: {}]   ;;  %s3107_s2 = inlined_call_operand.vmem [shape: bf16[16,16,32], index: 2, kind: input, shape index: {}]   ;;  %s3108_s6 = inlined_call_operand.vmem [shape: bf16[3,64,32], index: 6, kind: input, shape index: {}]   ;;  %s3109_s9 = inlined_call_operand.vmem [shape: f32[3,64], index: 9, kind: input, shape index: {}]   ;;  %s3110_s3 = inlined_call_operand.vmem [shape: bf16[16,16,32], index: 3, kind: input, shape index: {}]   ;;  %s3111_s0 = inlined_call_operand.vmem [shape: bf16[16,32], index: 0, kind: input, shape index: {}]   ;;  %s3112_s8 = inlined_call_operand.vmem [shape: f32[8,32], index: 8, kind: input, shape index: {}]   ;;  %s3113_s7 = inlined_call_operand.vmem [shape: f32[33,128], index: 7, kind: input, shape index: {}]   ;;  %s3114_s10 = inlined_call_operand.vmem [shape: f32[16,128], index: 10, kind: output, shape index: {}]  }
   0x1   :  { %v2456_v1 = vld [vmem:[%s3104_s4] sm:$0xff]  ;;  %v2461_v2 = vld [vmem:[%s3104_s4 + $0x8] sm:$0xff]  ;;  %v123_v4 = vunpack.c.l.s4 %v2395_v3  ;;  %v2344_v33 = vld [vmem:[%s3107_s2 + $0x10] sm:$0xff]   ;;  %vm812_vm2 = vcmask 523264   ;;  %vm1490_vm3 = vcmask 1041409   ;;  %vm1492_vm4 = vcmask 1042434  }
   0x2   :  { %v88_v5 = vsel %vm87_vm0, %v2456_v1, -inf  ;;  %v2340_v6 = vld [vmem:[%s3105_s5 + $0x8] sm:$0xff]   ;;  %v2341_v7 = vld [vmem:[%s3105_s5] sm:$0xff]   ;;  %v91_v8 = vsel %vm87_vm0, %v2461_v2, -inf  ;;  %v2473_v10 = vshrl.u32 %v125_v0, 7  ;;  %v2345_v49 = vld [vmem:[%s3107_s2 + $0x18] sm:$0xff]  }
   0x3   :  { %89 = vmax.xlane.f32.xlu0 %v88_v5  ;;  %v124_v9 = vunpack.c.0.s8 %v123_v4  ;;  %2213 = vmatprep.subr.bf16.mxu0 %v2340_v6  ;;  %v1991_v11 = vld.sshfl [vmem:[%s3106_s1] sm:$0x33 pattern:$0x75316420]  ;;  %v2343_v38 = vld [vmem:[%s3107_s2 + $0x8] sm:$0xff]   ;;  %vm1494_vm5 = vcmask 1043459  }
   0x4   :  { %2214 = vmatpush3.bf16.msra.mxu0 %v2340_v6  ;;  %v121_v12 = vcombine.high %v1991_v11, %v1991_v11  ;;  %v2484_v16 = vsub.s32 0, %v2473_v10  ;;  %v2342_v29 = vld [vmem:[%s3107_s2] sm:$0xff]   ;;  %v2347_v3 = vld [vmem:[%s3107_s2 + $0x28] sm:$0xff]   ;;  %vm1496_vm6 = vcmask 1044484   ;;  %vm1498_vm7 = vcmask 1045509  }
   0x5   :  { %v2479_v13 = vsub.s32 %v124_v9, %v2473_v10  ;;  %2215 = vmatprep.subr.bf16.mxu0 %v2341_v7  ;;  %v1992_v40 = vld.sshfl [vmem:[%s3106_s1 + $0x4] sm:$0x33 pattern:$0x75316420]  ;;  %vm1500_vm8 = vcmask 1046534   ;;  %vm1502_vm9 = vcmask 1047559  }
   0x6   :  { %v2346_v50 = vld [vmem:[%s3107_s2 + $0x20] sm:$0xff]   ;;  %v145_v60 = vcombine.high %v1992_v40, %v1992_v40  ;;  %vm2397_vm10 = vmmov 0  }
   0x7   :  { %92 = vmax.xlane.f32.xlu0 %v91_v8  ;;  %v128_v14 = vrot.slane %v1991_v11, %v2479_v13  ;;  %v135_v15 = vrot.slane %v121_v12, %v2479_v13  ;;  %v152_v54 = vrot.slane %v1992_v40, %v2479_v13 }
   0x8   :  { %2216 = vmatpush3.bf16.msra.mxu0 %v2341_v7  ;;  %v2348_v7 = vld [vmem:[%s3107_s2 + $0x30] sm:$0xff]   ;;  %v159_v9 = vrot.slane %v145_v60, %v2479_v13  ;;  %v2358_v13 = vld [vmem:[%s3108_s6 + $0x18] sm:$0xff]   ;;  %v2355_v60 = vld [vmem:[%s3107_s2 + $0x68] sm:$0xff]  }
   0x9   :  { %v1993_v17 = vpack.i.b16 %v128_v14, %v128_v14  ;;  %v163_v18 = vunpack.i.h.s16 %v128_v14  ;;  %v1994_v19 = vpack.i.b16 %v135_v15, %v135_v15  ;;  %v165_v20 = vunpack.i.h.s16 %v135_v15  ;;  %2249 = vmatprep.subr.bf16.mxu1 %v2358_v13 }
   0xa   :  { %v136_v21 = vcombine.high %v128_v14, %v128_v14  ;;  %v137_v35 = vcombine.high %v135_v15, %v135_v15  ;;  %v1997_v63 = vpack.i.b16 %v152_v54, %v152_v54  ;;  %v171_v5 = vunpack.i.h.s16 %v152_v54  ;;  %2250 = vmatpush3.bf16.msra.mxu1 %v2358_v13 }
   0xb   :  { %v229_v22 = vrot.slane %v1993_v17, %v2484_v16  ;;  %v211_v23 = vpack.i.b16 %v163_v18, %v163_v18  ;;  %v237_v24 = vrot.slane %v1994_v19, %v2484_v16  ;;  %v213_v25 = vpack.i.b16 %v165_v20, %v165_v20  ;;  %v2349_v19 = vld [vmem:[%s3107_s2 + $0x38] sm:$0xff]  }
   0xc   :  { %v1995_v26 = vpack.i.b16 %v136_v21, %v136_v21  ;;  %v167_v27 = vunpack.i.h.s16 %v136_v21  ;;  %v1996_v47 = vpack.i.b16 %v137_v35, %v137_v35  ;;  %v169_v53 = vunpack.i.h.s16 %v137_v35 }
   0xd   :  { %v291_v28 = vpack.i.b16 %v229_v22, %v229_v22  ;;  %v233_v30 = vrot.slane %v211_v23, %v2484_v16  ;;  %v305_v31 = vpack.i.b16 %v237_v24, %v237_v24  ;;  %v241_v32 = vrot.slane %v213_v25, %v2484_v16  ;;  %v2350_v24 = vld [vmem:[%s3107_s2 + $0x40] sm:$0xff]  }
   0xe   :  { %v245_v34 = vrot.slane %v1995_v26, %v2484_v16  ;;  %v215_v44 = vpack.i.b16 %v167_v27, %v167_v27  ;;  %v253_v56 = vrot.slane %v1996_v47, %v2484_v16  ;;  %v217_v59 = vpack.i.b16 %v169_v53, %v169_v53 }
   0xf   :  { %v296_v36 = vrot.slane %v291_v28, %v2484_v16  ;;  %v298_v37 = vpack.i.b16 %v233_v30, %v233_v30  ;;  %v310_v39 = vrot.slane %v305_v31, %v2484_v16  ;;  %v312_v43 = vpack.i.b16 %v241_v32, %v241_v32 }
  0x10   :  { %v319_v46 = vpack.i.b16 %v245_v34, %v245_v34  ;;  %v249_v52 = vrot.slane %v215_v44, %v2484_v16  ;;  %v333_v62 = vpack.i.b16 %v253_v56, %v253_v56  ;;  %v257_v4 = vrot.slane %v217_v59, %v2484_v16  ;;  %v2351_v34 = vld [vmem:[%s3107_s2 + $0x48] sm:$0xff]  }
  0x11   :  { %v498_v41 = vsub.bf16 %v296_v36, %v2342_v29  ;;  %v303_v42 = vrot.slane %v298_v37, %v2484_v16  ;;  %v500_v45 = vsub.bf16 %v310_v39, %v2344_v33  ;;  %v317_v51 = vrot.slane %v312_v43, %v2484_v16 }
  0x12   :  { %v324_v55 = vrot.slane %v319_v46, %v2484_v16  ;;  %v326_v58 = vpack.i.b16 %v249_v52, %v249_v52  ;;  %v338_v6 = vrot.slane %v333_v62, %v2484_v16  ;;  %v261_v8 = vrot.slane %v1997_v63, %v2484_v16  ;;  %v2354_v52 = vld [vmem:[%s3107_s2 + $0x60] sm:$0xff]   ;;  %v2356_v63 = vld [vmem:[%s3107_s2 + $0x70] sm:$0xff]  }
  0x13   :  { %2217 = vmatprep.mubr.msk.bf16.mxu0 %vm530_vm1, %v498_v41  ;;  %v499_v48 = vsub.bf16 %v303_v42, %v2343_v38  ;;  %v501_v57 = vsub.bf16 %v317_v51, %v2345_v49  ;;  %v340_v12 = vpack.i.b16 %v257_v4, %v257_v4  ;;  %v219_v14 = vpack.i.b16 %v171_v5, %v171_v5  ;;  %v2352_v38 = vld [vmem:[%s3107_s2 + $0x50] sm:$0xff]  }
  0x14   :  { %v502_v61 = vsub.bf16 %v324_v55, %v2346_v50  ;;  %v331_v0 = vrot.slane %v326_v58, %v2484_v16  ;;  %v504_v15 = vsub.bf16 %v338_v6, %v2348_v7  ;;  %v347_v17 = vpack.i.b16 %v261_v8, %v261_v8  ;;  %v2357_v6 = vld [vmem:[%s3107_s2 + $0x78] sm:$0xff]   ;;  %v2359_v8 = vld [vmem:[%s3108_s6 + $0x10] sm:$0xff]  }
  0x15   :  { %2218 = vmatmul.mubr.msk.bf16.vlgmr.msra.gmra.mxu0 %vm530_vm1, %v499_v48  ;;  %v1998_v18 = vpack.i.b16 %v159_v9, %v159_v9  ;;  %v345_v20 = vrot.slane %v340_v12, %v2484_v16  ;;  %v265_v21 = vrot.slane %v219_v14, %v2484_v16  ;;  %v173_v22 = vunpack.i.h.s16 %v159_v9  ;;  %v2353_v48 = vld [vmem:[%s3107_s2 + $0x58] sm:$0xff]   ;;  %2251 = vmatprep.subr.bf16.mxu1 %v2359_v8 }
  0x16   :  { %2221 = vmatprep.mubr.msk.bf16.mxu0 %vm530_vm1, %v500_v45  ;;  %v503_v11 = vsub.bf16 %v331_v0, %v2347_v3  ;;  %v352_v23 = vrot.slane %v347_v17, %v2484_v16  ;;  %v160_v26 = vcombine.high %v152_v54, %v152_v54  ;;  %v161_v40 = vcombine.high %v159_v9, %v159_v9  ;;  %v2360_v9 = vld [vmem:[%s3108_s6 + $0x8] sm:$0xff]  }
  0x17   :  { %v269_v25 = vrot.slane %v1998_v18, %v2484_v16  ;;  %v505_v27 = vsub.bf16 %v345_v20, %v2349_v19  ;;  %v354_v28 = vpack.i.b16 %v265_v21, %v265_v21  ;;  %v221_v29 = vpack.i.b16 %v173_v22, %v173_v22  ;;  %2252 = vmatpush3.bf16.msra.mxu1 %v2359_v8 }
  0x18   :  { %v506_v30 = vsub.bf16 %v352_v23, %v2350_v24  ;;  %v1999_v32 = vpack.i.b16 %v160_v26, %v160_v26  ;;  %v175_v36 = vunpack.i.h.s16 %v160_v26  ;;  %v2000_v46 = vpack.i.b16 %v161_v40, %v161_v40  ;;  %2253 = vmatprep.subr.bf16.mxu1 %v2360_v9 }
  0x19   :  { %v361_v31 = vpack.i.b16 %v269_v25, %v269_v25  ;;  %v359_v33 = vrot.slane %v354_v28, %v2484_v16  ;;  %v273_v35 = vrot.slane %v221_v29, %v2484_v16  ;;  %v177_v50 = vunpack.i.h.s16 %v161_v40 }
  0x1a   :  { %v277_v39 = vrot.slane %v1999_v32, %v2484_v16  ;;  %v223_v43 = vpack.i.b16 %v175_v36, %v175_v36  ;;  %v285_v53 = vrot.slane %v2000_v46, %v2484_v16 }
  0x1b   :  { %v366_v37 = vrot.slane %v361_v31, %v2484_v16  ;;  %v507_v41 = vsub.bf16 %v359_v33, %v2351_v34  ;;  %v368_v42 = vpack.i.b16 %v273_v35, %v273_v35  ;;  %v225_v56 = vpack.i.b16 %v177_v50, %v177_v50  ;;  %2254 = vmatpush3.bf16.msra.mxu1 %v2360_v9 }
  0x1c   :  { %v375_v45 = vpack.i.b16 %v277_v39, %v277_v39  ;;  %v281_v49 = vrot.slane %v223_v43, %v2484_v16  ;;  %v389_v58 = vpack.i.b16 %v285_v53, %v285_v53 }
  0x1d   :  { %2222 = vmatmul.mubr.msk.bf16.gmra.mxu0 %vm530_vm1, %v501_v57  ;;  %v508_v44 = vsub.bf16 %v366_v37, %v2352_v38  ;;  %v373_v47 = vrot.slane %v368_v42, %v2484_v16 }
  0x1e   :  { %2225 = vmatprep.mubr.msk.bf16.mxu0 %vm530_vm1, %v502_v61  ;;  %v380_v51 = vrot.slane %v375_v45, %v2484_v16  ;;  %v382_v55 = vpack.i.b16 %v281_v49, %v281_v49  ;;  %v289_v61 = vrot.slane %v225_v56, %v2484_v16  ;;  %v394_v62 = vrot.slane %v389_v58, %v2484_v16 }
  0x1f   :  { %v509_v54 = vsub.bf16 %v373_v47, %v2353_v48 }
  0x20   :  { %v510_v57 = vsub.bf16 %v380_v51, %v2354_v52  ;;  %v387_v59 = vrot.slane %v382_v55, %v2484_v16  ;;  %v396_v3 = vpack.i.b16 %v289_v61, %v289_v61  ;;  %v512_v4 = vsub.bf16 %v394_v62, %v2356_v63 }
  0x22   :  { %v511_v0 = vsub.bf16 %v387_v59, %v2355_v60  ;;  %v401_v5 = vrot.slane %v396_v3, %v2484_v16 }
  0x24   :  { %v513_v7 = vsub.bf16 %v401_v5, %v2357_v6 }
  0x25   :  { %2226 = vmatmul.mubr.msk.bf16.gmra.mxu0 %vm530_vm1, %v503_v11  ;;  %v2361_v11 = vld [vmem:[%s3108_s6] sm:$0xff]  }
  0x26   :  { %2229 = vmatprep.mubr.msk.bf16.mxu0 %vm530_vm1, %v504_v15  ;;  %2255 = vmatprep.subr.bf16.mxu1 %v2361_v11 }
  0x27   :  { %2256 = vmatpush3.bf16.msra.mxu1 %v2361_v11 }
  0x2d   :  { %2230 = vmatmul.mubr.msk.bf16.gmra.mxu0 %vm530_vm1, %v505_v27 }
  0x2e   :  { %2233 = vmatprep.mubr.msk.bf16.mxu0 %vm530_vm1, %v506_v30 }
  0x35   :  { %2234 = vmatmul.mubr.msk.bf16.gmra.mxu0 %vm530_vm1, %v507_v41 }
  0x36   :  { %2237 = vmatprep.mubr.msk.bf16.mxu0 %vm530_vm1, %v508_v44 }
  0x3d   :  { %2238 = vmatmul.mubr.msk.bf16.gmra.mxu0 %vm530_vm1, %v509_v54 }
  0x3e   :  { %2241 = vmatprep.mubr.msk.bf16.mxu0 %vm530_vm1, %v510_v57 }
  0x45   :  { %2242 = vmatmul.mubr.msk.bf16.gmra.mxu0 %vm530_vm1, %v511_v0 }
  0x46   :  { %2245 = vmatprep.mubr.msk.bf16.mxu0 %vm530_vm1, %v512_v4 }
  0x4d   :  { %2246 = vmatmul.mubr.msk.bf16.gmra.mxu0 %vm530_vm1, %v513_v7 }
  0x8c   :  { %v90_v12 = vpop.xlane.xlu0 %89 }
  0x8d   :  { %v94_v14 = vsub.f32 %v2456_v1, %v90_v12  ;;  %v37_v1 = vld [vmem:[%s3109_s9] sm:$0x7] }
  0x8f   :  { %v96_v15 = vmul.f32 1.442695, %v94_v14 }
  0x90   :  { %v93_v17 = vpop.xlane.xlu0 %92 }
  0x91   :  { %2374 = vpow2.f32 %v96_v15  ;;  %v95_v18 = vsub.f32 %v2461_v2, %v93_v17  ;;  %v2613_v2 = vrot.slane %v37_v1, %v2484_v16 }
  0x93   :  { %v98_v19 = vmul.f32 1.442695, %v95_v18 }
  0x95   :  { %2376 = vpow2.f32 %v98_v19 }
  0x9e   :  { %v2601_v20 = vpop.eup %2374 }
  0x9f   :  { %v100_v21 = vsel %vm87_vm0, %v2601_v20, 0.0 }
  0xa0   :  { %101 = vadd.xlane.f32.xlu1 %v100_v21 }
  0xa2   :  { %v2605_v22 = vpop.eup %2376 }
  0xa3   :  { %v103_v13 = vsel %vm87_vm0, %v2605_v22, 0.0 }
  0xa4   :  { %104 = vadd.xlane.f32.xlu1 %v103_v13 }
  0xd5   :  { %v2219_v23 = vpop.f32.mrf.mxu0 }
  0xd6   :  { %v622_v24 = vadd.f32 %v2219_v23, %v2613_v2 }
  0xd7   :  { %v613_v25 = vpop.f32.mrf.mxu0 }
  0xd8   :  { %v614_v26 = vadd.f32 %v613_v25, %v2613_v2  ;;  %v742_v29 = vmax.f32 %v622_v24, 0.0 }
  0xd9   :  { %v2220_v27 = vpop.f32.mrf.mxu0 }
  0xda   :  { %v625_v28 = vadd.f32 %v2220_v27, %v2613_v2  ;;  %v740_v31 = vmax.f32 %v614_v26, 0.0 }
  0xdb   :  { %v616_v30 = vpop.f32.mrf.mxu0 }
  0xdc   :  { %v743_v32 = vmax.f32 %v625_v28, 0.0  ;;  %v617_v33 = vadd.f32 %v616_v30, %v2613_v2 }
  0xdd   :  { %v2223_v34 = vpop.f32.mrf.mxu0 }
  0xde   :  { %v741_v35 = vmax.f32 %v617_v33, 0.0  ;;  %v773_v36 = vpack.c.bf16 %v743_v32, %v742_v29  ;;  %v638_v37 = vadd.f32 %v2223_v34, %v2613_v2 }
  0xdf   :  { %v629_v38 = vpop.f32.mrf.mxu0 }
  0xe0   :  { %v630_v39 = vadd.f32 %v629_v38, %v2613_v2  ;;  %v772_v40 = vpack.c.bf16 %v741_v35, %v740_v31  ;;  %v746_v43 = vmax.f32 %v638_v37, 0.0 }
  0xe1   :  { %v2224_v41 = vpop.f32.mrf.mxu0 }
  0xe2   :  { %v641_v42 = vadd.f32 %v2224_v41, %v2613_v2  ;;  %2257 = vmatprep.mubr.msk.bf16.mxu1 %vm812_vm2, %v772_v40  ;;  %v744_v45 = vmax.f32 %v630_v39, 0.0 }
  0xe3   :  { %v632_v44 = vpop.f32.mrf.mxu0  ;;  %2258 = vmatmul.mubr.msk.bf16.vlgmr.msra.gmra.mxu1 %vm812_vm2, %v773_v36 }
  0xe4   :  { %v747_v46 = vmax.f32 %v641_v42, 0.0  ;;  %v633_v47 = vadd.f32 %v632_v44, %v2613_v2 }
  0xe5   :  { %v2227_v48 = vpop.f32.mrf.mxu0 }
  0xe6   :  { %v745_v49 = vmax.f32 %v633_v47, 0.0  ;;  %v775_v50 = vpack.c.bf16 %v747_v46, %v746_v43  ;;  %v654_v51 = vadd.f32 %v2227_v48, %v2613_v2 }
  0xe7   :  { %v645_v52 = vpop.f32.mrf.mxu0 }
  0xe8   :  { %v774_v53 = vpack.c.bf16 %v745_v49, %v744_v45  ;;  %v646_v54 = vadd.f32 %v645_v52, %v2613_v2  ;;  %v750_v57 = vmax.f32 %v654_v51, 0.0 }
  0xe9   :  { %v2228_v55 = vpop.f32.mrf.mxu0 }
  0xea   :  { %v657_v56 = vadd.f32 %v2228_v55, %v2613_v2  ;;  %2261 = vmatprep.mubr.msk.bf16.mxu1 %vm812_vm2, %v774_v53  ;;  %v748_v59 = vmax.f32 %v646_v54, 0.0 }
  0xeb   :  { %v648_v58 = vpop.f32.mrf.mxu0  ;;  %2262 = vmatmul.mubr.msk.bf16.gmra.mxu1 %vm812_vm2, %v775_v50 }
  0xec   :  { %v751_v60 = vmax.f32 %v657_v56, 0.0  ;;  %v649_v61 = vadd.f32 %v648_v58, %v2613_v2 }
  0xed   :  { %v2231_v62 = vpop.f32.mrf.mxu0 }
  0xee   :  { %v749_v63 = vmax.f32 %v649_v61, 0.0  ;;  %v777_v0 = vpack.c.bf16 %v751_v60, %v750_v57  ;;  %v670_v3 = vadd.f32 %v2231_v62, %v2613_v2 }
  0xef   :  { %v661_v4 = vpop.f32.mrf.mxu0 }
  0xf0   :  { %v776_v5 = vpack.c.bf16 %v749_v63, %v748_v59  ;;  %v662_v6 = vadd.f32 %v661_v4, %v2613_v2  ;;  %v754_v9 = vmax.f32 %v670_v3, 0.0 }
  0xf1   :  { %v2232_v7 = vpop.f32.mrf.mxu0 }
  0xf2   :  { %v673_v8 = vadd.f32 %v2232_v7, %v2613_v2  ;;  %2265 = vmatprep.mubr.msk.bf16.mxu1 %vm812_vm2, %v776_v5  ;;  %v752_v12 = vmax.f32 %v662_v6, 0.0 }
  0xf3   :  { %v664_v11 = vpop.f32.mrf.mxu0  ;;  %2266 = vmatmul.mubr.msk.bf16.gmra.mxu1 %vm812_vm2, %v777_v0 }
  0xf4   :  { %v755_v14 = vmax.f32 %v673_v8, 0.0  ;;  %v665_v15 = vadd.f32 %v664_v11, %v2613_v2 }
  0xf5   :  { %v2235_v17 = vpop.f32.mrf.mxu0 }
  0xf6   :  { %v753_v18 = vmax.f32 %v665_v15, 0.0  ;;  %v779_v19 = vpack.c.bf16 %v755_v14, %v754_v9  ;;  %v686_v21 = vadd.f32 %v2235_v17, %v2613_v2 }
  0xf7   :  { %v677_v13 = vpop.f32.mrf.mxu0 }
  0xf8   :  { %v778_v1 = vpack.c.bf16 %v753_v18, %v752_v12  ;;  %v678_v23 = vadd.f32 %v677_v13, %v2613_v2  ;;  %v758_v26 = vmax.f32 %v686_v21, 0.0 }
  0xf9   :  { %v2236_v24 = vpop.f32.mrf.mxu0 }
  0xfa   :  { %v689_v25 = vadd.f32 %v2236_v24, %v2613_v2  ;;  %2269 = vmatprep.mubr.msk.bf16.mxu1 %vm812_vm2, %v778_v1  ;;  %v756_v28 = vmax.f32 %v678_v23, 0.0  ;;  %v2666_v1 = vsub.s32 1, %v2473_v10 }
  0xfb   :  { %v680_v27 = vpop.f32.mrf.mxu0  ;;  %2270 = vmatmul.mubr.msk.bf16.gmra.mxu1 %vm812_vm2, %v779_v19 }
  0xfc   :  { %v759_v29 = vmax.f32 %v689_v25, 0.0  ;;  %v681_v30 = vadd.f32 %v680_v27, %v2613_v2 }
  0xfd   :  { %v2239_v31 = vpop.f32.mrf.mxu0 }
  0xfe   :  { %v757_v32 = vmax.f32 %v681_v30, 0.0  ;;  %v781_v33 = vpack.c.bf16 %v759_v29, %v758_v26  ;;  %v702_v34 = vadd.f32 %v2239_v31, %v2613_v2  ;;  %v2683_v31 = vsub.s32 4, %v2473_v10 }
  0xff   :  { %v693_v35 = vpop.f32.mrf.mxu0 }
 0x100   :  { %v780_v36 = vpack.c.bf16 %v757_v32, %v756_v28  ;;  %v694_v37 = vadd.f32 %v693_v35, %v2613_v2  ;;  %v762_v40 = vmax.f32 %v702_v34, 0.0  ;;  %v2678_v28 = vsub.s32 3, %v2473_v10 }
 0x101   :  { %v2240_v38 = vpop.f32.mrf.mxu0  ;;  %v2688_v34 = vsub.s32 5, %v2473_v10 }
 0x102   :  { %v705_v39 = vadd.f32 %v2240_v38, %v2613_v2  ;;  %2273 = vmatprep.mubr.msk.bf16.mxu1 %vm812_vm2, %v780_v36  ;;  %v760_v42 = vmax.f32 %v694_v37, 0.0  ;;  %v2693_v37 = vsub.s32 6, %v2473_v10 }
 0x103   :  { %v696_v41 = vpop.f32.mrf.mxu0  ;;  %2274 = vmatmul.mubr.msk.bf16.gmra.mxu1 %vm812_vm2, %v781_v33 }
 0x104   :  { %v763_v43 = vmax.f32 %v705_v39, 0.0  ;;  %v697_v44 = vadd.f32 %v696_v41, %v2613_v2 }
 0x105   :  { %v2243_v45 = vpop.f32.mrf.mxu0 }
 0x106   :  { %v761_v46 = vmax.f32 %v697_v44, 0.0  ;;  %v783_v47 = vpack.c.bf16 %v763_v43, %v762_v40  ;;  %v718_v48 = vadd.f32 %v2243_v45, %v2613_v2  ;;  %v2698_v40 = vsub.s32 7, %v2473_v10 }
 0x107   :  { %v709_v49 = vpop.f32.mrf.mxu0 }
 0x108   :  { %v782_v50 = vpack.c.bf16 %v761_v46, %v760_v42  ;;  %v710_v51 = vadd.f32 %v709_v49, %v2613_v2  ;;  %v766_v54 = vmax.f32 %v718_v48, 0.0  ;;  %3116 = vst [vmem:[#allocation2_spill] sm:$0xff] %v2698_v40 }
 0x109   :  { %v2244_v52 = vpop.f32.mrf.mxu0 }
 0x10a   :  { %v721_v53 = vadd.f32 %v2244_v52, %v2613_v2  ;;  %2277 = vmatprep.mubr.msk.bf16.mxu1 %vm812_vm2, %v782_v50  ;;  %v764_v56 = vmax.f32 %v710_v51, 0.0  ;;  %v2141_v51 = vld [vmem:[%s3110_s3 + $0x8] sm:$0xff]   ;;  %v2074_v52 = vld [vmem:[%s3110_s3] sm:$0xff]  }
 0x10b   :  { %v712_v55 = vpop.f32.mrf.mxu0  ;;  %2278 = vmatmul.mubr.msk.bf16.gmra.mxu1 %vm812_vm2, %v783_v47 }
 0x10c   :  { %v767_v57 = vmax.f32 %v721_v53, 0.0  ;;  %v713_v58 = vadd.f32 %v712_v55, %v2613_v2 }
 0x10d   :  { %v2247_v59 = vpop.f32.mrf.mxu0 }
 0x10e   :  { %v765_v60 = vmax.f32 %v713_v58, 0.0  ;;  %v785_v61 = vpack.c.bf16 %v767_v57, %v766_v54  ;;  %v734_v62 = vadd.f32 %v2247_v59, %v2613_v2  ;;  %v2080_v57 = vunpack.c.h.bf16 %v2141_v51 }
 0x10f   :  { %v725_v63 = vpop.f32.mrf.mxu0  ;;  %v2076_v58 = vunpack.c.h.bf16 %v2074_v52 }
 0x110   :  { %v784_v0 = vpack.c.bf16 %v765_v60, %v764_v56  ;;  %v726_v3 = vadd.f32 %v725_v63, %v2613_v2  ;;  %v770_v6 = vmax.f32 %v734_v62, 0.0  ;;  %v2075_v56 = vunpack.c.l.bf16 %v2074_v52 }
 0x111   :  { %v2248_v4 = vpop.f32.mrf.mxu0  ;;  %v2079_v60 = vunpack.c.l.bf16 %v2141_v51 }
 0x112   :  { %v737_v5 = vadd.f32 %v2248_v4, %v2613_v2  ;;  %2281 = vmatprep.mubr.msk.bf16.mxu1 %vm812_vm2, %v784_v0  ;;  %v768_v8 = vmax.f32 %v726_v3, 0.0 }
 0x113   :  { %v728_v7 = vpop.f32.mrf.mxu0  ;;  %2282 = vmatmul.mubr.msk.bf16.gmra.mxu1 %vm812_vm2, %v785_v61 }
 0x114   :  { %v771_v9 = vmax.f32 %v737_v5, 0.0  ;;  %v729_v11 = vadd.f32 %v728_v7, %v2613_v2 }
 0x116   :  { %v769_v12 = vmax.f32 %v729_v11, 0.0  ;;  %v787_v14 = vpack.c.bf16 %v771_v9, %v770_v6 }
 0x118   :  { %v786_v15 = vpack.c.bf16 %v769_v12, %v768_v8 }
 0x11a   :  { %2285 = vmatprep.mubr.msk.bf16.mxu1 %vm812_vm2, %v786_v15 }
 0x11b   :  { %2286 = vmatmul.mubr.msk.bf16.gmra.mxu1 %vm812_vm2, %v787_v14 }
 0x129   :  { %v102_v17 = vpop.xlane.xlu1 %101 }
 0x12a   :  { %2378 = vrcp.f32 %v102_v17 }
 0x12d   :  { %v105_v18 = vpop.xlane.xlu1 %104 }
 0x12e   :  { %2380 = vrcp.f32 %v105_v18 }
 0x137   :  { %v2379_v19 = vpop.eup %2378 }
 0x138   :  { %v108_v21 = vmul.f32 %v2379_v19, %v2601_v20  ;;  %v2673_v20 = vsub.s32 2, %v2473_v10 }
 0x13a   :  { %v1121_v13 = vrot.slane %v108_v21, %v2484_v16  ;;  %v1132_v24 = vrot.slane %v108_v21, %v2666_v1  ;;  %v1143_v27 = vrot.slane %v108_v21, %v2673_v20  ;;  %v1154_v29 = vrot.slane %v108_v21, %v2678_v28 }
 0x13b   :  { %v2381_v2 = vpop.eup %2380  ;;  %v1165_v32 = vrot.slane %v108_v21, %v2683_v31  ;;  %v1176_v35 = vrot.slane %v108_v21, %v2688_v34  ;;  %v1187_v38 = vrot.slane %v108_v21, %v2693_v37  ;;  %v1198_v41 = vrot.slane %v108_v21, %v2698_v40 }
 0x13c   :  { %v109_v23 = vmul.f32 %v2381_v2, %v2605_v22  ;;  %1123 = vbcast.lane.b32.xlu0 %v1121_v13, 256  ;;  %1127 = vbcast.lane.b32.xlu1 %v1121_v13, 264 }
 0x13e   :  { %v1209_v25 = vrot.slane %v109_v23, %v2484_v16  ;;  %v1220_v26 = vrot.slane %v109_v23, %v2666_v1  ;;  %v1231_v22 = vrot.slane %v109_v23, %v2673_v20  ;;  %v1242_v30 = vrot.slane %v109_v23, %v2678_v28 }
 0x13f   :  { %v1253_v33 = vrot.slane %v109_v23, %v2683_v31  ;;  %v1264_v36 = vrot.slane %v109_v23, %v2688_v34  ;;  %v1275_v39 = vrot.slane %v109_v23, %v2693_v37  ;;  %v1286_v42 = vrot.slane %v109_v23, %v2698_v40 }
 0x140   :  { %1134 = vbcast.lane.b32.xlu1 %v1132_v24, 256  ;;  %1211 = vbcast.lane.b32.xlu0 %v1209_v25, 256 }
 0x144   :  { %1138 = vbcast.lane.b32.xlu1 %v1132_v24, 264  ;;  %1222 = vbcast.lane.b32.xlu0 %v1220_v26, 256  ;;  %v2142_v24 = vld [vmem:[%s3110_s3 + $0x10] sm:$0xff]  }
 0x148   :  { %1215 = vbcast.lane.b32.xlu1 %v1209_v25, 264  ;;  %1145 = vbcast.lane.b32.xlu0 %v1143_v27, 256 }
 0x14c   :  { %1226 = vbcast.lane.b32.xlu1 %v1220_v26, 264  ;;  %1233 = vbcast.lane.b32.xlu0 %v1231_v22, 256 }
 0x150   :  { %1149 = vbcast.lane.b32.xlu1 %v1143_v27, 264  ;;  %1156 = vbcast.lane.b32.xlu0 %v1154_v29, 256  ;;  %v2149_v27 = vld [vmem:[%s3110_s3 + $0x48] sm:$0xff]  }
 0x154   :  { %1237 = vbcast.lane.b32.xlu1 %v1231_v22, 264  ;;  %1244 = vbcast.lane.b32.xlu0 %v1242_v30, 256  ;;  %v2143_v22 = vld [vmem:[%s3110_s3 + $0x18] sm:$0xff]  }
 0x158   :  { %1160 = vbcast.lane.b32.xlu1 %v1154_v29, 264  ;;  %1167 = vbcast.lane.b32.xlu0 %v1165_v32, 256 }
 0x15c   :  { %1248 = vbcast.lane.b32.xlu1 %v1242_v30, 264  ;;  %1255 = vbcast.lane.b32.xlu0 %v1253_v33, 256  ;;  %v2084_v30 = vunpack.c.h.bf16 %v2142_v24 }
 0x160   :  { %1171 = vbcast.lane.b32.xlu1 %v1165_v32, 264  ;;  %1178 = vbcast.lane.b32.xlu0 %v1176_v35, 256  ;;  %v2754_v32 = vld [vmem:[%s3110_s3 + $0x28] sm:$0xff]  }
 0x164   :  { %1259 = vbcast.lane.b32.xlu1 %v1253_v33, 264  ;;  %1266 = vbcast.lane.b32.xlu0 %v1264_v36, 256  ;;  %v2759_v33 = vld [vmem:[%s3110_s3 + $0x20] sm:$0xff]  }
 0x168   :  { %1182 = vbcast.lane.b32.xlu1 %v1176_v35, 264  ;;  %1189 = vbcast.lane.b32.xlu0 %v1187_v38, 256 }
 0x16c   :  { %1270 = vbcast.lane.b32.xlu1 %v1264_v36, 264  ;;  %1277 = vbcast.lane.b32.xlu0 %v1275_v39, 256 }
 0x170   :  { %1193 = vbcast.lane.b32.xlu1 %v1187_v38, 264  ;;  %1200 = vbcast.lane.b32.xlu0 %v1198_v41, 256  ;;  %v2083_v38 = vunpack.c.l.bf16 %v2142_v24 }
 0x174   :  { %1281 = vbcast.lane.b32.xlu1 %v1275_v39, 264  ;;  %1288 = vbcast.lane.b32.xlu0 %v1286_v42, 256  ;;  %v2766_v39 = vld [vmem:[%s3110_s3 + $0x38] sm:$0xff]  }
 0x178   :  { %1204 = vbcast.lane.b32.xlu1 %v1198_v41, 264 }
 0x17c   :  { %1292 = vbcast.lane.b32.xlu1 %v1286_v42, 264 }
 0x1a3   :  { %v2259_v43 = vpop.f32.mrf.mxu1 }
 0x1a4   :  { %v1088_v6 = vadd.f32 %v2259_v43, %v2079_v60  ;;  %v2111_v43 = vunpack.c.l.bf16 %v2149_v27  ;;  %v2782_v60 = vld [vmem:[%s3110_s3 + $0x58] sm:$0xff]  }
 0x1a5   :  { %v895_v44 = vpop.f32.mrf.mxu1 }
 0x1a6   :  { %v1086_v0 = vadd.f32 %v2075_v56, %v895_v44  ;;  %v2148_v44 = vld [vmem:[%s3110_s3 + $0x40] sm:$0xff]  }
 0x1a7   :  { %v2260_v45 = vpop.f32.mrf.mxu1 }
 0x1a8   :  { %v1089_v3 = vadd.f32 %v2260_v45, %v2080_v57  ;;  %v2087_v45 = vunpack.c.l.bf16 %v2143_v22 }
 0x1a9   :  { %v898_v46 = vpop.f32.mrf.mxu1 }
 0x1aa   :  { %v1087_v4 = vadd.f32 %v2076_v58, %v898_v46  ;;  %v2088_v46 = vunpack.c.h.bf16 %v2143_v22  ;;  %v2777_v58 = vld [vmem:[%s3110_s3 + $0x30] sm:$0xff]   ;;  %v2119_v22 = vunpack.c.l.bf16 %v2782_v60 }
 0x1ab   :  { %v2702_v47 = vpop.f32.mrf.mxu1 }
 0x1ad   :  { %v2704_v10 = vpop.f32.mrf.mxu1 }
 0x1ae   :  { %v1128_v48 = vpop.permute.xlu1 %1127  ;;  %v1124_v49 = vpop.permute.xlu0 %1123 }
 0x1af   :  { %v2706_v50 = vpop.f32.mrf.mxu1  ;;  %v1295_v7 = vmul.f32 %v1128_v48, %v1087_v4  ;;  %v1294_v8 = vmul.f32 %v1124_v49, %v1086_v0  ;;  %v2091_v49 = vunpack.c.l.bf16 %v2759_v33  ;;  %v2107_v4 = vunpack.c.l.bf16 %v2148_v44 }
 0x1b1   :  { %v914_v53 = vpop.f32.mrf.mxu1  ;;  %v1327_v18 = vsel %vm530_vm1, %v1295_v7, 0.0  ;;  %v1326_v19 = vsel %vm530_vm1, %v1294_v8, 0.0  ;;  %v1090_v7 = vadd.f32 %v2083_v38, %v2704_v10  ;;  %v2804_v38 = vld [vmem:[%s3110_s3 + $0x68] sm:$0xff]  }
 0x1b2   :  { %v1135_v54 = vpop.permute.xlu1 %1134  ;;  %v2714_v55 = vpop.permute.xlu0 %1211  ;;  %v1328_v29 = vadd.f32 %v1327_v18, %v1326_v19  ;;  %v2108_v19 = vunpack.c.h.bf16 %v2148_v44 }
 0x1b3   :  { %v2716_v59 = vpop.f32.mrf.mxu1  ;;  %v1296_v15 = vmul.f32 %v1135_v54, %v1088_v6  ;;  %v1091_v54 = vadd.f32 %v2084_v30, %v914_v53  ;;  %v2112_v53 = vunpack.c.h.bf16 %v2149_v27  ;;  %v2789_v6 = vld [vmem:[%s3110_s3 + $0x50] sm:$0xff]  }
 0x1b4   :  { %v1329_v52 = vrot.slane %v1328_v29, 4  ;;  %v2115_v10 = vunpack.c.l.bf16 %v2789_v6 }
 0x1b5   :  { %v2718_v61 = vpop.f32.mrf.mxu1  ;;  %v1335_v25 = vsel %vm530_vm1, %v1296_v15, 0.0 }
 0x1b6   :  { %v1139_v62 = vpop.permute.xlu1 %1138  ;;  %v2720_v63 = vpop.permute.xlu0 %1222  ;;  %v1330_v30 = vadd.f32 %v1329_v52, %v1328_v29 }
 0x1b7   :  { %v2722_v5 = vpop.f32.mrf.mxu1  ;;  %v1297_v9 = vmul.f32 %v1139_v62, %v1089_v3  ;;  %v2092_v62 = vunpack.c.h.bf16 %v2759_v33 }
 0x1b9   :  { %v2724_v11 = vpop.f32.mrf.mxu1  ;;  %v1336_v21 = vsel %vm530_vm1, %v1297_v9, 0.0 }
 0x1ba   :  { %v2726_v12 = vpop.permute.xlu1 %1215  ;;  %v1146_v14 = vpop.permute.xlu0 %1145  ;;  %v1337_v35 = vadd.f32 %v1336_v21, %v1335_v25 }
 0x1bb   :  { %v2728_v17 = vpop.f32.mrf.mxu1  ;;  %v1298_v57 = vmul.f32 %v1146_v14, %v1090_v7  ;;  %v1092_v7 = vadd.f32 %v2702_v47, %v2087_v45  ;;  %v2824_v47 = vld [vmem:[%s3110_s3 + $0x70] sm:$0xff]  }
 0x1bc   :  { %v1338_v56 = vrot.slane %v1337_v35, 4  ;;  %v2132_v40 = vunpack.c.h.bf16 %v2824_v47 }
 0x1bd   :  { %v2733_v13 = vpop.f32.mrf.mxu1 }
 0x1be   :  { %v2735_v2 = vpop.permute.xlu1 %1226  ;;  %v2737_v23 = vpop.permute.xlu0 %1233  ;;  %v1339_v0 = vadd.f32 %v1338_v56, %v1337_v35  ;;  %v2116_v56 = vunpack.c.h.bf16 %v2789_v6 }
 0x1bf   :  { %v2743_v26 = vpop.f32.mrf.mxu1 }
 0x1c1   :  { %v2761_v36 = vpop.f32.mrf.mxu1 }
 0x1c2   :  { %v1150_v41 = vpop.permute.xlu1 %1149  ;;  %v1157_v42 = vpop.permute.xlu0 %1156 }
 0x1c3   :  { %v2275_v51 = vpop.f32.mrf.mxu1  ;;  %v1299_v8 = vmul.f32 %v1150_v41, %v1091_v54  ;;  %v1093_v41 = vadd.f32 %v2706_v50, %v2088_v46  ;;  %v2120_v54 = vunpack.c.h.bf16 %v2782_v60  ;;  %v1300_v45 = vmul.f32 %v1157_v42, %v1092_v7 }
 0x1c4   :  { %v1104_v9 = vadd.f32 %v2275_v51, %v2111_v43 }
 0x1c5   :  { %v959_v3 = vpop.f32.mrf.mxu1  ;;  %v1345_v25 = vsel %vm530_vm1, %v1299_v8, 0.0 }
 0x1c6   :  { %v2792_v15 = vpop.permute.xlu1 %1237  ;;  %v2794_v18 = vpop.permute.xlu0 %1244  ;;  %v1102_v43 = vadd.f32 %v2107_v4, %v959_v3  ;;  %v1312_v29 = vmul.f32 %v2720_v63, %v1104_v9  ;;  %v2817_v3 = vld [vmem:[%s3110_s3 + $0x60] sm:$0xff]   ;;  %v1331_v4 = vrot.slane %v1330_v30, 2  ;;  %v1340_v63 = vrot.slane %v1339_v0, 2 }
 0x1c7   :  { %v2276_v27 = vpop.f32.mrf.mxu1 }
 0x1c8   :  { %v1105_v44 = vadd.f32 %v2276_v27, %v2112_v53  ;;  %v1344_v53 = vsel %vm530_vm1, %v1298_v57, 0.0  ;;  %v1310_v6 = vmul.f32 %v2714_v55, %v1102_v43  ;;  %v2831_v27 = vld [vmem:[%s3110_s3 + $0x78] sm:$0xff]   ;;  %v1407_v57 = vsel %vm530_vm1, %v1312_v29, 0.0 }
 0x1c9   :  { %v962_v51 = vpop.f32.mrf.mxu1  ;;  %v1095_v29 = vadd.f32 %v2092_v62, %v2724_v11  ;;  %v1341_v46 = vadd.f32 %v1340_v63, %v1339_v0 }
 0x1ca   :  { %v1103_v35 = vadd.f32 %v2108_v19, %v962_v51  ;;  %v1161_v14 = vpop.permute.xlu1 %1160  ;;  %v1168_v52 = vpop.permute.xlu0 %1167  ;;  %v1313_v24 = vmul.f32 %v2735_v2, %v1105_v44  ;;  %v1346_v2 = vadd.f32 %v1345_v25, %v1344_v53  ;;  %v2123_v44 = vunpack.c.l.bf16 %v2817_v3 }
 0x1cb   :  { %v1301_v21 = vmul.f32 %v1161_v14, %v1093_v41  ;;  %v2279_v50 = vpop.f32.mrf.mxu1  ;;  %v1332_v14 = vadd.f32 %v1331_v4, %v1330_v30  ;;  %v1353_v25 = vsel %vm530_vm1, %v1300_v45, 0.0 }
 0x1cc   :  { %v1311_v8 = vmul.f32 %v2726_v12, %v1103_v35  ;;  %v1408_v9 = vsel %vm530_vm1, %v1313_v24, 0.0  ;;  %v1347_v48 = vrot.slane %v1346_v2, 4 }
 0x1cd   :  { %v975_v19 = vpop.f32.mrf.mxu1  ;;  %v1409_v55 = vadd.f32 %v1408_v9, %v1407_v57  ;;  %v1354_v43 = vsel %vm530_vm1, %v1301_v21, 0.0  ;;  %v1398_v9 = vsel %vm530_vm1, %v1310_v6, 0.0  ;;  %v1094_v21 = vadd.f32 %v2091_v49, %v2718_v61 }
 0x1ce   :  { %v1249_v12 = vpop.permute.xlu1 %1248  ;;  %v2834_v41 = vpop.permute.xlu0 %1255  ;;  %v1399_v24 = vsel %vm530_vm1, %v1311_v8, 0.0  ;;  %v1355_v30 = vadd.f32 %v1354_v43, %v1353_v25  ;;  %v1106_v35 = vadd.f32 %v2115_v10, %v975_v19  ;;  %v1333_v42 = vrot.slane %v1332_v14, 1 }
 0x1cf   :  { %v2280_v51 = vpop.f32.mrf.mxu1  ;;  %v1400_v8 = vadd.f32 %v1399_v24, %v1398_v9  ;;  %v1410_v7 = vrot.slane %v1409_v55, 4  ;;  %v1302_v45 = vmul.f32 %v1168_v52, %v1094_v21  ;;  %v1108_v6 = vadd.f32 %v2279_v50, %v2119_v22 }
 0x1d0   :  { %v1109_v4 = vadd.f32 %v2280_v51, %v2120_v54  ;;  %v3117_v61 = vunpack.c.l.bf16 %v2754_v32  ;;  %v1342_v49 = vrot.slane %v1341_v46, 1  ;;  %v1348_v54 = vadd.f32 %v1347_v48, %v1346_v2 }
 0x1d1   :  { %v978_v57 = vpop.f32.mrf.mxu1  ;;  %v3118_v10 = vunpack.c.h.bf16 %v2754_v32  ;;  %v3119_v52 = vunpack.c.l.bf16 %v2766_v39  ;;  %v1401_v51 = vrot.slane %v1400_v8, 4  ;;  %v1356_v48 = vrot.slane %v1355_v30, 4 }
 0x1d2   :  { %v1172_v11 = vpop.permute.xlu1 %1171  ;;  %v1179_v62 = vpop.permute.xlu0 %1178  ;;  %v1107_v53 = vadd.f32 %v2116_v56, %v978_v57  ;;  %v1096_v33 = vadd.f32 %v2716_v59, %v3117_v61  ;;  %v1317_v22 = vmul.f32 %v1249_v12, %v1109_v4  ;;  %v1411_v59 = vadd.f32 %v1410_v7, %v1409_v55 }
 0x1d3   :  { %v1303_v0 = vmul.f32 %v1172_v11, %v1095_v29  ;;  %v2283_v63 = vpop.f32.mrf.mxu1  ;;  %v1097_v56 = vadd.f32 %v2722_v5, %v3118_v10  ;;  %v2863_v60 = vadd.f32 %v2728_v17, %v3119_v52  ;;  %v1334_v29 = vadd.f32 %v1333_v42, %v1332_v14 }
 0x1d4   :  { %v1315_v25 = vmul.f32 %v2792_v15, %v1107_v53  ;;  %v1314_v15 = vmul.f32 %v2737_v23, %v1106_v35  ;;  %v3120_v5 = vunpack.c.l.bf16 %v2777_v58  ;;  %v1362_v53 = vsel %vm530_vm1, %v1302_v45, 0.0 }
 0x1d5   :  { %v991_v24 = vpop.f32.mrf.mxu1  ;;  %v1363_v50 = vsel %vm530_vm1, %v1303_v0, 0.0  ;;  %v1316_v17 = vmul.f32 %v2794_v18, %v1108_v6  ;;  %v1343_v12 = vadd.f32 %v1342_v49, %v1341_v46  ;;  %v1349_v9 = vrot.slane %v1348_v54, 2 }
 0x1d6   :  { %v1260_v19 = vpop.permute.xlu1 %1259  ;;  %v1267_v43 = vpop.permute.xlu0 %1266  ;;  %v1098_v32 = vadd.f32 %v3120_v5, %v2733_v13  ;;  %v1417_v57 = vsel %vm530_vm1, %v1315_v25, 0.0  ;;  %v1364_v21 = vadd.f32 %v1363_v50, %v1362_v53  ;;  %v3121_v7 = vunpack.c.h.bf16 %v2766_v39 }
 0x1d7   :  { %v2284_v2 = vpop.f32.mrf.mxu1  ;;  %v1426_v42 = vsel %vm530_vm1, %v1317_v22, 0.0  ;;  %v3122_v35 = vunpack.c.l.bf16 %v2804_v38  ;;  %v1110_v14 = vadd.f32 %v2123_v44, %v991_v24  ;;  %v1412_v18 = vrot.slane %v1411_v59, 2 }
 0x1d8   :  { %v2876_v23 = vadd.f32 %v2743_v26, %v3121_v7  ;;  %v1402_v46 = vadd.f32 %v1401_v51, %v1400_v8  ;;  %v1357_v0 = vadd.f32 %v1356_v48, %v1355_v30  ;;  %v1416_v45 = vsel %vm530_vm1, %v1314_v15, 0.0 }
 0x1d9   :  { %v994_v55 = vpop.f32.mrf.mxu1  ;;  %v1112_v13 = vadd.f32 %v2283_v63, %v3122_v35  ;;  %v3123_v39 = vunpack.c.h.bf16 %v2777_v58  ;;  %v1425_v61 = vsel %vm530_vm1, %v1316_v17, 0.0  ;;  %v1418_v49 = vadd.f32 %v1417_v57, %v1416_v45 }
 0x1da   :  { %v1183_v4 = vpop.permute.xlu1 %1182  ;;  %v1190_v11 = vpop.permute.xlu0 %1189  ;;  %v1304_v25 = vmul.f32 %v1179_v62, %v1096_v33  ;;  %v2889_v63 = vsel %vm1490_vm3, %v1343_v12, %v1334_v29  ;;  %v2891_v44 = vadd.f32 %v1349_v9, %v1348_v54  ;;  %v1427_v24 = vadd.f32 %v1426_v42, %v1425_v61 }
 0x1db   :  { %v2882_v6 = vpop.f32.mrf.mxu1  ;;  %v1099_v26 = vadd.f32 %v3123_v39, %v2761_v36  ;;  %v1365_v8 = vrot.slane %v1364_v21, 4  ;;  %v1318_v10 = vmul.f32 %v2834_v41, %v1110_v14  ;;  %v1320_v52 = vmul.f32 %v1267_v43, %v1112_v13 }
 0x1dc   :  { %v3124_v22 = vunpack.c.h.bf16 %v2817_v3  ;;  %v1305_v58 = vmul.f32 %v1183_v4, %v1097_v56  ;;  %v2896_v48 = vadd.f32 %v1412_v18, %v1411_v59  ;;  %v1403_v62 = vrot.slane %v1402_v46, 2 }
 0x1dd   :  { %v1007_v30 = vpop.f32.mrf.mxu1  ;;  %v1358_v33 = vrot.slane %v1357_v0, 2  ;;  %v3125_v15 = vunpack.c.h.bf16 %v2804_v38  ;;  %v1419_v5 = vrot.slane %v1418_v49, 4  ;;  %v1371_v53 = vsel %vm530_vm1, %v1304_v25, 0.0 }
 0x1de   :  { %v1111_v50 = vadd.f32 %v3124_v22, %v994_v55  ;;  %v1271_v36 = vpop.permute.xlu1 %1270  ;;  %v1278_v51 = vpop.permute.xlu0 %1277  ;;  %v1372_v41 = vsel %vm530_vm1, %v1305_v58, 0.0  ;;  %v1428_v43 = vrot.slane %v1427_v24, 4  ;;  %v3126_v56 = vunpack.c.l.bf16 %v2824_v47 }
 0x1df   :  { %v1113_v54 = vadd.f32 %v2284_v2, %v3125_v15  ;;  %v2288_v29 = vpop.f32.mrf.mxu1  ;;  %v1373_v3 = vadd.f32 %v1372_v41, %v1371_v53  ;;  %v1366_v59 = vadd.f32 %v1365_v8, %v1364_v21  ;;  %v1434_v57 = vsel %vm530_vm1, %v1318_v10, 0.0 }
 0x1e0   :  { %v1319_v17 = vmul.f32 %v1260_v19, %v1111_v50  ;;  %v1114_v12 = vadd.f32 %v3126_v56, %v1007_v30  ;;  %v1443_v55 = vsel %vm530_vm1, %v1320_v52, 0.0  ;;  %v1306_v35 = vmul.f32 %v1190_v11, %v1098_v32 }
 0x1e1   :  { %v1321_v9 = vmul.f32 %v1271_v36, %v1113_v54  ;;  %v1374_v42 = vrot.slane %v1373_v3, 4  ;;  %v1010_v13 = vpop.f32.mrf.mxu1  ;;  %v1351_v14 = vrot.slane %v2891_v44, 1  ;;  %v2909_v4 = vadd.f32 %v1358_v33, %v1357_v0 }
 0x1e2   :  { %v1435_v38 = vsel %vm530_vm1, %v1319_v17, 0.0  ;;  %v1194_v2 = vpop.permute.xlu1 %1193  ;;  %v1420_v18 = vadd.f32 %v1419_v5, %v1418_v49  ;;  %v1201_v21 = vpop.permute.xlu0 %1200  ;;  %v1429_v39 = vadd.f32 %v1428_v43, %v1427_v24  ;;  %v1322_v25 = vmul.f32 %v1278_v51, %v1114_v12 }
 0x1e3   :  { %v1436_v7 = vadd.f32 %v1435_v38, %v1434_v57  ;;  %v1444_v19 = vsel %vm530_vm1, %v1321_v9, 0.0  ;;  %v1307_v8 = vmul.f32 %v1194_v2, %v1099_v26  ;;  %v2911_v30 = vadd.f32 %v1403_v62, %v1402_v46 }
 0x1e4   :  { %v1445_v45 = vadd.f32 %v1444_v19, %v1443_v55  ;;  %v1375_v10 = vadd.f32 %v1374_v42, %v1373_v3  ;;  %v1115_v32 = vadd.f32 %v2132_v40, %v1010_v13  ;;  %v1414_v22 = vrot.slane %v2896_v48, 1 }
 0x1e5   :  { %v1437_v61 = vrot.slane %v1436_v7, 4  ;;  %v1367_v50 = vrot.slane %v1366_v59, 2  ;;  %v1380_v0 = vsel %vm530_vm1, %v1306_v35, 0.0  ;;  %v1381_v49 = vsel %vm530_vm1, %v1307_v8, 0.0 }
 0x1e6   :  { %v1446_v52 = vrot.slane %v1445_v45, 4  ;;  %v1282_v11 = vpop.permute.xlu1 %1281  ;;  %v1421_v58 = vrot.slane %v1420_v18, 2  ;;  %v1382_v24 = vadd.f32 %v1381_v49, %v1380_v0  ;;  %v1308_v36 = vmul.f32 %v1201_v21, %v2863_v60  ;;  %v1289_v5 = vpop.permute.xlu0 %1288 }
 0x1e7   :  { %v1323_v26 = vmul.f32 %v1282_v11, %v1115_v32  ;;  %v1360_v46 = vrot.slane %v2909_v4, 1  ;;  %v1430_v51 = vrot.slane %v1429_v39, 2  ;;  %v1438_v62 = vadd.f32 %v1437_v61, %v1436_v7 }
 0x1e8   :  { %v1452_v47 = vsel %vm530_vm1, %v1322_v25, 0.0  ;;  %v1376_v40 = vrot.slane %v1375_v10, 2  ;;  %v1447_v33 = vadd.f32 %v1446_v52, %v1445_v45  ;;  %v1383_v15 = vrot.slane %v1382_v24, 4 }
 0x1e9   :  { %v1453_v54 = vsel %vm530_vm1, %v1323_v26, 0.0  ;;  %v1368_v17 = vadd.f32 %v1367_v50, %v1366_v59  ;;  %v3127_v41 = vunpack.c.l.bf16 %v2831_v27  ;;  %v1422_v56 = vadd.f32 %v1421_v58, %v1420_v18 }
 0x1ea   :  { %v1205_v53 = vpop.permute.xlu1 %1204  ;;  %v1454_v60 = vadd.f32 %v1453_v54, %v1452_v47  ;;  %v3128_v12 = vunpack.c.h.bf16 %v2831_v27  ;;  %v1384_v57 = vadd.f32 %v1383_v15, %v1382_v24  ;;  %v1389_v55 = vsel %vm530_vm1, %v1308_v36, 0.0 }
 0x1eb   :  { %v1116_v43 = vadd.f32 %v2882_v6, %v3127_v41  ;;  %v1309_v3 = vmul.f32 %v1205_v53, %v2876_v23  ;;  %v1439_v38 = vrot.slane %v1438_v62, 2  ;;  %v1377_v42 = vadd.f32 %v1376_v40, %v1375_v10  ;;  %v2138_v40 = vld [vmem:[%s3111_s0] sm:$0xff]  }
 0x1ec   :  { %v1117_v9 = vadd.f32 %v2288_v29, %v3128_v12  ;;  %v1455_v2 = vrot.slane %v1454_v60, 4  ;;  %v1448_v35 = vrot.slane %v1447_v33, 2  ;;  %v1385_v6 = vrot.slane %v1384_v57, 2 }
 0x1ed   :  { %v1324_v7 = vmul.f32 %v1289_v5, %v1116_v43  ;;  %v1390_v59 = vsel %vm530_vm1, %v1309_v3, 0.0  ;;  %v1405_v23 = vrot.slane %v2911_v30, 1  ;;  %v1431_v18 = vadd.f32 %v1430_v51, %v1429_v39 }
 0x1ee   :  { %v1391_v19 = vadd.f32 %v1390_v59, %v1389_v55  ;;  %v1293_v13 = vpop.permute.xlu1 %1292  ;;  %v1456_v27 = vadd.f32 %v1455_v2, %v1454_v60  ;;  %v1423_v45 = vrot.slane %v1422_v56, 1  ;;  %v1369_v21 = vrot.slane %v1368_v17, 1 }
 0x1ef   :  { %v1325_v29 = vmul.f32 %v1293_v13, %v1117_v9  ;;  %v1386_v61 = vadd.f32 %v1385_v6, %v1384_v57  ;;  %v1440_v8 = vadd.f32 %v1439_v38, %v1438_v62  ;;  %v1461_v10 = vsel %vm530_vm1, %v1324_v7, 0.0 }
 0x1f0   :  { %v1392_v25 = vrot.slane %v1391_v19, 4  ;;  %v1457_v52 = vrot.slane %v1456_v27, 2  ;;  %v1378_v11 = vrot.slane %v1377_v42, 1  ;;  %v1449_v50 = vadd.f32 %v1448_v35, %v1447_v33 }
 0x1f1   :  { %v1462_v32 = vsel %vm530_vm1, %v1325_v29, 0.0  ;;  %v1352_v39 = vadd.f32 %v1351_v14, %v2891_v44  ;;  %v1415_v58 = vadd.f32 %v1414_v22, %v2896_v48  ;;  %v1387_v24 = vrot.slane %v1386_v61, 1 }
 0x1f2   :  { %v1393_v0 = vadd.f32 %v1392_v25, %v1391_v19  ;;  %v1463_v49 = vadd.f32 %v1462_v32, %v1461_v10  ;;  %v1458_v36 = vadd.f32 %v1457_v52, %v1456_v27  ;;  %v1406_v26 = vadd.f32 %v1405_v23, %v2911_v30  ;;  %v2362_v25 = vld [vmem:[%s3105_s5 + $0x18] sm:$0xff]   ;;  %v2363_v52 = vld [vmem:[%s3105_s5 + $0x10] sm:$0xff]  }
 0x1f3   :  { %v1361_v51 = vadd.f32 %v1360_v46, %v2909_v4  ;;  %v1432_v33 = vrot.slane %v1431_v18, 1  ;;  %v1424_v15 = vadd.f32 %v1423_v45, %v1422_v56  ;;  %v1370_v54 = vadd.f32 %v1369_v21, %v1368_v17 }
 0x1f4   :  { %v1394_v62 = vrot.slane %v1393_v0, 2  ;;  %v1464_v47 = vrot.slane %v1463_v49, 4  ;;  %v1441_v5 = vrot.slane %v1440_v8, 1  ;;  %v1379_v53 = vadd.f32 %v1378_v11, %v1377_v42 }
 0x1f5   :  { %v1450_v44 = vrot.slane %v1449_v50, 1  ;;  %v1493_v22 = vsel %vm1492_vm4, %v1352_v39, %v2889_v63  ;;  %v1388_v30 = vadd.f32 %v1387_v24, %v1386_v61  ;;  %v1459_v41 = vrot.slane %v1458_v36, 1 }
 0x1f6   :  { %v1395_v14 = vadd.f32 %v1394_v62, %v1393_v0  ;;  %v1465_v48 = vadd.f32 %v1464_v47, %v1463_v49  ;;  %v2139_v4 = vunpack.c.l.bf16 %v2138_v40  ;;  %v1504_v46 = vsel %vm1490_vm3, %v1415_v58, %v1406_v26  ;;  %v2364_v26 = vld [vmem:[%s3108_s6 + $0x38] sm:$0xff]   ;;  %v2366_v62 = vld [vmem:[%s3108_s6 + $0x28] sm:$0xff]   ;;  %v2367_v47 = vld [vmem:[%s3108_s6 + $0x20] sm:$0xff]  }
 0x1f7   :  { %v1495_v43 = vsel %vm1494_vm5, %v1361_v51, %v1493_v22  ;;  %v1433_v12 = vadd.f32 %v1432_v33, %v1431_v18  ;;  %v1505_v17 = vsel %vm1492_vm4, %v1424_v15, %v1504_v46  ;;  %v1442_v56 = vadd.f32 %v1441_v5, %v1440_v8  ;;  %v2365_v51 = vld [vmem:[%s3108_s6 + $0x30] sm:$0xff]  }
 0x1f8   :  { %v1396_v60 = vrot.slane %v1395_v14, 1  ;;  %v1466_v3 = vrot.slane %v1465_v48, 2  ;;  %v1497_v9 = vsel %vm1496_vm6, %v1370_v54, %v1495_v43  ;;  %v1451_v57 = vadd.f32 %v1450_v44, %v1449_v50  ;;  %v3001_v44 = vld [vmem:[%s3112_s8] sm:$0xff] }
 0x1f9   :  { %v1499_v63 = vsel %vm1498_vm7, %v1379_v53, %v1497_v9  ;;  %v1460_v2 = vadd.f32 %v1459_v41, %v1458_v36  ;;  %v1506_v35 = vsel %vm1494_vm5, %v1433_v12, %v1505_v17  ;;  %v2140_v19 = vunpack.c.h.bf16 %v2138_v40 }
 0x1fa   :  { %v1397_v55 = vadd.f32 %v1396_v60, %v1395_v14  ;;  %v1467_v38 = vadd.f32 %v1466_v3, %v1465_v48  ;;  %v1501_v7 = vsel %vm1500_vm8, %v1388_v30, %v1499_v63  ;;  %v1507_v13 = vsel %vm1496_vm6, %v1442_v56, %v1506_v35 }
 0x1fb   :  { %v1508_v18 = vsel %vm1498_vm7, %v1451_v57, %v1507_v13  ;;  %v2396_v8 = vmov 0.0   ;;  %v1545_v48 = vrot.slane %v3001_v44, %v2484_v16  ;;  %v1551_v41 = vrot.slane %v3001_v44, %v2666_v1  ;;  %v3013_v16 = vld [vmem:[%s3109_s9] sm:$0x7] }
 0x1fc   :  { %v1468_v59 = vrot.slane %v1467_v38, 1  ;;  %v1503_v42 = vsel %vm1502_vm9, %v1397_v55, %v1501_v7  ;;  %v1509_v29 = vsel %vm1500_vm8, %v1460_v2, %v1508_v18  ;;  %2289 = vmatprep.subr.bf16.mxu0 %v2396_v8  ;;  %2297 = vmatprep.subr.bf16.mxu1 %v2396_v8  ;;  %v1558_v17 = vrot.slane %v3013_v16, %v2666_v1 }
 0x1fd   :  { %v2952_v6 = vadd.f32 %v2139_v4, %v1503_v42  ;;  %2290 = vmatpush3.bf16.msra.mxu0 %v2362_v25  ;;  %2293 = vmatprep.mubr.msk.bf16.mxu0 %vm2397_vm10, %v2396_v8  ;;  %v1691_v42 = vrot.slane %v3001_v44, %v2673_v20 }
 0x1fe   :  { %v1469_v23 = vadd.f32 %v1468_v59, %v1467_v38  ;;  %2291 = vmatprep.subr.bf16.mxu0 %v2396_v8  ;;  %2305 = vmatprep.mubr.msk.bf16.mxu1 %vm2397_vm10, %v2396_v8 }
 0x1ff   :  { %v1515_v27 = vsel %vm530_vm1, %v2952_v6, 0.0  ;;  %2298 = vmatpush3.bf16.msra.mxu1 %v2364_v26 }
 0x200   :  { %1516 = vadd.xlane.f32.xlu0 %v1515_v27  ;;  %v1510_v45 = vsel %vm1502_vm9, %v1469_v23, %v1509_v29  ;;  %2299 = vmatprep.subr.bf16.mxu1 %v2396_v8 }
 0x201   :  { %v2960_v21 = vadd.f32 %v2140_v19, %v1510_v45  ;;  %2292 = vmatpush3.bf16.msra.mxu0 %v2363_v52 }
 0x202   :  { %2309 = vmatprep.subr.bf16.mxu0 %v2396_v8 }
 0x203   :  { %v1518_v61 = vsel %vm530_vm1, %v2960_v21, 0.0  ;;  %2300 = vmatpush3.bf16.msra.mxu1 %v2365_v51 }
 0x204   :  { %1519 = vadd.xlane.f32.xlu1 %v1518_v61  ;;  %2301 = vmatprep.subr.bf16.mxu1 %v2396_v8 }
 0x207   :  { %2302 = vmatpush3.bf16.msra.mxu1 %v2366_v62 }
 0x208   :  { %2303 = vmatprep.subr.bf16.mxu1 %v2396_v8 }
 0x20b   :  { %2304 = vmatpush3.bf16.msra.mxu1 %v2367_v47 }
 0x20c   :  { %2329 = vmatprep.subr.bf16.mxu1 %v2396_v8 }
 0x289   :  { %v1517_v10 = vpop.xlane.xlu0 %1516 }
 0x28a   :  { %v1522_v32 = vmul.f32 0.03125, %v1517_v10 }
 0x28c   :  { %v1524_v11 = vsub.f32 %v2952_v6, %v1522_v32 }
 0x28d   :  { %v1520_v50 = vpop.xlane.xlu1 %1519 }
 0x28e   :  { %v1523_v0 = vmul.f32 0.03125, %v1520_v50  ;;  %v1526_v49 = vmul.f32 %v1524_v11, %v1524_v11 }
 0x290   :  { %v1525_v39 = vsub.f32 %v2960_v21, %v1523_v0  ;;  %v1528_v58 = vsel %vm530_vm1, %v1526_v49, 0.0 }
 0x291   :  { %1529 = vadd.xlane.f32.xlu0 %v1528_v58  ;;  %v2369_v58 = vld [vmem:[%s3105_s5 + $0x20] sm:$0xff]  }
 0x292   :  { %v1527_v24 = vmul.f32 %v1525_v39, %v1525_v39 }
 0x294   :  { %v1531_v36 = vsel %vm530_vm1, %v1527_v24, 0.0 }
 0x295   :  { %1532 = vadd.xlane.f32.xlu0 %v1531_v36 }
 0x31a   :  { %v1530_v40 = vpop.xlane.xlu0 %1529 }
 0x31b   :  { %v1534_v33 = vmul.f32 0.03125, %v1530_v40 }
 0x31d   :  { %v1536_v15 = vadd.f32 1e-05, %v1534_v33  ;;  %v1723_v33 = vrot.slane %v3001_v44, %v2678_v28  ;;  %v2371_v28 = vld [vmem:[%s3108_s6 + $0x50] sm:$0xff]  }
 0x31e   :  { %v1533_v54 = vpop.xlane.xlu0 %1532 }
 0x31f   :  { %2382 = vrsqrt.f32 %v1536_v15  ;;  %v1535_v5 = vmul.f32 0.03125, %v1533_v54 }
 0x321   :  { %v1537_v53 = vadd.f32 1e-05, %v1535_v5  ;;  %v1729_v5 = vrot.slane %v3001_v44, %v2683_v31  ;;  %v2372_v31 = vld [vmem:[%s3108_s6 + $0x48] sm:$0xff]  }
 0x323   :  { %2384 = vrsqrt.f32 %v1537_v53 }
 0x32c   :  { %v2383_v14 = vpop.eup %2382 }
 0x32d   :  { %v1540_v22 = vmul.f32 %v2383_v14, %v1524_v11 }
 0x32f   :  { %v1546_v4 = vmul.f32 %v1545_v48, %v1540_v22 }
 0x330   :  { %v2385_v30 = vpop.eup %2384 }
 0x331   :  { %v1541_v46 = vmul.f32 %v2385_v30, %v1525_v39  ;;  %v1552_v60 = vadd.f32 %v1551_v41, %v1546_v4  ;;  %v2368_v39 = vld [vmem:[%s3105_s5 + $0x28] sm:$0xff]  }
 0x333   :  { %v1547_v43 = vmul.f32 %v1545_v48, %v1541_v46  ;;  %v2373_v46 = vld [vmem:[%s3108_s6 + $0x40] sm:$0xff]  }
 0x335   :  { %v1553_v3 = vadd.f32 %v1551_v41, %v1547_v43  ;;  %v2370_v41 = vld [vmem:[%s3108_s6 + $0x58] sm:$0xff]   ;;  %v1736_v43 = vrot.slane %v3013_v16, %v2673_v20 }
 0x337   :  { %v1554_v12 = vpack.c.bf16 %v1553_v3, %v1552_v60 }
 0x339   :  { %2294 = vmatmul.mubr.msk.bf16.vlgmr.msra.gmra.mxu0 %vm530_vm1, %v1554_v12 }
 0x33a   :  { %2313 = vmatprep.mubr.msk.bf16.mxu0 %vm2397_vm10, %v2396_v8  ;;  %2310 = vmatpush3.bf16.msra.mxu0 %v2368_v39 }
 0x33b   :  { %2311 = vmatprep.subr.bf16.mxu0 %v2396_v8 }
 0x33e   :  { %2312 = vmatpush3.bf16.msra.mxu0 %v2369_v58 }
 0x33f   :  { %2317 = vmatprep.subr.bf16.mxu0 %v2396_v8 }
 0x3f9   :  { %v1608_v56 = vpop.f32.mrf.mxu0 }
 0x3fa   :  { %v1609_v57 = vadd.f32 %v1608_v56, %v1558_v17 }
 0x3fb   :  { %v2295_v9 = vpop.f32.mrf.mxu0 }
 0x3fc   :  { %v1615_v2 = vmax.f32 %v1609_v57, 0.0 }
 0x3fd   :  { %v1611_v55 = vpop.f32.mrf.mxu0 }
 0x3fe   :  { %v1612_v38 = vadd.f32 %v1611_v55, %v1558_v17 }
 0x3ff   :  { %v2296_v63 = vpop.f32.mrf.mxu0 }
 0x400   :  { %v1616_v7 = vmax.f32 %v1612_v38, 0.0  ;;  %v1869_v63 = vrot.slane %v3001_v44, %v2688_v34 }
 0x402   :  { %v1617_v59 = vpack.c.bf16 %v1616_v7, %v1615_v2 }
 0x404   :  { %2306 = vmatmul.mubr.msk.bf16.vlgmr.msra.gmra.mxu1 %vm812_vm2, %v1617_v59 }
 0x405   :  { %2333 = vmatprep.mubr.msk.bf16.mxu1 %vm2397_vm10, %v2396_v8 }
 0x4c4   :  { %v1679_v35 = vpop.f32.mrf.mxu1 }
 0x4c5   :  { %v1686_v1 = vadd.f32 %v1679_v35, %v2952_v6 }
 0x4c6   :  { %v2307_v19 = vpop.f32.mrf.mxu1 }
 0x4c7   :  { %v3023_v13 = vadd.f32 %v1691_v42, %v1686_v1 }
 0x4c8   :  { %v1682_v23 = vpop.f32.mrf.mxu1 }
 0x4c9   :  { %v1687_v18 = vadd.f32 %v1682_v23, %v2960_v21  ;;  %v1694_v27 = vsel %vm530_vm1, %v3023_v13, 0.0 }
 0x4ca   :  { %1695 = vadd.xlane.f32.xlu0 %v1694_v27  ;;  %v2308_v29 = vpop.f32.mrf.mxu1 }
 0x4cb   :  { %v3028_v45 = vadd.f32 %v1691_v42, %v1687_v18 }
 0x4cd   :  { %v1697_v61 = vsel %vm530_vm1, %v3028_v45, 0.0 }
 0x4ce   :  { %1698 = vadd.xlane.f32.xlu1 %v1697_v61 }
 0x553   :  { %v1696_v25 = vpop.xlane.xlu0 %1695 }
 0x554   :  { %v1700_v52 = vmul.f32 0.03125, %v1696_v25 }
 0x556   :  { %v1702_v6 = vsub.f32 %v3023_v13, %v1700_v52 }
 0x557   :  { %v1699_v10 = vpop.xlane.xlu1 %1698 }
 0x558   :  { %v1701_v32 = vmul.f32 0.03125, %v1699_v10  ;;  %v1704_v11 = vmul.f32 %v1702_v6, %v1702_v6  ;;  %v80_v10 = vld [vmem:[%s3113_s7 + $0x10] sm:$0xff] }
 0x55a   :  { %v1703_v21 = vsub.f32 %v3028_v45, %v1701_v32  ;;  %v1706_v50 = vsel %vm530_vm1, %v1704_v11, 0.0  ;;  %v81_v32 = vld [vmem:[%s3113_s7 + $0x18] sm:$0xff]  ;;  %v78_v11 = vld [vmem:[%s3113_s7] sm:$0xff] }
 0x55b   :  { %1707 = vadd.xlane.f32.xlu0 %v1706_v50  ;;  %v79_v50 = vld [vmem:[%s3113_s7 + $0x8] sm:$0xff] }
 0x55c   :  { %v1705_v0 = vmul.f32 %v1703_v21, %v1703_v21 }
 0x55e   :  { %v1709_v49 = vsel %vm530_vm1, %v1705_v0, 0.0  ;;  %v83_v0 = vpack.c.bf16 %v79_v50, %v78_v11 }
 0x55f   :  { %1710 = vadd.xlane.f32.xlu1 %v1709_v49 }
 0x5e4   :  { %v1708_v24 = vpop.xlane.xlu0 %1707 }
 0x5e5   :  { %v1712_v36 = vmul.f32 0.03125, %v1708_v24 }
 0x5e7   :  { %v1714_v26 = vadd.f32 1e-05, %v1712_v36 }
 0x5e8   :  { %v1711_v51 = vpop.xlane.xlu1 %1710 }
 0x5e9   :  { %2386 = vrsqrt.f32 %v1714_v26  ;;  %v1713_v62 = vmul.f32 0.03125, %v1711_v51  ;;  %v1901_v51 = vrot.slane %v3001_v44, %v2693_v37  ;;  %v2071_v37 = vld [vmem:[%s3113_s7 + $0x20] ss:$0 sm:$0xff] }
 0x5eb   :  { %v1715_v47 = vadd.f32 1e-05, %v1713_v62 }
 0x5ed   :  { %2388 = vrsqrt.f32 %v1715_v47 }
 0x5f6   :  { %v2387_v40 = vpop.eup %2386 }
 0x5f7   :  { %v1718_v15 = vmul.f32 %v2387_v40, %v1702_v6  ;;  %v3129_v40 = vld [vmem:[#allocation2_spill] sm:$0xff] }
 0x5f9   :  { %v1724_v14 = vmul.f32 %v1723_v33, %v1718_v15 }
 0x5fa   :  { %v2389_v54 = vpop.eup %2388 }
 0x5fb   :  { %v1719_v53 = vmul.f32 %v2389_v54, %v1703_v21  ;;  %v1730_v22 = vadd.f32 %v1729_v5, %v1724_v14  ;;  %v84_v21 = vpack.c.bf16 %v81_v32, %v80_v10 }
 0x5fd   :  { %v1725_v48 = vmul.f32 %v1723_v33, %v1719_v53  ;;  %2330 = vmatpush3.bf16.msra.mxu1 %v84_v21  ;;  %v1907_v33 = vrot.slane %v3001_v44, %v3129_v40 }
 0x5fe   :  { %2331 = vmatprep.subr.bf16.mxu1 %v2396_v8 }
 0x5ff   :  { %v1731_v30 = vadd.f32 %v1729_v5, %v1725_v48 }
 0x601   :  { %v1732_v4 = vpack.c.bf16 %v1731_v30, %v1730_v22  ;;  %2332 = vmatpush3.bf16.msra.mxu1 %v83_v0 }
 0x603   :  { %2314 = vmatmul.mubr.msk.bf16.vlgmr.msra.gmra.mxu0 %vm530_vm1, %v1732_v4 }
 0x604   :  { %2318 = vmatpush3.bf16.msra.mxu0 %v2370_v41  ;;  %2325 = vmatprep.mubr.msk.bf16.mxu0 %vm2397_vm10, %v2396_v8 }
 0x605   :  { %2319 = vmatprep.subr.bf16.mxu0 %v2396_v8 }
 0x608   :  { %2320 = vmatpush3.bf16.msra.mxu0 %v2371_v28 }
 0x609   :  { %2321 = vmatprep.subr.bf16.mxu0 %v2396_v8 }
 0x60c   :  { %2322 = vmatpush3.bf16.msra.mxu0 %v2372_v31 }
 0x60d   :  { %2323 = vmatprep.subr.bf16.mxu0 %v2396_v8 }
 0x610   :  { %2324 = vmatpush3.bf16.msra.mxu0 %v2373_v46 }
 0x6c3   :  { %v1786_v60 = vpop.f32.mrf.mxu0 }
 0x6c4   :  { %v1787_v12 = vadd.f32 %v1786_v60, %v1736_v43 }
 0x6c5   :  { %v2315_v3 = vpop.f32.mrf.mxu0 }
 0x6c6   :  { %v1793_v57 = vmax.f32 %v1787_v12, 0.0 }
 0x6c7   :  { %v1789_v17 = vpop.f32.mrf.mxu0 }
 0x6c8   :  { %v1790_v56 = vadd.f32 %v1789_v17, %v1736_v43 }
 0x6c9   :  { %v2316_v9 = vpop.f32.mrf.mxu0 }
 0x6ca   :  { %v1794_v55 = vmax.f32 %v1790_v56, 0.0 }
 0x6cc   :  { %v1795_v38 = vpack.c.bf16 %v1794_v55, %v1793_v57 }
 0x6ce   :  { %2326 = vmatmul.mubr.msk.bf16.vlgmr.msra.gmra.mxu0 %vm812_vm2, %v1795_v38 }
 0x78e   :  { %v1857_v2 = vpop.f32.mrf.mxu0 }
 0x78f   :  { %v1864_v7 = vadd.f32 %v1857_v2, %v3023_v13 }
 0x790   :  { %v2327_v59 = vpop.f32.mrf.mxu0 }
 0x791   :  { %v1870_v42 = vadd.f32 %v1869_v63, %v1864_v7 }
 0x792   :  { %v1860_v20 = vpop.f32.mrf.mxu0 }
 0x793   :  { %v1865_v16 = vadd.f32 %v1860_v20, %v3028_v45  ;;  %v1872_v35 = vsel %vm530_vm1, %v1870_v42, 0.0 }
 0x794   :  { %1873 = vadd.xlane.f32.xlu0 %v1872_v35  ;;  %v2328_v1 = vpop.f32.mrf.mxu0 }
 0x795   :  { %v1871_v19 = vadd.f32 %v1869_v63, %v1865_v16 }
 0x797   :  { %v1875_v23 = vsel %vm530_vm1, %v1871_v19, 0.0 }
 0x798   :  { %1876 = vadd.xlane.f32.xlu1 %v1875_v23 }
 0x81d   :  { %v1874_v18 = vpop.xlane.xlu0 %1873 }
 0x81e   :  { %v1878_v27 = vmul.f32 0.03125, %v1874_v18 }
 0x820   :  { %v1880_v29 = vsub.f32 %v1870_v42, %v1878_v27 }
 0x821   :  { %v1877_v34 = vpop.xlane.xlu1 %1876 }
 0x822   :  { %v1879_v61 = vmul.f32 0.03125, %v1877_v34  ;;  %v1882_v25 = vmul.f32 %v1880_v29, %v1880_v29 }
 0x824   :  { %v1881_v13 = vsub.f32 %v1871_v19, %v1879_v61  ;;  %v1884_v52 = vsel %vm530_vm1, %v1882_v25, 0.0 }
 0x825   :  { %1885 = vadd.xlane.f32.xlu0 %v1884_v52 }
 0x826   :  { %v1883_v6 = vmul.f32 %v1881_v13, %v1881_v13 }
 0x828   :  { %v1887_v45 = vsel %vm530_vm1, %v1883_v6, 0.0 }
 0x829   :  { %1888 = vadd.xlane.f32.xlu1 %v1887_v45 }
 0x8ae   :  { %v1886_v49 = vpop.xlane.xlu0 %1885 }
 0x8af   :  { %v1890_v39 = vmul.f32 0.03125, %v1886_v49 }
 0x8b1   :  { %v1892_v58 = vadd.f32 1e-05, %v1890_v39 }
 0x8b2   :  { %v1889_v24 = vpop.xlane.xlu1 %1888 }
 0x8b3   :  { %2390 = vrsqrt.f32 %v1892_v58  ;;  %v1891_v36 = vmul.f32 0.03125, %v1889_v24 }
 0x8b5   :  { %v1893_v26 = vadd.f32 1e-05, %v1891_v36 }
 0x8b7   :  { %2392 = vrsqrt.f32 %v1893_v26 }
 0x8c0   :  { %v2391_v62 = vpop.eup %2390 }
 0x8c1   :  { %v1896_v47 = vmul.f32 %v2391_v62, %v1880_v29 }
 0x8c3   :  { %v1902_v15 = vmul.f32 %v1901_v51, %v1896_v47 }
 0x8c4   :  { %v2393_v54 = vpop.eup %2392 }
 0x8c5   :  { %v1897_v8 = vmul.f32 %v2393_v54, %v1881_v13  ;;  %v1908_v53 = vadd.f32 %v1907_v33, %v1902_v15 }
 0x8c7   :  { %v1903_v5 = vmul.f32 %v1901_v51, %v1897_v8  ;;  %v1910_v48 = vmax.f32 %v1908_v53, 0.0 }
 0x8c9   :  { %v1909_v14 = vadd.f32 %v1907_v33, %v1903_v5 }
 0x8cb   :  { %v1911_v22 = vmax.f32 %v1909_v14, 0.0 }
 0x8cd   :  { %v1912_v30 = vpack.c.bf16 %v1911_v22, %v1910_v48 }
 0x8cf   :  { %2334 = vmatmul.mubr.msk.bf16.vlgmr.msra.gmra.mxu1 %vm530_vm1, %v1912_v30 }
 0x98f   :  { %v1954_v41 = vpop.f32.mrf.mxu1 }
 0x990   :  { %v1955_v4 = vadd.f32 %v2071_v37, %v1954_v41 }
 0x991   :  { %v2335_v28 = vpop.f32.mrf.mxu1 }
 0x992   :  { %1961 = vst [vmem:[%s3114_s10] sm:$0xff] %v1955_v4 }
 0x993   :  { %v1957_v44 = vpop.f32.mrf.mxu1 }
 0x994   :  { %v1958_v31 = vadd.f32 %v2071_v37, %v1957_v44 }
 0x995   :  { %v2336_v46 = vpop.f32.mrf.mxu1 }
 0x996   :  { %1962 = vst [vmem:[%s3114_s10 + $0x8] sm:$0xff] %v1958_v31 }

</bundles_post_ra>
